<compile_context>
chip_gen: v6e
topology: v6e:2x2x1
jax: 0.10.0
libtpu: 0.0.40
codegen_flags: <defaults>
</compile_context>

<pallas_src>
import functools

import jax
import jax.numpy as jnp
from jax import lax
from jax.experimental import pallas as pl
from jax.experimental.pallas import tpu as pltpu


COMPUTE_DTYPE = jnp.bfloat16      # MXU-native on v5e/v6e/v7x; accumulation stays f32.
SE_ENLARGE = 2.0


def _vmem_budget_bytes():
    # Generation-adaptive scoped-VMEM budget: ~60% of per-core VMEM, capped at 96 MiB.
    try:
        cap = pltpu.get_tpu_info().vmem_capacity_bytes
    except Exception:
        cap = 64 * 1024 * 1024
    return int(min(96 * 1024 * 1024, max(32 * 1024 * 1024, 0.6 * cap)))


VMEM_LIMIT = _vmem_budget_bytes()
# Bigger row tiles on 128 MiB parts (v5e/v6e); keep 512 on v7x (64 MiB / TC).
ROW_TILE_TARGET = 1024 if VMEM_LIMIT >= 48 * 1024 * 1024 else 512


def _round_up(n, m):
    return (n + m - 1) // m * m


def _cparams(*sem):
    return pltpu.CompilerParams(dimension_semantics=sem, vmem_limit_bytes=VMEM_LIMIT)


def _pick_tile(n, target):
    """Row tile for an n-row dim; prefer an exact divisor so no padding pass is needed."""
    if n <= target:
        return n, n
    d = target - target % 8
    while d >= 128:
        if n % d == 0:
            return d, n
        d -= 8
    return target, pl.cdiv(n, target) * target


def _pick_k2_rows(ho, wo, target=512):
    """Smallest divisor of ho giving >= target im2col rows per tile (sublane friendly)."""
    for th in range(1, ho + 1):
        if ho % th == 0 and th * wo >= target and (th * wo) % 8 == 0:
            return th
    return ho


# --------------------------- K1: bn1+relu -> conv1 -> bn2+relu (+ shortcut) ---------------

def _k1_kernel(x_ref, s1_ref, b1_ref, w1_ref, s2_ref, b2_ref, pre2_ref):
    a = jnp.maximum(x_ref[...].astype(jnp.float32) * s1_ref[...] + b1_ref[...], 0.0)
    z = jnp.dot(a.astype(w1_ref.dtype), w1_ref[...], preferred_element_type=jnp.float32)
    pre2_ref[...] = jnp.maximum(z * s2_ref[...] + b2_ref[...], 0.0).astype(pre2_ref.dtype)


def _k1_fused_sc_kernel(x_ref, s1_ref, b1_ref, w1_ref, s2_ref, b2_ref, wsc_ref,
                        pre2_ref, sc_ref):
    a = jnp.maximum(x_ref[...].astype(jnp.float32) * s1_ref[...] + b1_ref[...], 0.0)
    ab = a.astype(w1_ref.dtype)
    z = jnp.dot(ab, w1_ref[...], preferred_element_type=jnp.float32)
    pre2_ref[...] = jnp.maximum(z * s2_ref[...] + b2_ref[...], 0.0).astype(pre2_ref.dtype)
    sc_ref[...] = jnp.dot(ab, wsc_ref[...],
                          preferred_element_type=jnp.float32).astype(sc_ref.dtype)


def k1_conv1(x2d, s1, b1, w1, s2, b2, wsc=None):
    n, cin = x2d.shape
    cmid = w1.shape[1]
    tm, n_pad = _pick_tile(n, ROW_TILE_TARGET)
    if n_pad != n:
        x2d = jnp.pad(x2d, ((0, n_pad - n), (0, 0)))
    in_specs = [pl.BlockSpec((tm, cin), lambda i: (i, 0)),
                pl.BlockSpec((1, cin), lambda i: (0, 0)),
                pl.BlockSpec((1, cin), lambda i: (0, 0)),
                pl.BlockSpec((cin, cmid), lambda i: (0, 0)),
                pl.BlockSpec((1, cmid), lambda i: (0, 0)),
                pl.BlockSpec((1, cmid), lambda i: (0, 0))]
    args = [x2d, s1, b1, w1, s2, b2]
    if wsc is None:
        out_shape = jax.ShapeDtypeStruct((n_pad, cmid), x2d.dtype)
        out_specs = pl.BlockSpec((tm, cmid), lambda i: (i, 0))
        kern = _k1_kernel
    else:
        # bf16 weights keep w1/wsc VMEM residency cheap even at 2048x2048; add an
        # output-channel grid axis here if weights are ever kept in f32.
        cout = wsc.shape[1]
        in_specs.append(pl.BlockSpec((cin, cout), lambda i: (0, 0)))
        args.append(wsc)
        out_shape = (jax.ShapeDtypeStruct((n_pad, cmid), x2d.dtype),
                     jax.ShapeDtypeStruct((n_pad, cout), x2d.dtype))
        out_specs = (pl.BlockSpec((tm, cmid), lambda i: (i, 0)),
                     pl.BlockSpec((tm, cout), lambda i: (i, 0)))
        kern = _k1_fused_sc_kernel
    res = pl.pallas_call(
        kern, out_shape=out_shape, grid=(n_pad // tm,),
        in_specs=in_specs, out_specs=out_specs,
        compiler_params=_cparams("parallel"),
    )(*args)
    if wsc is None:
        return (res[:n] if n_pad != n else res), None
    pre2, sc = res
    if n_pad != n:
        pre2, sc = pre2[:n], sc[:n]
    return pre2, sc


# ------------- K2: 3x3 conv (im2col in VMEM) -> bn3+relu -> conv3 + SE pooling ------------

def _conv3x3_kernel(*refs, stride, th, wo, n_halo, cdt):
    main_ref = refs[0]
    halo_refs = refs[1:1 + n_halo]
    w2_ref, s3_ref, b3_ref, w3_ref = refs[1 + n_halo:5 + n_halo]
    o_ref, pool_ref = refs[5 + n_halo:]

    # Row window with halo: main block = th*stride rows, remaining (3-stride) rows come
    # from the single-row halo BlockSpecs.
    xwin = jnp.concatenate([main_ref[0]] + [h[0] for h in halo_refs], axis=0)

    # im2col in VMEM: one lane-dense (th*wo, 9*P) patch matrix -> single K=9P matmul.
    parts = []
    for dy in range(3):
        rows = xwin[dy:dy + (th - 1) * stride + 1:stride]                       # (th, Wp, P)
        for dx in range(3):
            parts.append(rows[:, dx:dx + (wo - 1) * stride + 1:stride, :])      # (th, wo, P)
    patches = jnp.concatenate(parts, axis=-1).reshape(th * wo, -1)

    acc = jnp.dot(patches.astype(cdt), w2_ref[...], preferred_element_type=jnp.float32)
    pre3 = jnp.maximum(acc * s3_ref[...] + b3_ref[...], 0.0)
    out3 = jnp.dot(pre3.astype(cdt), w3_ref[...], preferred_element_type=jnp.float32)

    o_ref[...] = out3[None].astype(o_ref.dtype)
    psum = jnp.sum(out3, axis=0)                                                # (C,)
    pool_ref[...] = jnp.broadcast_to(psum, (8, psum.shape[0]))[None, None].astype(pool_ref.dtype)


def conv3x3_bn_conv_pool(pre2p, w2, s3, b3, w3, *, stride, ho, wo, row_tile=None):
    B, Hp, Wp, P = pre2p.shape
    C = w3.shape[1]
    th = row_tile if row_tile is not None else _pick_k2_rows(ho, wo)
    assert ho % th == 0 and ((th * wo) % 8 == 0 or th == ho), (ho, wo, th)
    T = ho // th
    n_halo = 3 - stride                     # 2 extra rows for stride 1, 1 for stride 2
    assert 1 <= n_halo <= 2, stride

    kern = functools.partial(_conv3x3_kernel, stride=stride, th=th, wo=wo,
                             n_halo=n_halo, cdt=w2.dtype)
    in_specs = [pl.BlockSpec((1, th * stride, Wp, P), lambda b, t: (b, t, 0, 0))]
    in_specs += [pl.BlockSpec((1, 1, Wp, P),
                              lambda b, t, j=j: (b, (t + 1) * th * stride + j, 0, 0))
                 for j in range(n_halo)]
    in_specs += [pl.BlockSpec(w2.shape, lambda b, t: (0, 0)),
                 pl.BlockSpec((1, P), lambda b, t: (0, 0)),
                 pl.BlockSpec((1, P), lambda b, t: (0, 0)),
                 pl.BlockSpec((P, C), lambda b, t: (0, 0))]
    out3, pool = pl.pallas_call(
        kern,
        out_shape=(jax.ShapeDtypeStruct((B, ho * wo, C), pre2p.dtype),
                   jax.ShapeDtypeStruct((B, T, 8, C), jnp.float32)),
        grid=(B, T),
        in_specs=in_specs,
        out_specs=(pl.BlockSpec((1, th * wo, C), lambda b, t: (b, t, 0)),
                   pl.BlockSpec((1, 1, 8, C), lambda b, t: (b, t, 0, 0))),
        compiler_params=_cparams("parallel", "parallel"),
    )(*([pre2p] * (1 + n_halo) + [w2, s3, b3, w3]))
    return out3, pool


# --------------------------------- K3: SE gate (per image) --------------------------------

def _se_gate_kernel(p_ref, w1_ref, w2_ref, y_ref):
    m = p_ref[...].astype(jnp.float32)
    h = jnp.maximum(jnp.dot(m.astype(w1_ref.dtype), w1_ref[...],
                            preferred_element_type=jnp.float32), 0.0)
    y_ref[...] = jax.nn.sigmoid(
        SE_ENLARGE * jnp.dot(h.astype(w2_ref.dtype), w2_ref[...],
                             preferred_element_type=jnp.float32)).astype(y_ref.dtype)


def se_gate(pooled, w1, w2):
    B, C = pooled.shape
    R = w1.shape[1]
    return pl.pallas_call(
        _se_gate_kernel,
        out_shape=jax.ShapeDtypeStruct((B, C), jnp.float32),
        grid=(1,),
        in_specs=[pl.BlockSpec((B, C), lambda i: (0, 0)),
                  pl.BlockSpec((C, R), lambda i: (0, 0)),
                  pl.BlockSpec((R, C), lambda i: (0, 0))],
        out_specs=pl.BlockSpec((B, C), lambda i: (0, 0)),
        compiler_params=_cparams("arbitrary"),
    )(pooled, w1, w2)


# ------------------------------ K4: out = x * y + shortcut --------------------------------

def _se_residual_kernel(x_ref, y_ref, sc_ref, o_ref):
    o_ref[...] = (x_ref[...].astype(jnp.float32) * y_ref[...].astype(jnp.float32)
                  + sc_ref[...].astype(jnp.float32)).astype(o_ref.dtype)


def se_residual(x, y, sc):
    B, HW, C = x.shape
    tile, hw_pad = _pick_tile(HW, ROW_TILE_TARGET)
    if hw_pad != HW:
        x = jnp.pad(x, ((0, 0), (0, hw_pad - HW), (0, 0)))
        sc = jnp.pad(sc, ((0, 0), (0, hw_pad - HW), (0, 0)))
    out = pl.pallas_call(
        _se_residual_kernel,
        out_shape=jax.ShapeDtypeStruct((B, hw_pad, C), jnp.float32),
        grid=(B, hw_pad // tile),
        in_specs=[pl.BlockSpec((1, tile, C), lambda b, t: (b, t, 0)),
                  pl.BlockSpec((1, 1, C), lambda b, t: (b, 0, 0)),
                  pl.BlockSpec((1, tile, C), lambda b, t: (b, t, 0))],
        out_specs=pl.BlockSpec((1, tile, C), lambda b, t: (b, t, 0)),
        compiler_params=_cparams("parallel", "parallel"),
    )(x, y.reshape(B, 1, C), sc)
    return out[:, :HW] if hw_pad != HW else out


# ----------------------- shortcut conv for stride > 1 (downsample blocks) -----------------

def _shortcut_strided_kernel(x_ref, s1_ref, b1_ref, w_ref, o_ref, *, stride, ho, wo):
    x = x_ref[0]                                                  # (H, W, Cin)
    xs = x[0:(ho - 1) * stride + 1:stride, 0:(wo - 1) * stride + 1:stride, :]
    a = jnp.maximum(xs.reshape(ho * wo, -1).astype(jnp.float32) * s1_ref[...]
                    + b1_ref[...], 0.0)
    o_ref[...] = jnp.dot(a.astype(w_ref.dtype), w_ref[...],
                         preferred_element_type=jnp.float32)[None].astype(o_ref.dtype)


def shortcut_strided(xc, s1, b1, wsc, *, stride, ho, wo):
    # TODO(synk): tile this over output rows (strided row selection in the index_map)
    # instead of one whole image per grid step; only the rare stride>1 blocks use it.
    B, H, W, Cin = xc.shape
    C = wsc.shape[1]
    kern = functools.partial(_shortcut_strided_kernel, stride=stride, ho=ho, wo=wo)
    return pl.pallas_call(
        kern,
        out_shape=jax.ShapeDtypeStruct((B, ho * wo, C), xc.dtype),
        grid=(B,),
        in_specs=[pl.BlockSpec((1, H, W, Cin), lambda b: (b, 0, 0, 0)),
                  pl.BlockSpec((1, Cin), lambda b: (0, 0)),
                  pl.BlockSpec((1, Cin), lambda b: (0, 0)),
                  pl.BlockSpec((Cin, C), lambda b: (0, 0))],
        out_specs=pl.BlockSpec((1, ho * wo, C), lambda b: (b, 0, 0)),
        compiler_params=_cparams("parallel"),
    )(xc, s1, b1, wsc)


# ------------------------------------------ forward ---------------------------------------

def preact_bottleneck_forward(x_nchw, q, *, stride, cout, k2_row_tile=None):
    x = jnp.transpose(x_nchw, (0, 2, 3, 1))                       # NHWC
    B, H, W, Cin = x.shape
    cin_p, pl_p = q["w1"].shape
    cout_p = q["w3"].shape[1]
    dt = q["w1"].dtype

    xc = jnp.pad(x, ((0, 0), (0, 0), (0, 0), (0, cin_p - Cin))).astype(dt)
    x2d = xc.reshape(B * H * W, cin_p)

    Ho = (H + 2 - 3) // stride + 1
    Wo = (W + 2 - 3) // stride + 1

    need_sc = (stride != 1) or (Cin != cout)
    fuse_sc = need_sc and stride == 1

    # K1 (+ fused shortcut when stride == 1)
    pre2_flat, sc_flat = k1_conv1(x2d, q["bn1_scale"], q["bn1_shift"], q["w1"],
                                  q["bn2_scale"], q["bn2_shift"],
                                  q["w_sc"] if fuse_sc else None)
    pre2 = pre2_flat.reshape(B, H, W, pl_p)
    # TODO(synk): fold this +/-1 halo zero-pad into an in-kernel DMA instead of an XLA pass.
    pre2p = jnp.pad(pre2, ((0, 0), (1, 1), (1, 1), (0, 0)))

    # K2
    out3, pool_parts = conv3x3_bn_conv_pool(pre2p, q["w2"], q["bn3_scale"], q["bn3_shift"],
                                            q["w3"], stride=stride, ho=Ho, wo=Wo,
                                            row_tile=k2_row_tile)
    pooled = pool_parts[:, :, 0, :].sum(axis=1) * (1.0 / (Ho * Wo))     # (B, cout_p) f32

    # K3: SE gate once per image
    y = se_gate(pooled, q["se_w1"], q["se_w2"])                          # (B, cout_p) f32

    # shortcut
    if not need_sc:
        sc = xc.reshape(B, H * W, cout_p)                                # identity uses x
    elif stride == 1:
        sc = sc_flat.reshape(B, H * W, cout_p)
    else:
        sc = shortcut_strided(xc, q["bn1_scale"], q["bn1_shift"], q["w_sc"],
                              stride=stride, ho=Ho, wo=Wo)

    # K4
    out = se_residual(out3, y, sc)                                       # (B, Ho*Wo, cout_p) f32
    out = out.reshape(B, Ho, Wo, cout_p)[..., :cout]
    return jnp.transpose(out, (0, 3, 1, 2))                              # NCHW


# ------------------------------- deterministic params -------------------------------------

def init_params(key, in_planes, planes, reduction=16, expansion=4):
    Cout = expansion * planes
    ks = jax.random.split(key, 20)
    eps = 1e-5

    def folded_bn(kg, kb, km, kv, c):
        gamma = 1.0 + 0.1 * jax.random.normal(kg, (c,), jnp.float32)
        beta = 0.1 * jax.random.normal(kb, (c,), jnp.float32)
        mean = 0.1 * jax.random.normal(km, (c,), jnp.float32)
        var = jnp.abs(jax.random.normal(kv, (c,), jnp.float32)) + 0.5
        scale = gamma / jnp.sqrt(var + eps)
        shift = beta - mean * scale
        return scale[None, :], shift[None, :]

    def nrm(k, shape, fan_in):
        return jax.random.normal(k, shape, jnp.float32) * (1.0 / jnp.sqrt(fan_in))

    p = {}
    p["bn1_scale"], p["bn1_shift"] = folded_bn(ks[0], ks[1], ks[2], ks[3], in_planes)
    p["bn2_scale"], p["bn2_shift"] = folded_bn(ks[4], ks[5], ks[6], ks[7], planes)
    p["bn3_scale"], p["bn3_shift"] = folded_bn(ks[8], ks[9], ks[10], ks[11], planes)
    p["w1"] = nrm(ks[12], (in_planes, planes), in_planes)            # 1x1 conv
    p["w2"] = nrm(ks[13], (3 * 3 * planes, planes), 9 * planes)      # 3x3 conv, rows (dy,dx,cin)
    p["w3"] = nrm(ks[14], (planes, Cout), planes)                    # 1x1 conv
    p["w_sc"] = nrm(ks[15], (in_planes, Cout), in_planes)            # shortcut 1x1 conv
    p["se_w1"] = nrm(ks[16], (Cout, Cout // reduction), Cout)
    p["se_w2"] = nrm(ks[17], (Cout // reduction, Cout), Cout // reduction)
    return p


def pack_params(p, compute_dtype=COMPUTE_DTYPE):
    """Zero-pad channel dims to multiples of 128 (lane dense) and cast MXU weights.
    Zero-padding is a correctness invariant: it keeps every padded channel exactly zero
    through the whole pipeline (including the SE gate)."""
    def pad_to(a, shape):
        return jnp.pad(a, [(0, t - s) for s, t in zip(a.shape, shape)])

    cin, planes = p["w1"].shape
    cout = p["w3"].shape[1]
    red = p["se_w1"].shape[1]
    cin_p, pl_p, cout_p, red_p = (_round_up(c, 128) for c in (cin, planes, cout, red))

    q = {}
    q["bn1_scale"] = pad_to(p["bn1_scale"], (1, cin_p))
    q["bn1_shift"] = pad_to(p["bn1_shift"], (1, cin_p))
    q["bn2_scale"] = pad_to(p["bn2_scale"], (1, pl_p))
    q["bn2_shift"] = pad_to(p["bn2_shift"], (1, pl_p))
    q["bn3_scale"] = pad_to(p["bn3_scale"], (1, pl_p))
    q["bn3_shift"] = pad_to(p["bn3_shift"], (1, pl_p))
    q["w1"] = pad_to(p["w1"], (cin_p, pl_p)).astype(compute_dtype)
    w2 = p["w2"].reshape(3, 3, planes, planes)
    w2 = pad_to(w2, (3, 3, pl_p, pl_p))                              # pad cin/cout per tap
    q["w2"] = w2.reshape(9 * pl_p, pl_p).astype(compute_dtype)       # rows (dy, dx, cin)
    q["w3"] = pad_to(p["w3"], (pl_p, cout_p)).astype(compute_dtype)
    q["w_sc"] = pad_to(p["w_sc"], (cin_p, cout_p)).astype(compute_dtype)
    q["se_w1"] = pad_to(p["se_w1"], (cout_p, red_p)).astype(compute_dtype)
    q["se_w2"] = pad_to(p["se_w2"], (red_p, cout_p)).astype(compute_dtype)
    return q


# ------------------------------------- pure-JAX ref ---------------------------------------

def reference_forward(x_nchw, p, stride=1):
    x = jnp.transpose(x_nchw, (0, 2, 3, 1)).astype(jnp.float32)
    Cin = x.shape[-1]
    planes = p["w1"].shape[1]
    Cout = p["w3"].shape[1]
    dn = ("NHWC", "HWIO", "NHWC")

    def br(v, s, sh):
        return jnp.maximum(v * s.reshape(-1) + sh.reshape(-1), 0.0)

    pre1 = br(x, p["bn1_scale"], p["bn1_shift"])
    if stride != 1 or Cin != Cout:
        sc = lax.conv_general_dilated(pre1, p["w_sc"].reshape(1, 1, Cin, Cout),
                                      (stride, stride), "VALID", dimension_numbers=dn)
    else:
        sc = x
    out = lax.conv_general_dilated(pre1, p["w1"].reshape(1, 1, Cin, planes),
                                   (1, 1), "VALID", dimension_numbers=dn)
    out = br(out, p["bn2_scale"], p["bn2_shift"])
    out = lax.conv_general_dilated(out, p["w2"].reshape(3, 3, planes, planes),
                                   (stride, stride), ((1, 1), (1, 1)), dimension_numbers=dn)
    out = br(out, p["bn3_scale"], p["bn3_shift"])
    out = lax.conv_general_dilated(out, p["w3"].reshape(1, 1, planes, Cout),
                                   (1, 1), "VALID", dimension_numbers=dn)
    m = jnp.mean(out, axis=(1, 2))
    y = jax.nn.sigmoid(SE_ENLARGE * (jnp.maximum(m @ p["se_w1"], 0.0) @ p["se_w2"]))
    out = out * y[:, None, None, :] + sc
    return jnp.transpose(out, (0, 3, 1, 2))


# ------------------------------------------ main ------------------------------------------

if __name__ == "__main__":
    key = jax.random.PRNGKey(0)
    k_x, k_p = jax.random.split(key)

    B, in_planes, H, W = 2, 16, 16, 16
    planes, stride = 8, 1                   # expansion*planes = 32 != in_planes -> shortcut conv
    Cout = 4 * planes

    x = jax.random.normal(k_x, (B, in_planes, H, W), jnp.float32)   # NCHW, like PyTorch
    params = init_params(k_p, in_planes, planes)
    packed = pack_params(params)

    # k2_row_tile=4 forces 4 spatial tiles per image so the halo-stitched K2 path is tested.
    fwd = jax.jit(functools.partial(preact_bottleneck_forward, stride=stride,
                                    cout=Cout, k2_row_tile=4))
    out = jax.block_until_ready(fwd(x, packed))

    ref = reference_forward(x, params, stride=stride)
    assert out.shape == (B, Cout, H, W), out.shape
    max_err = float(jnp.max(jnp.abs(out - ref)))
    rel_err = float(jnp.linalg.norm(out - ref) / jnp.linalg.norm(ref))
    # bf16 weights/activations (f32 accumulation) -> bf16-level tolerance.
    assert max_err < 0.12 and rel_err < 2e-2, (max_err, rel_err)

    print("KERNEL_OK")
</pallas_src>

<mosaic_0001>
module attributes {stable_mosaic.version = 11 : i64} {
  func.func @_k1_fused_sc_kernel(%arg0: i32, %arg1: memref<512x128xbf16, #tpu.memory_space<vmem>>, %arg2: memref<1x128xf32, #tpu.memory_space<vmem>>, %arg3: memref<1x128xf32, #tpu.memory_space<vmem>>, %arg4: memref<128x128xbf16, #tpu.memory_space<vmem>>, %arg5: memref<1x128xf32, #tpu.memory_space<vmem>>, %arg6: memref<1x128xf32, #tpu.memory_space<vmem>>, %arg7: memref<128x128xbf16, #tpu.memory_space<vmem>>, %arg8: memref<512x128xbf16, #tpu.memory_space<vmem>>, %arg9: memref<512x128xbf16, #tpu.memory_space<vmem>>) attributes {dimension_semantics = [#tpu.dimension_semantics<parallel>], iteration_bounds = array<i64: 1>, scalar_prefetch = 0 : i64, scratch_operands = 0 : i64, tpu.core_type = #tpu.core_type<tc>, window_params = [{transform_indices = @transform_0, window_bounds = array<i64: 512, 128>}, {pipeline_mode = #tpu.pipeline_mode<synchronous>, transform_indices = @transform_1, window_bounds = array<i64: 1, 128>}, {pipeline_mode = #tpu.pipeline_mode<synchronous>, transform_indices = @transform_2, window_bounds = array<i64: 1, 128>}, {pipeline_mode = #tpu.pipeline_mode<synchronous>, transform_indices = @transform_3, window_bounds = array<i64: 128, 128>}, {pipeline_mode = #tpu.pipeline_mode<synchronous>, transform_indices = @transform_4, window_bounds = array<i64: 1, 128>}, {pipeline_mode = #tpu.pipeline_mode<synchronous>, transform_indices = @transform_5, window_bounds = array<i64: 1, 128>}, {pipeline_mode = #tpu.pipeline_mode<synchronous>, transform_indices = @transform_6, window_bounds = array<i64: 128, 128>}, {transform_indices = @transform_7, window_bounds = array<i64: 512, 128>}, {transform_indices = @transform_8, window_bounds = array<i64: 512, 128>}]} {
    %c0 = arith.constant 0 : index
    %c0_0 = arith.constant 0 : index
    %0 = vector.load %arg1[%c0, %c0_0] : memref<512x128xbf16, #tpu.memory_space<vmem>>, vector<512x128xbf16>
    %1 = arith.extf %0 : vector<512x128xbf16> to vector<512x128xf32>
    %c0_1 = arith.constant 0 : index
    %c0_2 = arith.constant 0 : index
    %2 = vector.load %arg2[%c0_1, %c0_2] : memref<1x128xf32, #tpu.memory_space<vmem>>, vector<1x128xf32>
    %3 = vector.broadcast %2 : vector<1x128xf32> to vector<512x128xf32>
    %4 = arith.mulf %1, %3 : vector<512x128xf32>
    %c0_3 = arith.constant 0 : index
    %c0_4 = arith.constant 0 : index
    %5 = vector.load %arg3[%c0_3, %c0_4] : memref<1x128xf32, #tpu.memory_space<vmem>>, vector<1x128xf32>
    %6 = vector.broadcast %5 : vector<1x128xf32> to vector<512x128xf32>
    %7 = arith.addf %4, %6 : vector<512x128xf32>
    %cst = arith.constant 0.000000e+00 : f32
    %8 = vector.broadcast %cst : f32 to vector<512x128xf32>
    %9 = arith.maximumf %7, %8 : vector<512x128xf32>
    %10 = arith.truncf %9 : vector<512x128xf32> to vector<512x128xbf16>
    %c0_5 = arith.constant 0 : index
    %c0_6 = arith.constant 0 : index
    %11 = vector.load %arg4[%c0_5, %c0_6] : memref<128x128xbf16, #tpu.memory_space<vmem>>, vector<128x128xbf16>
    %cst_7 = arith.constant dense<0.000000e+00> : vector<512x128xf32>
    %12 = tpu.matmul %10, %11, %cst_7 {dimension_numbers = #tpu.dot_dimension_numbers<[1], [0], [0], [1], [0, 0, 1, 1], [], []>} : vector<512x128xbf16>, vector<128x128xbf16>, vector<512x128xf32> -> vector<512x128xf32>
    %c0_8 = arith.constant 0 : index
    %c0_9 = arith.constant 0 : index
    %13 = vector.load %arg5[%c0_8, %c0_9] : memref<1x128xf32, #tpu.memory_space<vmem>>, vector<1x128xf32>
    %14 = vector.broadcast %13 : vector<1x128xf32> to vector<512x128xf32>
    %15 = arith.mulf %12, %14 : vector<512x128xf32>
    %c0_10 = arith.constant 0 : index
    %c0_11 = arith.constant 0 : index
    %16 = vector.load %arg6[%c0_10, %c0_11] : memref<1x128xf32, #tpu.memory_space<vmem>>, vector<1x128xf32>
    %17 = vector.broadcast %16 : vector<1x128xf32> to vector<512x128xf32>
    %18 = arith.addf %15, %17 : vector<512x128xf32>
    %cst_12 = arith.constant 0.000000e+00 : f32
    %19 = vector.broadcast %cst_12 : f32 to vector<512x128xf32>
    %20 = arith.maximumf %18, %19 : vector<512x128xf32>
    %21 = arith.truncf %20 : vector<512x128xf32> to vector<512x128xbf16>
    %c0_13 = arith.constant 0 : index
    %c0_14 = arith.constant 0 : index
    %22 = vector.load %arg8[%c0_13, %c0_14] : memref<512x128xbf16, #tpu.memory_space<vmem>>, vector<512x128xbf16>
    tpu.vector_store %arg8[%c0_13, %c0_14], %21 {strides = array<i32>} : memref<512x128xbf16, #tpu.memory_space<vmem>>, vector<512x128xbf16>,
    %c0_15 = arith.constant 0 : index
    %c0_16 = arith.constant 0 : index
    %23 = vector.load %arg7[%c0_15, %c0_16] : memref<128x128xbf16, #tpu.memory_space<vmem>>, vector<128x128xbf16>
    %cst_17 = arith.constant dense<0.000000e+00> : vector<512x128xf32>
    %24 = tpu.matmul %10, %23, %cst_17 {dimension_numbers = #tpu.dot_dimension_numbers<[1], [0], [0], [1], [0, 0, 1, 1], [], []>} : vector<512x128xbf16>, vector<128x128xbf16>, vector<512x128xf32> -> vector<512x128xf32>
    %25 = arith.truncf %24 : vector<512x128xf32> to vector<512x128xbf16>
    %c0_18 = arith.constant 0 : index
    %c0_19 = arith.constant 0 : index
    %26 = vector.load %arg9[%c0_18, %c0_19] : memref<512x128xbf16, #tpu.memory_space<vmem>>, vector<512x128xbf16>
    tpu.vector_store %arg9[%c0_18, %c0_19], %25 {strides = array<i32>} : memref<512x128xbf16, #tpu.memory_space<vmem>>, vector<512x128xbf16>,
    return
  }
  func.func @transform_0(%arg0: i32) -> (i32, i32) {
    %c0_i32 = arith.constant 0 : i32
    %c0_i32_0 = arith.constant 0 : i32
    return %arg0, %c0_i32 : i32, i32
  }
  func.func @transform_1(%arg0: i32) -> (i32, i32) {
    %c0_i32 = arith.constant 0 : i32
    %c0_i32_0 = arith.constant 0 : i32
    %c0_i32_1 = arith.constant 0 : i32
    return %c0_i32, %c0_i32_0 : i32, i32
  }
  func.func @transform_2(%arg0: i32) -> (i32, i32) {
    %c0_i32 = arith.constant 0 : i32
    %c0_i32_0 = arith.constant 0 : i32
    %c0_i32_1 = arith.constant 0 : i32
    return %c0_i32, %c0_i32_0 : i32, i32
  }
  func.func @transform_3(%arg0: i32) -> (i32, i32) {
    %c0_i32 = arith.constant 0 : i32
    %c0_i32_0 = arith.constant 0 : i32
    %c0_i32_1 = arith.constant 0 : i32
    return %c0_i32, %c0_i32_0 : i32, i32
  }
  func.func @transform_4(%arg0: i32) -> (i32, i32) {
    %c0_i32 = arith.constant 0 : i32
    %c0_i32_0 = arith.constant 0 : i32
    %c0_i32_1 = arith.constant 0 : i32
    return %c0_i32, %c0_i32_0 : i32, i32
  }
  func.func @transform_5(%arg0: i32) -> (i32, i32) {
    %c0_i32 = arith.constant 0 : i32
    %c0_i32_0 = arith.constant 0 : i32
    %c0_i32_1 = arith.constant 0 : i32
    return %c0_i32, %c0_i32_0 : i32, i32
  }
  func.func @transform_6(%arg0: i32) -> (i32, i32) {
    %c0_i32 = arith.constant 0 : i32
    %c0_i32_0 = arith.constant 0 : i32
    %c0_i32_1 = arith.constant 0 : i32
    return %c0_i32, %c0_i32_0 : i32, i32
  }
  func.func @transform_7(%arg0: i32) -> (i32, i32) {
    %c0_i32 = arith.constant 0 : i32
    %c0_i32_0 = arith.constant 0 : i32
    return %arg0, %c0_i32 : i32, i32
  }
  func.func @transform_8(%arg0: i32) -> (i32, i32) {
    %c0_i32 = arith.constant 0 : i32
    %c0_i32_0 = arith.constant 0 : i32
    return %arg0, %c0_i32 : i32, i32
  }
}

module attributes {stable_mosaic.version = 11 : i64} {
  func.func @_conv3x3_kernel(%arg0: i32, %arg1: i32, %arg2: memref<1x4x18x128xbf16, #tpu.memory_space<vmem>>, %arg3: memref<1x1x18x128xbf16, #tpu.memory_space<vmem>>, %arg4: memref<1x1x18x128xbf16, #tpu.memory_space<vmem>>, %arg5: memref<1152x128xbf16, #tpu.memory_space<vmem>>, %arg6: memref<1x128xf32, #tpu.memory_space<vmem>>, %arg7: memref<1x128xf32, #tpu.memory_space<vmem>>, %arg8: memref<128x128xbf16, #tpu.memory_space<vmem>>, %arg9: memref<1x64x128xbf16, #tpu.memory_space<vmem>>, %arg10: memref<1x1x8x128xf32, #tpu.memory_space<vmem>>) attributes {dimension_semantics = [#tpu.dimension_semantics<parallel>, #tpu.dimension_semantics<parallel>], iteration_bounds = array<i64: 2, 4>, scalar_prefetch = 0 : i64, scratch_operands = 0 : i64, tpu.core_type = #tpu.core_type<tc>, window_params = [{transform_indices = @transform_0, window_bounds = array<i64: 1, 4, 18, 128>}, {transform_indices = @transform_1, window_bounds = array<i64: 1, 1, 18, 128>}, {transform_indices = @transform_2, window_bounds = array<i64: 1, 1, 18, 128>}, {pipeline_mode = #tpu.pipeline_mode<synchronous>, transform_indices = @transform_3, window_bounds = array<i64: 1152, 128>}, {pipeline_mode = #tpu.pipeline_mode<synchronous>, transform_indices = @transform_4, window_bounds = array<i64: 1, 128>}, {pipeline_mode = #tpu.pipeline_mode<synchronous>, transform_indices = @transform_5, window_bounds = array<i64: 1, 128>}, {pipeline_mode = #tpu.pipeline_mode<synchronous>, transform_indices = @transform_6, window_bounds = array<i64: 128, 128>}, {transform_indices = @transform_7, window_bounds = array<i64: 1, 64, 128>}, {transform_indices = @transform_8, window_bounds = array<i64: 1, 1, 8, 128>}]} {
    %c0 = arith.constant 0 : index
    %c0_0 = arith.constant 0 : index
    %c0_1 = arith.constant 0 : index
    %c0_2 = arith.constant 0 : index
    %0 = vector.load %arg2[%c0, %c0_0, %c0_1, %c0_2] : memref<1x4x18x128xbf16, #tpu.memory_space<vmem>>, vector<1x4x18x128xbf16>
    %1 = vector.shape_cast %0 : vector<1x4x18x128xbf16> to vector<4x18x128xbf16>
    %c0_3 = arith.constant 0 : index
    %c0_4 = arith.constant 0 : index
    %c0_5 = arith.constant 0 : index
    %c0_6 = arith.constant 0 : index
    %2 = vector.load %arg3[%c0_3, %c0_4, %c0_5, %c0_6] : memref<1x1x18x128xbf16, #tpu.memory_space<vmem>>, vector<1x1x18x128xbf16>
    %3 = vector.shape_cast %2 : vector<1x1x18x128xbf16> to vector<1x18x128xbf16>
    %c0_7 = arith.constant 0 : index
    %c0_8 = arith.constant 0 : index
    %c0_9 = arith.constant 0 : index
    %c0_10 = arith.constant 0 : index
    %4 = vector.load %arg4[%c0_7, %c0_8, %c0_9, %c0_10] : memref<1x1x18x128xbf16, #tpu.memory_space<vmem>>, vector<1x1x18x128xbf16>
    %5 = vector.shape_cast %4 : vector<1x1x18x128xbf16> to vector<1x18x128xbf16>
    %6 = tpu.concatenate %1, %3, %5 in 0 : vector<4x18x128xbf16>, vector<1x18x128xbf16>, vector<1x18x128xbf16> -> vector<6x18x128xbf16>
    %7 = vector.extract_strided_slice %6 {offsets = [0, 0, 0], sizes = [4, 18, 128], strides = [1, 1, 1]} : vector<6x18x128xbf16> to vector<4x18x128xbf16>
    %8 = vector.extract_strided_slice %7 {offsets = [0, 0, 0], sizes = [4, 16, 128], strides = [1, 1, 1]} : vector<4x18x128xbf16> to vector<4x16x128xbf16>
    %9 = vector.extract_strided_slice %7 {offsets = [0, 1, 0], sizes = [4, 16, 128], strides = [1, 1, 1]} : vector<4x18x128xbf16> to vector<4x16x128xbf16>
    %10 = vector.extract_strided_slice %7 {offsets = [0, 2, 0], sizes = [4, 16, 128], strides = [1, 1, 1]} : vector<4x18x128xbf16> to vector<4x16x128xbf16>
    %11 = vector.extract_strided_slice %6 {offsets = [1, 0, 0], sizes = [4, 18, 128], strides = [1, 1, 1]} : vector<6x18x128xbf16> to vector<4x18x128xbf16>
    %12 = vector.extract_strided_slice %11 {offsets = [0, 0, 0], sizes = [4, 16, 128], strides = [1, 1, 1]} : vector<4x18x128xbf16> to vector<4x16x128xbf16>
    %13 = vector.extract_strided_slice %11 {offsets = [0, 1, 0], sizes = [4, 16, 128], strides = [1, 1, 1]} : vector<4x18x128xbf16> to vector<4x16x128xbf16>
    %14 = vector.extract_strided_slice %11 {offsets = [0, 2, 0], sizes = [4, 16, 128], strides = [1, 1, 1]} : vector<4x18x128xbf16> to vector<4x16x128xbf16>
    %15 = vector.extract_strided_slice %6 {offsets = [2, 0, 0], sizes = [4, 18, 128], strides = [1, 1, 1]} : vector<6x18x128xbf16> to vector<4x18x128xbf16>
    %16 = vector.extract_strided_slice %15 {offsets = [0, 0, 0], sizes = [4, 16, 128], strides = [1, 1, 1]} : vector<4x18x128xbf16> to vector<4x16x128xbf16>
    %17 = vector.extract_strided_slice %15 {offsets = [0, 1, 0], sizes = [4, 16, 128], strides = [1, 1, 1]} : vector<4x18x128xbf16> to vector<4x16x128xbf16>
    %18 = vector.extract_strided_slice %15 {offsets = [0, 2, 0], sizes = [4, 16, 128], strides = [1, 1, 1]} : vector<4x18x128xbf16> to vector<4x16x128xbf16>
    %19 = tpu.concatenate %8, %9, %10, %12, %13, %14, %16, %17, %18 in 2 : vector<4x16x128xbf16>, vector<4x16x128xbf16>, vector<4x16x128xbf16>, vector<4x16x128xbf16>, vector<4x16x128xbf16>, vector<4x16x128xbf16>, vector<4x16x128xbf16>, vector<4x16x128xbf16>, vector<4x16x128xbf16> -> vector<4x16x1152xbf16>
    %20 = vector.shape_cast %19 : vector<4x16x1152xbf16> to vector<64x1152xbf16>
    %c0_11 = arith.constant 0 : index
    %c0_12 = arith.constant 0 : index
    %21 = vector.load %arg5[%c0_11, %c0_12] : memref<1152x128xbf16, #tpu.memory_space<vmem>>, vector<1152x128xbf16>
    %cst = arith.constant dense<0.000000e+00> : vector<64x128xf32>
    %22 = tpu.matmul %20, %21, %cst {dimension_numbers = #tpu.dot_dimension_numbers<[1], [0], [0], [1], [0, 0, 1, 1], [], []>} : vector<64x1152xbf16>, vector<1152x128xbf16>, vector<64x128xf32> -> vector<64x128xf32>
    %c0_13 = arith.constant 0 : index
    %c0_14 = arith.constant 0 : index
    %23 = vector.load %arg6[%c0_13, %c0_14] : memref<1x128xf32, #tpu.memory_space<vmem>>, vector<1x128xf32>
    %24 = vector.broadcast %23 : vector<1x128xf32> to vector<64x128xf32>
    %25 = arith.mulf %22, %24 : vector<64x128xf32>
    %c0_15 = arith.constant 0 : index
    %c0_16 = arith.constant 0 : index
    %26 = vector.load %arg7[%c0_15, %c0_16] : memref<1x128xf32, #tpu.memory_space<vmem>>, vector<1x128xf32>
    %27 = vector.broadcast %26 : vector<1x128xf32> to vector<64x128xf32>
    %28 = arith.addf %25, %27 : vector<64x128xf32>
    %cst_17 = arith.constant 0.000000e+00 : f32
    %29 = vector.broadcast %cst_17 : f32 to vector<64x128xf32>
    %30 = arith.maximumf %28, %29 : vector<64x128xf32>
    %31 = arith.truncf %30 : vector<64x128xf32> to vector<64x128xbf16>
    %c0_18 = arith.constant 0 : index
    %c0_19 = arith.constant 0 : index
    %32 = vector.load %arg8[%c0_18, %c0_19] : memref<128x128xbf16, #tpu.memory_space<vmem>>, vector<128x128xbf16>
    %cst_20 = arith.constant dense<0.000000e+00> : vector<64x128xf32>
    %33 = tpu.matmul %31, %32, %cst_20 {dimension_numbers = #tpu.dot_dimension_numbers<[1], [0], [0], [1], [0, 0, 1, 1], [], []>} : vector<64x128xbf16>, vector<128x128xbf16>, vector<64x128xf32> -> vector<64x128xf32>
    %34 = vector.shape_cast %33 : vector<64x128xf32> to vector<1x64x128xf32>
    %35 = arith.truncf %34 : vector<1x64x128xf32> to vector<1x64x128xbf16>
    %c0_21 = arith.constant 0 : index
    %c0_22 = arith.constant 0 : index
    %c0_23 = arith.constant 0 : index
    %36 = vector.load %arg9[%c0_21, %c0_22, %c0_23] : memref<1x64x128xbf16, #tpu.memory_space<vmem>>, vector<1x64x128xbf16>
    tpu.vector_store %arg9[%c0_21, %c0_22, %c0_23], %35 {strides = array<i32>} : memref<1x64x128xbf16, #tpu.memory_space<vmem>>, vector<1x64x128xbf16>,
    %cst_24 = arith.constant dense<0.000000e+00> : vector<128xf32>
    %37 = vector.multi_reduction <add>, %33, %cst_24 [0] : vector<64x128xf32> to vector<128xf32>
    %38 = vector.shape_cast %37 : vector<128xf32> to vector<1x128xf32>
    %39 = vector.broadcast %38 : vector<1x128xf32> to vector<8x128xf32>
    %40 = vector.shape_cast %39 : vector<8x128xf32> to vector<1x1x8x128xf32>
    %c0_25 = arith.constant 0 : index
    %c0_26 = arith.constant 0 : index
    %c0_27 = arith.constant 0 : index
    %c0_28 = arith.constant 0 : index
    %41 = vector.load %arg10[%c0_25, %c0_26, %c0_27, %c0_28] : memref<1x1x8x128xf32, #tpu.memory_space<vmem>>, vector<1x1x8x128xf32>
    tpu.vector_store %arg10[%c0_25, %c0_26, %c0_27, %c0_28], %40 {strides = array<i32>} : memref<1x1x8x128xf32, #tpu.memory_space<vmem>>, vector<1x1x8x128xf32>,
    return
  }
  func.func @transform_0(%arg0: i32, %arg1: i32) -> (i32, i32, i32, i32) {
    %c0_i32 = arith.constant 0 : i32
    %c0_i32_0 = arith.constant 0 : i32
    %c0_i32_1 = arith.constant 0 : i32
    return %arg0, %arg1, %c0_i32, %c0_i32_0 : i32, i32, i32, i32
  }
  func.func @transform_1(%arg0: i32, %arg1: i32) -> (i32, i32, i32, i32) {
    %c1_i32 = arith.constant 1 : i32
    %0 = arith.addi %arg1, %c1_i32 : i32
    %c4_i32 = arith.constant 4 : i32
    %1 = arith.muli %0, %c4_i32 : i32
    %c1_i32_0 = arith.constant 1 : i32
    %2 = arith.muli %1, %c1_i32_0 : i32
    %c0_i32 = arith.constant 0 : i32
    %3 = arith.addi %2, %c0_i32 : i32
    %c0_i32_1 = arith.constant 0 : i32
    %c0_i32_2 = arith.constant 0 : i32
    %c0_i32_3 = arith.constant 0 : i32
    return %arg0, %3, %c0_i32_1, %c0_i32_2 : i32, i32, i32, i32
  }
  func.func @transform_2(%arg0: i32, %arg1: i32) -> (i32, i32, i32, i32) {
    %c1_i32 = arith.constant 1 : i32
    %0 = arith.addi %arg1, %c1_i32 : i32
    %c4_i32 = arith.constant 4 : i32
    %1 = arith.muli %0, %c4_i32 : i32
    %c1_i32_0 = arith.constant 1 : i32
    %2 = arith.muli %1, %c1_i32_0 : i32
    %c1_i32_1 = arith.constant 1 : i32
    %3 = arith.addi %2, %c1_i32_1 : i32
    %c0_i32 = arith.constant 0 : i32
    %c0_i32_2 = arith.constant 0 : i32
    %c0_i32_3 = arith.constant 0 : i32
    return %arg0, %3, %c0_i32, %c0_i32_2 : i32, i32, i32, i32
  }
  func.func @transform_3(%arg0: i32, %arg1: i32) -> (i32, i32) {
    %c0_i32 = arith.constant 0 : i32
    %c0_i32_0 = arith.constant 0 : i32
    %c0_i32_1 = arith.constant 0 : i32
    return %c0_i32, %c0_i32_0 : i32, i32
  }
  func.func @transform_4(%arg0: i32, %arg1: i32) -> (i32, i32) {
    %c0_i32 = arith.constant 0 : i32
    %c0_i32_0 = arith.constant 0 : i32
    %c0_i32_1 = arith.constant 0 : i32
    return %c0_i32, %c0_i32_0 : i32, i32
  }
  func.func @transform_5(%arg0: i32, %arg1: i32) -> (i32, i32) {
    %c0_i32 = arith.constant 0 : i32
    %c0_i32_0 = arith.constant 0 : i32
    %c0_i32_1 = arith.constant 0 : i32
    return %c0_i32, %c0_i32_0 : i32, i32
  }
  func.func @transform_6(%arg0: i32, %arg1: i32) -> (i32, i32) {
    %c0_i32 = arith.constant 0 : i32
    %c0_i32_0 = arith.constant 0 : i32
    %c0_i32_1 = arith.constant 0 : i32
    return %c0_i32, %c0_i32_0 : i32, i32
  }
  func.func @transform_7(%arg0: i32, %arg1: i32) -> (i32, i32, i32) {
    %c0_i32 = arith.constant 0 : i32
    %c0_i32_0 = arith.constant 0 : i32
    return %arg0, %arg1, %c0_i32 : i32, i32, i32
  }
  func.func @transform_8(%arg0: i32, %arg1: i32) -> (i32, i32, i32, i32) {
    %c0_i32 = arith.constant 0 : i32
    %c0_i32_0 = arith.constant 0 : i32
    %c0_i32_1 = arith.constant 0 : i32
    return %arg0, %arg1, %c0_i32, %c0_i32_0 : i32, i32, i32, i32
  }
}

module attributes {stable_mosaic.version = 11 : i64} {
  func.func @_se_gate_kernel(%arg0: i32, %arg1: memref<2x128xf32, #tpu.memory_space<vmem>>, %arg2: memref<128x128xbf16, #tpu.memory_space<vmem>>, %arg3: memref<128x128xbf16, #tpu.memory_space<vmem>>, %arg4: memref<2x128xf32, #tpu.memory_space<vmem>>) attributes {dimension_semantics = [#tpu.dimension_semantics<arbitrary>], iteration_bounds = array<i64: 1>, scalar_prefetch = 0 : i64, scratch_operands = 0 : i64, tpu.core_type = #tpu.core_type<tc>, window_params = [{pipeline_mode = #tpu.pipeline_mode<synchronous>, transform_indices = @transform_0, window_bounds = array<i64: 2, 128>}, {pipeline_mode = #tpu.pipeline_mode<synchronous>, transform_indices = @transform_1, window_bounds = array<i64: 128, 128>}, {pipeline_mode = #tpu.pipeline_mode<synchronous>, transform_indices = @transform_2, window_bounds = array<i64: 128, 128>}, {pipeline_mode = #tpu.pipeline_mode<synchronous>, transform_indices = @transform_3, window_bounds = array<i64: 2, 128>}]} {
    %c0 = arith.constant 0 : index
    %c0_0 = arith.constant 0 : index
    %0 = vector.load %arg1[%c0, %c0_0] : memref<2x128xf32, #tpu.memory_space<vmem>>, vector<2x128xf32>
    %1 = arith.truncf %0 : vector<2x128xf32> to vector<2x128xbf16>
    %c0_1 = arith.constant 0 : index
    %c0_2 = arith.constant 0 : index
    %2 = vector.load %arg2[%c0_1, %c0_2] : memref<128x128xbf16, #tpu.memory_space<vmem>>, vector<128x128xbf16>
    %cst = arith.constant dense<0.000000e+00> : vector<2x128xf32>
    %3 = tpu.matmul %1, %2, %cst {dimension_numbers = #tpu.dot_dimension_numbers<[1], [0], [0], [1], [0, 0, 1, 1], [], []>} : vector<2x128xbf16>, vector<128x128xbf16>, vector<2x128xf32> -> vector<2x128xf32>
    %cst_3 = arith.constant 0.000000e+00 : f32
    %4 = vector.broadcast %cst_3 : f32 to vector<2x128xf32>
    %5 = arith.maximumf %3, %4 : vector<2x128xf32>
    %6 = arith.truncf %5 : vector<2x128xf32> to vector<2x128xbf16>
    %c0_4 = arith.constant 0 : index
    %c0_5 = arith.constant 0 : index
    %7 = vector.load %arg3[%c0_4, %c0_5] : memref<128x128xbf16, #tpu.memory_space<vmem>>, vector<128x128xbf16>
    %cst_6 = arith.constant dense<0.000000e+00> : vector<2x128xf32>
    %8 = tpu.matmul %6, %7, %cst_6 {dimension_numbers = #tpu.dot_dimension_numbers<[1], [0], [0], [1], [0, 0, 1, 1], [], []>} : vector<2x128xbf16>, vector<128x128xbf16>, vector<2x128xf32> -> vector<2x128xf32>
    %cst_7 = arith.constant 2.000000e+00 : f32
    %9 = vector.broadcast %cst_7 : f32 to vector<2x128xf32>
    %10 = arith.mulf %9, %8 : vector<2x128xf32>
    %11 = arith.negf %10 : vector<2x128xf32>
    %12 = math.exp %11 : vector<2x128xf32>
    %cst_8 = arith.constant 1.000000e+00 : f32
    %13 = vector.broadcast %cst_8 : f32 to vector<2x128xf32>
    %14 = arith.addf %13, %12 : vector<2x128xf32>
    %15 = arith.divf %13, %14 : vector<2x128xf32>
    %c0_9 = arith.constant 0 : index
    %c0_10 = arith.constant 0 : index
    %16 = vector.load %arg4[%c0_9, %c0_10] : memref<2x128xf32, #tpu.memory_space<vmem>>, vector<2x128xf32>
    tpu.vector_store %arg4[%c0_9, %c0_10], %15 {strides = array<i32>} : memref<2x128xf32, #tpu.memory_space<vmem>>, vector<2x128xf32>,
    return
  }
  func.func @transform_0(%arg0: i32) -> (i32, i32) {
    %c0_i32 = arith.constant 0 : i32
    %c0_i32_0 = arith.constant 0 : i32
    %c0_i32_1 = arith.constant 0 : i32
    return %c0_i32, %c0_i32_0 : i32, i32
  }
  func.func @transform_1(%arg0: i32) -> (i32, i32) {
    %c0_i32 = arith.constant 0 : i32
    %c0_i32_0 = arith.constant 0 : i32
    %c0_i32_1 = arith.constant 0 : i32
    return %c0_i32, %c0_i32_0 : i32, i32
  }
  func.func @transform_2(%arg0: i32) -> (i32, i32) {
    %c0_i32 = arith.constant 0 : i32
    %c0_i32_0 = arith.constant 0 : i32
    %c0_i32_1 = arith.constant 0 : i32
    return %c0_i32, %c0_i32_0 : i32, i32
  }
  func.func @transform_3(%arg0: i32) -> (i32, i32) {
    %c0_i32 = arith.constant 0 : i32
    %c0_i32_0 = arith.constant 0 : i32
    %c0_i32_1 = arith.constant 0 : i32
    return %c0_i32, %c0_i32_0 : i32, i32
  }
}

module attributes {stable_mosaic.version = 11 : i64} {
  func.func @_se_residual_kernel(%arg0: i32, %arg1: i32, %arg2: memref<1x256x128xbf16, #tpu.memory_space<vmem>>, %arg3: memref<1x1x128xf32, #tpu.memory_space<vmem>>, %arg4: memref<1x256x128xbf16, #tpu.memory_space<vmem>>, %arg5: memref<1x256x128xf32, #tpu.memory_space<vmem>>) attributes {dimension_semantics = [#tpu.dimension_semantics<parallel>, #tpu.dimension_semantics<parallel>], iteration_bounds = array<i64: 2, 1>, scalar_prefetch = 0 : i64, scratch_operands = 0 : i64, tpu.core_type = #tpu.core_type<tc>, window_params = [{transform_indices = @transform_0, window_bounds = array<i64: 1, 256, 128>}, {transform_indices = @transform_1, window_bounds = array<i64: 1, 1, 128>}, {transform_indices = @transform_2, window_bounds = array<i64: 1, 256, 128>}, {transform_indices = @transform_3, window_bounds = array<i64: 1, 256, 128>}]} {
    %c0 = arith.constant 0 : index
    %c0_0 = arith.constant 0 : index
    %c0_1 = arith.constant 0 : index
    %0 = vector.load %arg2[%c0, %c0_0, %c0_1] : memref<1x256x128xbf16, #tpu.memory_space<vmem>>, vector<1x256x128xbf16>
    %1 = arith.extf %0 : vector<1x256x128xbf16> to vector<1x256x128xf32>
    %c0_2 = arith.constant 0 : index
    %c0_3 = arith.constant 0 : index
    %c0_4 = arith.constant 0 : index
    %2 = vector.load %arg3[%c0_2, %c0_3, %c0_4] : memref<1x1x128xf32, #tpu.memory_space<vmem>>, vector<1x1x128xf32>
    %3 = vector.broadcast %2 : vector<1x1x128xf32> to vector<1x256x128xf32>
    %4 = arith.mulf %1, %3 : vector<1x256x128xf32>
    %c0_5 = arith.constant 0 : index
    %c0_6 = arith.constant 0 : index
    %c0_7 = arith.constant 0 : index
    %5 = vector.load %arg4[%c0_5, %c0_6, %c0_7] : memref<1x256x128xbf16, #tpu.memory_space<vmem>>, vector<1x256x128xbf16>
    %6 = arith.extf %5 : vector<1x256x128xbf16> to vector<1x256x128xf32>
    %7 = arith.addf %4, %6 : vector<1x256x128xf32>
    %c0_8 = arith.constant 0 : index
    %c0_9 = arith.constant 0 : index
    %c0_10 = arith.constant 0 : index
    %8 = vector.load %arg5[%c0_8, %c0_9, %c0_10] : memref<1x256x128xf32, #tpu.memory_space<vmem>>, vector<1x256x128xf32>
    tpu.vector_store %arg5[%c0_8, %c0_9, %c0_10], %7 {strides = array<i32>} : memref<1x256x128xf32, #tpu.memory_space<vmem>>, vector<1x256x128xf32>,
    return
  }
  func.func @transform_0(%arg0: i32, %arg1: i32) -> (i32, i32, i32) {
    %c0_i32 = arith.constant 0 : i32
    %c0_i32_0 = arith.constant 0 : i32
    return %arg0, %arg1, %c0_i32 : i32, i32, i32
  }
  func.func @transform_1(%arg0: i32, %arg1: i32) -> (i32, i32, i32) {
    %c0_i32 = arith.constant 0 : i32
    %c0_i32_0 = arith.constant 0 : i32
    %c0_i32_1 = arith.constant 0 : i32
    return %arg0, %c0_i32, %c0_i32_0 : i32, i32, i32
  }
  func.func @transform_2(%arg0: i32, %arg1: i32) -> (i32, i32, i32) {
    %c0_i32 = arith.constant 0 : i32
    %c0_i32_0 = arith.constant 0 : i32
    return %arg0, %arg1, %c0_i32 : i32, i32, i32
  }
  func.func @transform_3(%arg0: i32, %arg1: i32) -> (i32, i32, i32) {
    %c0_i32 = arith.constant 0 : i32
    %c0_i32_0 = arith.constant 0 : i32
    return %arg0, %arg1, %c0_i32 : i32, i32, i32
  }
}

</mosaic_0001>

<bundles_post_ra>
// kernel: preact_bottleneck_forward.6
= control target key start
LH: loop header
LB: loop body
LE: loop exit
PB: predicated region body
PF: predicated region fallthrough
CT: control target
= control target key end

     0   :  { %v336_v0 = vmov 0.0   ;;  %vm337_vm0 = vmmov 0   ;;  %s412_s1 = inlined_call_operand.vmem [shape: bf16[128,128], index: 1, kind: input, shape index: {}]   ;;  %s413_s2 = inlined_call_operand.vmem [shape: bf16[128,128], index: 2, kind: input, shape index: {}]   ;;  %s414_s0 = inlined_call_operand.vmem [shape: f32[2,128], index: 0, kind: input, shape index: {}]   ;;  %s415_s3 = inlined_call_operand.vmem [shape: f32[2,128], index: 3, kind: output, shape index: {}]  }
   0x1   :  { %274 = vmatprep.subr.bf16.mxu0 %v336_v0  ;;  %v316_v1 = vld [vmem:[%s412_s1 + $0x38] sm:$0xff]   ;;  %290 = vmatprep.mubr.msk.bf16.mxu0 %vm337_vm0, %v336_v0  ;;  %v317_v2 = vld [vmem:[%s412_s1 + $0x30] sm:$0xff]   ;;  %v318_v3 = vld [vmem:[%s412_s1 + $0x28] sm:$0xff]  }
   0x2   :  { %294 = vmatprep.subr.bf16.mxu1 %v336_v0  ;;  %310 = vmatprep.mubr.msk.bf16.mxu1 %vm337_vm0, %v336_v0  ;;  %v324_v4 = vld [vmem:[%s413_s2 + $0x38] sm:$0xff]   ;;  %v319_v5 = vld [vmem:[%s412_s1 + $0x20] sm:$0xff]   ;;  %v325_v6 = vld [vmem:[%s413_s2 + $0x30] sm:$0xff]  }
   0x3   :  { %275 = vmatpush3.bf16.msra.mxu0 %v316_v1  ;;  %295 = vmatpush3.bf16.msra.mxu1 %v324_v4  ;;  %v320_v7 = vld [vmem:[%s412_s1 + $0x18] sm:$0xff]   ;;  %v326_v8 = vld [vmem:[%s413_s2 + $0x28] sm:$0xff]   ;;  %v321_v9 = vld [vmem:[%s412_s1 + $0x10] sm:$0xff]  }
   0x4   :  { %276 = vmatprep.subr.bf16.mxu0 %v336_v0  ;;  %296 = vmatprep.subr.bf16.mxu1 %v336_v0  ;;  %v327_v10 = vld [vmem:[%s413_s2 + $0x20] sm:$0xff]   ;;  %v322_v11 = vld [vmem:[%s412_s1 + $0x8] sm:$0xff]   ;;  %v328_v12 = vld [vmem:[%s413_s2 + $0x18] sm:$0xff]  }
   0x5   :  { %v323_v13 = vld [vmem:[%s412_s1] sm:$0xff]   ;;  %v329_v15 = vld [vmem:[%s413_s2 + $0x10] sm:$0xff]   ;;  %v330_v17 = vld [vmem:[%s413_s2 + $0x8] sm:$0xff]  }
   0x6   :  { %v15_v14 = vld [vmem:[%s414_s0] sm:$0x3] }
   0x7   :  { %277 = vmatpush3.bf16.msra.mxu0 %v317_v2  ;;  %297 = vmatpush3.bf16.msra.mxu1 %v325_v6  ;;  %v16_v16 = vpack.c.bf16 %v15_v14, %v15_v14  ;;  %v331_v18 = vld [vmem:[%s413_s2] sm:$0xff]  }
   0x8   :  { %278 = vmatprep.subr.bf16.mxu0 %v336_v0  ;;  %298 = vmatprep.subr.bf16.mxu1 %v336_v0 }
   0xb   :  { %279 = vmatpush3.bf16.msra.mxu0 %v318_v3  ;;  %299 = vmatpush3.bf16.msra.mxu1 %v326_v8 }
   0xc   :  { %280 = vmatprep.subr.bf16.mxu0 %v336_v0  ;;  %300 = vmatprep.subr.bf16.mxu1 %v336_v0 }
   0xf   :  { %281 = vmatpush3.bf16.msra.mxu0 %v319_v5  ;;  %301 = vmatpush3.bf16.msra.mxu1 %v327_v10 }
  0x10   :  { %282 = vmatprep.subr.bf16.mxu0 %v336_v0  ;;  %302 = vmatprep.subr.bf16.mxu1 %v336_v0 }
  0x13   :  { %283 = vmatpush3.bf16.msra.mxu0 %v320_v7  ;;  %303 = vmatpush3.bf16.msra.mxu1 %v328_v12 }
  0x14   :  { %284 = vmatprep.subr.bf16.mxu0 %v336_v0  ;;  %304 = vmatprep.subr.bf16.mxu1 %v336_v0 }
  0x17   :  { %285 = vmatpush3.bf16.msra.mxu0 %v321_v9  ;;  %305 = vmatpush3.bf16.msra.mxu1 %v329_v15 }
  0x18   :  { %286 = vmatprep.subr.bf16.mxu0 %v336_v0  ;;  %306 = vmatprep.subr.bf16.mxu1 %v336_v0 }
  0x1b   :  { %287 = vmatpush3.bf16.msra.mxu0 %v322_v11  ;;  %307 = vmatpush3.bf16.msra.mxu1 %v330_v17 }
  0x1c   :  { %288 = vmatprep.subr.bf16.mxu0 %v336_v0  ;;  %308 = vmatprep.subr.bf16.mxu1 %v336_v0 }
  0x1f   :  { %289 = vmatpush3.bf16.msra.mxu0 %v323_v13  ;;  %309 = vmatpush3.bf16.msra.mxu1 %v331_v18 }
  0x22   :  { %291 = vmatmul.mubr.bf16.vlgmr.msra.gmra.mxu0 %v16_v16 }
  0xe2   :  { %v115_v19 = vpop.f32.mrf.mxu0 }
  0xe3   :  { %v121_v20 = vmax.f32 %v115_v19, 0.0 }
  0xe4   :  { %v292_v21 = vpop.f32.mrf.mxu0 }
  0xe5   :  { %v122_v22 = vpack.c.bf16 %v121_v20, %v121_v20 }
  0xe6   :  { %v118_v23 = vpop.f32.mrf.mxu0 }
  0xe7   :  { %311 = vmatmul.mubr.bf16.vlgmr.msra.gmra.mxu1 %v122_v22 }
  0xe8   :  { %v293_v24 = vpop.f32.mrf.mxu0 }
 0x1a7   :  { %v221_v25 = vpop.f32.mrf.mxu1 }
 0x1a8   :  { %v255_v26 = vmul.f32 -2.0, %v221_v25 }
 0x1a9   :  { %v312_v27 = vpop.f32.mrf.mxu1 }
 0x1aa   :  { %v229_v28 = vmul.f32 1.442695, %v255_v26 }
 0x1ab   :  { %v224_v29 = vpop.f32.mrf.mxu1 }
 0x1ac   :  { %332 = vpow2.f32 %v229_v28 }
 0x1ad   :  { %v313_v30 = vpop.f32.mrf.mxu1 }
 0x1b9   :  { %v333_v31 = vpop.eup %332 }
 0x1ba   :  { %v231_v32 = vadd.f32 1.0, %v333_v31 }
 0x1bc   :  { %334 = vrcp.f32 %v231_v32 }
 0x1c9   :  { %v335_v33 = vpop.eup %334 }
 0x1ca   :  { %234 = vst [vmem:[%s415_s3] sm:$0x3] %v335_v33 }

// kernel: preact_bottleneck_forward.4
= control target key start
LH: loop header
LB: loop body
LE: loop exit
PB: predicated region body
PF: predicated region fallthrough
CT: control target
= control target key end

     0   :  { %s3685_s3 = inlined_call_operand.vmem [shape: bf16[128,128], index: 3, kind: input, shape index: {}]   ;;  %s3686_s6 = inlined_call_operand.vmem [shape: bf16[128,128], index: 6, kind: input, shape index: {}]   ;;  %s3687_s0 = inlined_call_operand.vmem [shape: bf16[512,128], index: 0, kind: input, shape index: {}]   ;;  %s3688_s1 = inlined_call_operand.vmem [shape: f32[1,128], index: 1, kind: input, shape index: {}]   ;;  %s3689_s2 = inlined_call_operand.vmem [shape: f32[1,128], index: 2, kind: input, shape index: {}]   ;;  %s3690_s4 = inlined_call_operand.vmem [shape: f32[1,128], index: 4, kind: input, shape index: {}]   ;;  %s3691_s5 = inlined_call_operand.vmem [shape: f32[1,128], index: 5, kind: input, shape index: {}]   ;;  %s3692_s8 = inlined_call_operand.vmem [shape: bf16[512,128], index: 8, kind: output, shape index: {1}]   ;;  %s3693_s7 = inlined_call_operand.vmem [shape: bf16[512,128], index: 7, kind: output, shape index: {0}]  }
   0x1   :  { %v3012_v0 = vld [vmem:[%s3685_s3 + $0x38] sm:$0xff]   ;;  %v3014_v2 = vld [vmem:[%s3685_s3 + $0x30] sm:$0xff]   ;;  %v3016_v4 = vld [vmem:[%s3685_s3 + $0x28] sm:$0xff]  }
   0x2   :  { %v3013_v1 = vld [vmem:[%s3686_s6 + $0x38] sm:$0xff]   ;;  %2852 = vmatprep.subr.bf16.mxu0 %v3012_v0  ;;  %v3015_v3 = vld [vmem:[%s3686_s6 + $0x30] sm:$0xff]   ;;  %v3017_v5 = vld [vmem:[%s3686_s6 + $0x28] sm:$0xff]  }
   0x3   :  { %2932 = vmatprep.subr.bf16.mxu1 %v3013_v1  ;;  %2853 = vmatpush3.bf16.msra.mxu0 %v3012_v0  ;;  %v3018_v6 = vld [vmem:[%s3685_s3 + $0x20] sm:$0xff]   ;;  %v3020_v8 = vld [vmem:[%s3685_s3 + $0x18] sm:$0xff]   ;;  %v3022_v10 = vld [vmem:[%s3685_s3 + $0x10] sm:$0xff]  }
   0x4   :  { %2933 = vmatpush3.bf16.msra.mxu1 %v3013_v1  ;;  %2854 = vmatprep.subr.bf16.mxu0 %v3014_v2  ;;  %v3019_v7 = vld [vmem:[%s3686_s6 + $0x20] sm:$0xff]   ;;  %v3021_v9 = vld [vmem:[%s3686_s6 + $0x18] sm:$0xff]   ;;  %v3023_v11 = vld [vmem:[%s3686_s6 + $0x10] sm:$0xff]  }
   0x5   :  { %2934 = vmatprep.subr.bf16.mxu1 %v3015_v3  ;;  %v2232_v12 = vld [vmem:[%s3687_s0] sm:$0xff]   ;;  %v2679_v16 = vld [vmem:[%s3687_s0 + $0x8] sm:$0xff]   ;;  %v2680_v17 = vld [vmem:[%s3687_s0 + $0x10] sm:$0xff]  }
   0x6   :  { %v3115_v13 = vld [vmem:[%s3688_s1] ss:$0 sm:$0xff]  ;;  %v2233_v14 = vunpack.c.l.bf16 %v2232_v12  ;;  %v2234_v15 = vunpack.c.h.bf16 %v2232_v12  ;;  %v2681_v18 = vld [vmem:[%s3687_s0 + $0x18] sm:$0xff]   ;;  %v2237_v20 = vunpack.c.l.bf16 %v2679_v16  ;;  %v2238_v21 = vunpack.c.h.bf16 %v2679_v16  ;;  %v3024_v28 = vld [vmem:[%s3685_s3 + $0x8] sm:$0xff]  }
   0x7   :  { %2855 = vmatpush3.bf16.msra.mxu0 %v3014_v2  ;;  %v3129_v19 = vld [vmem:[%s3689_s2] ss:$0 sm:$0xff]  ;;  %v2241_v22 = vunpack.c.l.bf16 %v2680_v17  ;;  %v2242_v23 = vunpack.c.h.bf16 %v2680_v17  ;;  %v2245_v26 = vunpack.c.l.bf16 %v2681_v18  ;;  %v2246_v32 = vunpack.c.h.bf16 %v2681_v18  ;;  %v3025_v33 = vld [vmem:[%s3686_s6 + $0x8] sm:$0xff]   ;;  %v2684_v57 = vld [vmem:[%s3687_s0 + $0x30] sm:$0xff]  }
   0x8   :  { %2935 = vmatpush3.bf16.msra.mxu1 %v3015_v3  ;;  %2856 = vmatprep.subr.bf16.mxu0 %v3016_v4  ;;  %v164_v24 = vmul.f32 %v2233_v14, %v3115_v13  ;;  %v165_v25 = vmul.f32 %v2234_v15, %v3115_v13  ;;  %v2682_v27 = vld [vmem:[%s3687_s0 + $0x20] sm:$0xff]   ;;  %v166_v29 = vmul.f32 %v2237_v20, %v3115_v13  ;;  %v2683_v56 = vld [vmem:[%s3687_s0 + $0x28] sm:$0xff]   ;;  %v2257_v63 = vunpack.c.l.bf16 %v2684_v57 }
   0x9   :  { %2936 = vmatprep.subr.bf16.mxu1 %v3017_v5  ;;  %v167_v30 = vmul.f32 %v2238_v21, %v3115_v13  ;;  %v168_v31 = vmul.f32 %v2241_v22, %v3115_v13  ;;  %v169_v36 = vmul.f32 %v2242_v23, %v3115_v13  ;;  %v2249_v39 = vunpack.c.l.bf16 %v2682_v27  ;;  %v3026_v44 = vld [vmem:[%s3685_s3] sm:$0xff]  }
   0xa   :  { %v235_v34 = vadd.f32 %v3129_v19, %v164_v24  ;;  %v236_v35 = vadd.f32 %v3129_v19, %v165_v25  ;;  %v237_v37 = vadd.f32 %v3129_v19, %v166_v29  ;;  %v170_v45 = vmul.f32 %v2245_v26, %v3115_v13  ;;  %v3027_v47 = vld [vmem:[%s3686_s6] sm:$0xff]  }
   0xb   :  { %2857 = vmatpush3.bf16.msra.mxu0 %v3016_v4  ;;  %v238_v38 = vadd.f32 %v3129_v19, %v167_v30  ;;  %v239_v42 = vadd.f32 %v3129_v19, %v168_v31  ;;  %v240_v43 = vadd.f32 %v3129_v19, %v169_v36  ;;  %v171_v46 = vmul.f32 %v2246_v32, %v3115_v13  ;;  %v2686_v14 = vld [vmem:[%s3687_s0 + $0x40] sm:$0xff]  }
   0xc   :  { %2937 = vmatpush3.bf16.msra.mxu1 %v3017_v5  ;;  %2858 = vmatprep.subr.bf16.mxu0 %v3018_v6  ;;  %v299_v40 = vmax.f32 %v235_v34, 0.0  ;;  %v300_v41 = vmax.f32 %v236_v35, 0.0  ;;  %v301_v49 = vmax.f32 %v237_v37, 0.0  ;;  %v2250_v51 = vunpack.c.h.bf16 %v2682_v27  ;;  %v2687_v34 = vld [vmem:[%s3687_s0 + $0x48] sm:$0xff]   ;;  %v2688_v35 = vld [vmem:[%s3687_s0 + $0x50] sm:$0xff]  }
   0xd   :  { %2938 = vmatprep.subr.bf16.mxu1 %v3019_v7  ;;  %v302_v50 = vmax.f32 %v238_v38, 0.0  ;;  %v303_v52 = vmax.f32 %v239_v42, 0.0  ;;  %v304_v53 = vmax.f32 %v240_v43, 0.0  ;;  %v172_v54 = vmul.f32 %v2249_v39, %v3115_v13 }
   0xe   :  { %v363_v48 = vpack.c.bf16 %v300_v41, %v299_v40  ;;  %v173_v55 = vmul.f32 %v2250_v51, %v3115_v13  ;;  %v241_v59 = vadd.f32 %v3129_v19, %v170_v45  ;;  %v242_v60 = vadd.f32 %v3129_v19, %v171_v46 }
   0xf   :  { %2859 = vmatpush3.bf16.msra.mxu0 %v3018_v6  ;;  %v364_v58 = vpack.c.bf16 %v302_v50, %v301_v49  ;;  %v2253_v61 = vunpack.c.l.bf16 %v2683_v56  ;;  %v2254_v62 = vunpack.c.h.bf16 %v2683_v56  ;;  %v2258_v0 = vunpack.c.h.bf16 %v2684_v57  ;;  %v2689_v50 = vld [vmem:[%s3687_s0 + $0x58] sm:$0xff]  }
  0x10   :  { %2939 = vmatpush3.bf16.msra.mxu1 %v3019_v7  ;;  %2860 = vmatprep.subr.bf16.mxu0 %v3020_v8  ;;  %v365_v1 = vpack.c.bf16 %v304_v53, %v303_v52  ;;  %v243_v2 = vadd.f32 %v3129_v19, %v172_v54  ;;  %v244_v3 = vadd.f32 %v3129_v19, %v173_v55  ;;  %v305_v4 = vmax.f32 %v241_v59, 0.0  ;;  %v2690_v55 = vld [vmem:[%s3687_s0 + $0x60] sm:$0xff]  }
  0x11   :  { %2940 = vmatprep.subr.bf16.mxu1 %v3021_v9  ;;  %2868 = vmatprep.mubr.bf16.mxu0 %v363_v48  ;;  %v306_v5 = vmax.f32 %v242_v60, 0.0  ;;  %v174_v6 = vmul.f32 %v2253_v61, %v3115_v13  ;;  %v175_v7 = vmul.f32 %v2254_v62, %v3115_v13  ;;  %v2265_v24 = vunpack.c.l.bf16 %v2686_v14 }
  0x12   :  { %2948 = vmatprep.mubr.bf16.mxu1 %v363_v48  ;;  %v308_v12 = vmax.f32 %v244_v3, 0.0  ;;  %v2266_v25 = vunpack.c.h.bf16 %v2686_v14  ;;  %v2269_v40 = vunpack.c.l.bf16 %v2687_v34  ;;  %v2270_v41 = vunpack.c.h.bf16 %v2687_v34 }
  0x13   :  { %2861 = vmatpush3.bf16.msra.mxu0 %v3020_v8  ;;  %v176_v8 = vmul.f32 %v2257_v63, %v3115_v13  ;;  %v366_v15 = vpack.c.bf16 %v306_v5, %v305_v4  ;;  %v245_v18 = vadd.f32 %v3129_v19, %v174_v6  ;;  %v246_v20 = vadd.f32 %v3129_v19, %v175_v7 }
  0x14   :  { %2941 = vmatpush3.bf16.msra.mxu1 %v3021_v9  ;;  %2862 = vmatprep.subr.bf16.mxu0 %v3022_v10  ;;  %v177_v9 = vmul.f32 %v2258_v0, %v3115_v13  ;;  %v180_v32 = vmul.f32 %v2265_v24, %v3115_v13  ;;  %v2274_v45 = vunpack.c.h.bf16 %v2688_v35  ;;  %v182_v48 = vmul.f32 %v2269_v40, %v3115_v13 }
  0x15   :  { %2942 = vmatprep.subr.bf16.mxu1 %v3023_v11  ;;  %v247_v21 = vadd.f32 %v3129_v19, %v176_v8  ;;  %v310_v29 = vmax.f32 %v246_v20, 0.0  ;;  %v183_v49 = vmul.f32 %v2270_v41, %v3115_v13  ;;  %v2277_v56 = vunpack.c.l.bf16 %v2689_v50 }
  0x16   :  { %v248_v22 = vadd.f32 %v3129_v19, %v177_v9  ;;  %v251_v42 = vadd.f32 %v3129_v19, %v180_v32  ;;  %v185_v54 = vmul.f32 %v2274_v45, %v3115_v13  ;;  %v2278_v57 = vunpack.c.h.bf16 %v2689_v50 }
  0x17   :  { %2863 = vmatpush3.bf16.msra.mxu0 %v3022_v10  ;;  %v2685_v10 = vld [vmem:[%s3687_s0 + $0x38] sm:$0xff]   ;;  %v311_v30 = vmax.f32 %v247_v21, 0.0  ;;  %v253_v59 = vadd.f32 %v3129_v19, %v182_v48  ;;  %v254_v60 = vadd.f32 %v3129_v19, %v183_v49  ;;  %v2281_v61 = vunpack.c.l.bf16 %v2690_v55  ;;  %v2695_v48 = vld [vmem:[%s3687_s0 + $0x88] sm:$0xff]  }
  0x18   :  { %2943 = vmatpush3.bf16.msra.mxu1 %v3023_v11  ;;  %2864 = vmatprep.subr.bf16.mxu0 %v3024_v28  ;;  %v307_v11 = vmax.f32 %v243_v2, 0.0  ;;  %v2261_v16 = vunpack.c.l.bf16 %v2685_v10  ;;  %v2262_v17 = vunpack.c.h.bf16 %v2685_v10  ;;  %v312_v31 = vmax.f32 %v248_v22, 0.0  ;;  %v2691_v10 = vld [vmem:[%s3687_s0 + $0x68] sm:$0xff]  }
  0x19   :  { %2944 = vmatprep.subr.bf16.mxu1 %v3025_v33  ;;  %v315_v51 = vmax.f32 %v251_v42, 0.0  ;;  %v256_v0 = vadd.f32 %v3129_v19, %v185_v54  ;;  %v186_v2 = vmul.f32 %v2277_v56, %v3115_v13  ;;  %v187_v3 = vmul.f32 %v2278_v57, %v3115_v13 }
  0x1a   :  { %v367_v23 = vpack.c.bf16 %v308_v12, %v307_v11  ;;  %v178_v26 = vmul.f32 %v2261_v16, %v3115_v13  ;;  %v179_v27 = vmul.f32 %v2262_v17, %v3115_v13  ;;  %v369_v39 = vpack.c.bf16 %v312_v31, %v311_v30  ;;  %v2692_v11 = vld [vmem:[%s3687_s0 + $0x70] sm:$0xff]  }
  0x1b   :  { %2865 = vmatpush3.bf16.msra.mxu0 %v3024_v28  ;;  %v309_v28 = vmax.f32 %v245_v18, 0.0  ;;  %v317_v4 = vmax.f32 %v253_v59, 0.0  ;;  %v318_v5 = vmax.f32 %v254_v60, 0.0  ;;  %v320_v7 = vmax.f32 %v256_v0, 0.0 }
  0x1c   :  { %2945 = vmatpush3.bf16.msra.mxu1 %v3025_v33  ;;  %2866 = vmatprep.subr.bf16.mxu0 %v3026_v44  ;;  %v181_v33 = vmul.f32 %v2266_v25, %v3115_v13  ;;  %v249_v36 = vadd.f32 %v3129_v19, %v178_v26  ;;  %v250_v37 = vadd.f32 %v3129_v19, %v179_v27  ;;  %v2285_v16 = vunpack.c.l.bf16 %v2691_v10 }
  0x1d   :  { %2946 = vmatprep.subr.bf16.mxu1 %v3027_v47  ;;  %v368_v38 = vpack.c.bf16 %v310_v29, %v309_v28  ;;  %v188_v8 = vmul.f32 %v2281_v61, %v3115_v13  ;;  %v257_v12 = vadd.f32 %v3129_v19, %v186_v2  ;;  %v258_v14 = vadd.f32 %v3129_v19, %v187_v3  ;;  %v2693_v29 = vld [vmem:[%s3687_s0 + $0x78] sm:$0xff]  }
  0x1e   :  { %v252_v43 = vadd.f32 %v3129_v19, %v181_v33  ;;  %v313_v46 = vmax.f32 %v249_v36, 0.0  ;;  %v2286_v17 = vunpack.c.h.bf16 %v2691_v10  ;;  %v2289_v18 = vunpack.c.l.bf16 %v2692_v11  ;;  %v2694_v33 = vld [vmem:[%s3687_s0 + $0x80] sm:$0xff]  }
  0x1f   :  { %2867 = vmatpush3.bf16.msra.mxu0 %v3026_v44  ;;  %v2273_v44 = vunpack.c.l.bf16 %v2688_v35  ;;  %v259_v21 = vadd.f32 %v3129_v19, %v188_v8  ;;  %v321_v24 = vmax.f32 %v257_v12, 0.0  ;;  %v322_v25 = vmax.f32 %v258_v14, 0.0 }
  0x20   :  { %2947 = vmatpush3.bf16.msra.mxu1 %v3027_v47  ;;  %v314_v47 = vmax.f32 %v250_v37, 0.0  ;;  %v316_v52 = vmax.f32 %v252_v43, 0.0  ;;  %v190_v26 = vmul.f32 %v2285_v16, %v3115_v13  ;;  %v191_v27 = vmul.f32 %v2286_v17, %v3115_v13 }
  0x21   :  { %v184_v53 = vmul.f32 %v2273_v44, %v3115_v13  ;;  %v192_v28 = vmul.f32 %v2289_v18, %v3115_v13  ;;  %v323_v30 = vmax.f32 %v259_v21, 0.0  ;;  %v374_v34 = vpack.c.bf16 %v322_v25, %v321_v24 }
  0x22   :  { %2869 = vmatmul.mubr.bf16.vlgmr.msra.gmra.mxu0 %v364_v58  ;;  %v371_v62 = vpack.c.bf16 %v316_v52, %v315_v51  ;;  %v2293_v35 = vunpack.c.l.bf16 %v2693_v29  ;;  %v261_v36 = vadd.f32 %v3129_v19, %v190_v26  ;;  %v262_v37 = vadd.f32 %v3129_v19, %v191_v27  ;;  %v2699_v26 = vld [vmem:[%s3687_s0 + $0xa8] sm:$0xff]  }
  0x23   :  { %2949 = vmatmul.mubr.bf16.vlgmr.msra.gmra.mxu1 %v364_v58  ;;  %2872 = vmatprep.mubr.bf16.mxu0 %v365_v1  ;;  %v370_v58 = vpack.c.bf16 %v314_v47, %v313_v46  ;;  %v255_v63 = vadd.f32 %v3129_v19, %v184_v53  ;;  %v2297_v42 = vunpack.c.l.bf16 %v2694_v33  ;;  %v2298_v43 = vunpack.c.h.bf16 %v2694_v33  ;;  %v2696_v53 = vld [vmem:[%s3687_s0 + $0x90] sm:$0xff]  }
  0x24   :  { %2952 = vmatprep.mubr.bf16.mxu1 %v365_v1  ;;  %v2282_v1 = vunpack.c.h.bf16 %v2690_v55  ;;  %v194_v44 = vmul.f32 %v2293_v35, %v3115_v13  ;;  %v325_v45 = vmax.f32 %v261_v36, 0.0  ;;  %v326_v46 = vmax.f32 %v262_v37, 0.0 }
  0x25   :  { %v319_v6 = vmax.f32 %v255_v63, 0.0  ;;  %v196_v51 = vmul.f32 %v2297_v42, %v3115_v13  ;;  %v197_v52 = vmul.f32 %v2298_v43, %v3115_v13  ;;  %v2301_v55 = vunpack.c.l.bf16 %v2695_v48 }
  0x26   :  { %v189_v9 = vmul.f32 %v2282_v1, %v3115_v13  ;;  %v265_v54 = vadd.f32 %v3129_v19, %v194_v44  ;;  %v376_v56 = vpack.c.bf16 %v326_v46, %v325_v45  ;;  %v2305_v59 = vunpack.c.l.bf16 %v2696_v53 }
  0x27   :  { %v373_v20 = vpack.c.bf16 %v320_v7, %v319_v6  ;;  %v267_v61 = vadd.f32 %v3129_v19, %v196_v51  ;;  %v2306_v63 = vunpack.c.h.bf16 %v2696_v53  ;;  %v198_v2 = vmul.f32 %v2301_v55, %v3115_v13  ;;  %v2702_v51 = vld [vmem:[%s3687_s0 + $0xc0] sm:$0xff]  }
  0x28   :  { %v260_v22 = vadd.f32 %v3129_v19, %v189_v9  ;;  %v329_v0 = vmax.f32 %v265_v54, 0.0  ;;  %v2698_v9 = vld [vmem:[%s3687_s0 + $0xa0] sm:$0xff]   ;;  %v2318_v36 = vunpack.c.h.bf16 %v2699_v26 }
  0x29   :  { %v331_v6 = vmax.f32 %v267_v61, 0.0  ;;  %v201_v8 = vmul.f32 %v2306_v63, %v3115_v13  ;;  %v269_v14 = vadd.f32 %v3129_v19, %v198_v2  ;;  %v2314_v21 = vunpack.c.h.bf16 %v2698_v9 }
  0x2a   :  { %2873 = vmatmul.mubr.bf16.gmra.mxu0 %v366_v15  ;;  %v324_v31 = vmax.f32 %v260_v22, 0.0  ;;  %v207_v45 = vmul.f32 %v2318_v36, %v3115_v13  ;;  %v2330_v61 = vunpack.c.h.bf16 %v2702_v51 }
  0x2b   :  { %2953 = vmatmul.mubr.bf16.gmra.mxu1 %v366_v15  ;;  %2876 = vmatprep.mubr.bf16.mxu0 %v367_v23  ;;  %v372_v15 = vpack.c.bf16 %v318_v5, %v317_v4  ;;  %v200_v4 = vmul.f32 %v2305_v59, %v3115_v13  ;;  %v2697_v5 = vld [vmem:[%s3687_s0 + $0x98] sm:$0xff]   ;;  %v272_v18 = vadd.f32 %v3129_v19, %v201_v8  ;;  %v333_v24 = vmax.f32 %v269_v14, 0.0 }
  0x2c   :  { %2956 = vmatprep.mubr.bf16.mxu1 %v367_v23  ;;  %v2290_v23 = vunpack.c.h.bf16 %v2692_v11  ;;  %v375_v40 = vpack.c.bf16 %v324_v31, %v323_v30  ;;  %v2309_v10 = vunpack.c.l.bf16 %v2697_v5  ;;  %v2310_v11 = vunpack.c.h.bf16 %v2697_v5  ;;  %v2700_v31 = vld [vmem:[%s3687_s0 + $0xb0] sm:$0xff]  }
  0x2d   :  { %v271_v16 = vadd.f32 %v3129_v19, %v200_v4  ;;  %v205_v30 = vmul.f32 %v2314_v21, %v3115_v13  ;;  %v2321_v37 = vunpack.c.l.bf16 %v2700_v31  ;;  %v278_v55 = vadd.f32 %v3129_v19, %v207_v45  ;;  %v2703_v4 = vld [vmem:[%s3687_s0 + $0xc8] sm:$0xff]  }
  0x2e   :  { %v193_v32 = vmul.f32 %v2290_v23, %v3115_v13  ;;  %v202_v22 = vmul.f32 %v2309_v10, %v3115_v13  ;;  %v203_v23 = vmul.f32 %v2310_v11, %v3115_v13  ;;  %v2334_v14 = vunpack.c.h.bf16 %v2703_v4 }
  0x2f   :  { %v335_v27 = vmax.f32 %v271_v16, 0.0  ;;  %v208_v46 = vmul.f32 %v2321_v37, %v3115_v13 }
  0x30   :  { %v264_v41 = vadd.f32 %v3129_v19, %v193_v32  ;;  %v273_v32 = vadd.f32 %v3129_v19, %v202_v22  ;;  %v274_v33 = vadd.f32 %v3129_v19, %v203_v23  ;;  %v215_v23 = vmul.f32 %v2334_v14, %v3115_v13 }
  0x32   :  { %2877 = vmatmul.mubr.bf16.gmra.mxu0 %v368_v38  ;;  %v328_v50 = vmax.f32 %v264_v41, 0.0  ;;  %v276_v41 = vadd.f32 %v3129_v19, %v205_v30  ;;  %v337_v42 = vmax.f32 %v273_v32, 0.0  ;;  %v338_v43 = vmax.f32 %v274_v33, 0.0 }
  0x33   :  { %2957 = vmatmul.mubr.bf16.gmra.mxu1 %v368_v38  ;;  %2880 = vmatprep.mubr.bf16.mxu0 %v369_v39  ;;  %v263_v38 = vadd.f32 %v3129_v19, %v192_v28  ;;  %v336_v28 = vmax.f32 %v272_v18, 0.0 }
  0x34   :  { %2960 = vmatprep.mubr.bf16.mxu1 %v369_v39  ;;  %v2294_v39 = vunpack.c.h.bf16 %v2693_v29 }
  0x35   :  { %v327_v49 = vmax.f32 %v263_v38, 0.0  ;;  %v2322_v38 = vunpack.c.h.bf16 %v2700_v31 }
  0x36   :  { %v195_v47 = vmul.f32 %v2294_v39, %v3115_v13  ;;  %v381_v39 = vpack.c.bf16 %v336_v28, %v335_v27 }
  0x37   :  { %v377_v60 = vpack.c.bf16 %v328_v50, %v327_v49  ;;  %v340_v50 = vmax.f32 %v276_v41, 0.0 }
  0x38   :  { %v266_v57 = vadd.f32 %v3129_v19, %v195_v47  ;;  %v209_v47 = vmul.f32 %v2322_v38, %v3115_v13 }
  0x3a   :  { %2881 = vmatmul.mubr.bf16.gmra.mxu0 %v370_v58  ;;  %v330_v1 = vmax.f32 %v266_v57, 0.0  ;;  %v280_v57 = vadd.f32 %v3129_v19, %v209_v47 }
  0x3b   :  { %2961 = vmatmul.mubr.bf16.gmra.mxu1 %v370_v58  ;;  %2884 = vmatprep.mubr.bf16.mxu0 %v371_v62  ;;  %v2302_v58 = vunpack.c.h.bf16 %v2695_v48  ;;  %v2701_v48 = vld [vmem:[%s3687_s0 + $0xb8] sm:$0xff]  }
  0x3c   :  { %2964 = vmatprep.mubr.bf16.mxu1 %v371_v62  ;;  %v268_v62 = vadd.f32 %v3129_v19, %v197_v52  ;;  %v378_v12 = vpack.c.bf16 %v330_v1, %v329_v0  ;;  %v382_v52 = vpack.c.bf16 %v338_v43, %v337_v42  ;;  %v2325_v54 = vunpack.c.l.bf16 %v2701_v48 }
  0x3d   :  { %v199_v3 = vmul.f32 %v2302_v58, %v3115_v13  ;;  %v2326_v58 = vunpack.c.h.bf16 %v2701_v48  ;;  %v342_v0 = vmax.f32 %v278_v55, 0.0  ;;  %v344_v2 = vmax.f32 %v280_v57, 0.0  ;;  %v2707_v48 = vld [vmem:[%s3687_s0 + $0xe8] sm:$0xff]  }
  0x3e   :  { %v332_v7 = vmax.f32 %v268_v62, 0.0  ;;  %v210_v63 = vmul.f32 %v2325_v54, %v3115_v13  ;;  %v2349_v54 = vunpack.c.l.bf16 %v2707_v48  ;;  %v2350_v55 = vunpack.c.h.bf16 %v2707_v48 }
  0x40   :  { %v379_v17 = vpack.c.bf16 %v332_v7, %v331_v6  ;;  %v213_v6 = vmul.f32 %v2330_v61, %v3115_v13  ;;  %v2704_v7 = vld [vmem:[%s3687_s0 + $0xd0] sm:$0xff]   ;;  %v281_v8 = vadd.f32 %v3129_v19, %v210_v63  ;;  %v223_v63 = vmul.f32 %v2350_v55, %v3115_v13 }
  0x41   :  { %v2338_v18 = vunpack.c.h.bf16 %v2704_v7 }
  0x42   :  { %2885 = vmatmul.mubr.bf16.gmra.mxu0 %v372_v15  ;;  %v284_v16 = vadd.f32 %v3129_v19, %v213_v6 }
  0x43   :  { %2965 = vmatmul.mubr.bf16.gmra.mxu1 %v372_v15  ;;  %2888 = vmatprep.mubr.bf16.mxu0 %v373_v20  ;;  %v270_v15 = vadd.f32 %v3129_v19, %v199_v3  ;;  %v211_v3 = vmul.f32 %v2326_v58, %v3115_v13  ;;  %v217_v28 = vmul.f32 %v2338_v18, %v3115_v13 }
  0x44   :  { %2968 = vmatprep.mubr.bf16.mxu1 %v373_v20  ;;  %v2313_v20 = vunpack.c.l.bf16 %v2698_v9  ;;  %v2333_v9 = vunpack.c.l.bf16 %v2703_v4  ;;  %v2709_v4 = vld [vmem:[%s3687_s0 + $0xf8] sm:$0xff]  }
  0x45   :  { %v334_v25 = vmax.f32 %v270_v15, 0.0  ;;  %v288_v38 = vadd.f32 %v3129_v19, %v217_v28 }
  0x46   :  { %v204_v29 = vmul.f32 %v2313_v20, %v3115_v13  ;;  %v345_v20 = vmax.f32 %v281_v8, 0.0  ;;  %v214_v22 = vmul.f32 %v2333_v9, %v3115_v13  ;;  %v2357_v8 = vunpack.c.l.bf16 %v2709_v4 }
  0x47   :  { %v380_v35 = vpack.c.bf16 %v334_v25, %v333_v24  ;;  %v2705_v24 = vld [vmem:[%s3687_s0 + $0xd8] sm:$0xff]   ;;  %v2358_v9 = vunpack.c.h.bf16 %v2709_v4 }
  0x48   :  { %v2341_v30 = vunpack.c.l.bf16 %v2705_v24  ;;  %v2342_v31 = vunpack.c.h.bf16 %v2705_v24  ;;  %v285_v33 = vadd.f32 %v3129_v19, %v214_v22 }
  0x4a   :  { %2889 = vmatmul.mubr.bf16.gmra.mxu0 %v374_v34  ;;  %v219_v41 = vmul.f32 %v2342_v31, %v3115_v13  ;;  %v349_v42 = vmax.f32 %v285_v33, 0.0 }
  0x4b   :  { %2969 = vmatmul.mubr.bf16.gmra.mxu1 %v374_v34  ;;  %2892 = vmatprep.mubr.bf16.mxu0 %v375_v40  ;;  %v2317_v34 = vunpack.c.l.bf16 %v2699_v26  ;;  %v348_v26 = vmax.f32 %v284_v16, 0.0  ;;  %v226_v16 = vmul.f32 %v2357_v8, %v3115_v13 }
  0x4c   :  { %2972 = vmatprep.mubr.bf16.mxu1 %v375_v40  ;;  %v275_v40 = vadd.f32 %v3129_v19, %v204_v29  ;;  %v2706_v29 = vld [vmem:[%s3687_s0 + $0xe0] sm:$0xff]  }
  0x4d   :  { %v206_v44 = vmul.f32 %v2317_v34, %v3115_v13  ;;  %v286_v34 = vadd.f32 %v3129_v19, %v215_v23  ;;  %v297_v22 = vadd.f32 %v3129_v19, %v226_v16 }
  0x4e   :  { %v339_v49 = vmax.f32 %v275_v40, 0.0  ;;  %v218_v40 = vmul.f32 %v2341_v30, %v3115_v13 }
  0x4f   :  { %v277_v53 = vadd.f32 %v3129_v19, %v206_v44  ;;  %v350_v43 = vmax.f32 %v286_v34, 0.0 }
  0x50   :  { %v383_v59 = vpack.c.bf16 %v340_v50, %v339_v49  ;;  %v2708_v49 = vld [vmem:[%s3687_s0 + $0xf0] sm:$0xff]   ;;  %v289_v50 = vadd.f32 %v3129_v19, %v218_v40 }
  0x51   :  { %v341_v62 = vmax.f32 %v277_v53, 0.0  ;;  %v2353_v58 = vunpack.c.l.bf16 %v2708_v49 }
  0x52   :  { %2893 = vmatmul.mubr.bf16.gmra.mxu0 %v376_v56 }
  0x53   :  { %2973 = vmatmul.mubr.bf16.gmra.mxu1 %v376_v56  ;;  %2896 = vmatprep.mubr.bf16.mxu0 %v377_v60  ;;  %v279_v56 = vadd.f32 %v3129_v19, %v208_v46  ;;  %v384_v10 = vpack.c.bf16 %v342_v0, %v341_v62  ;;  %v352_v46 = vmax.f32 %v288_v38, 0.0  ;;  %v222_v62 = vmul.f32 %v2349_v54, %v3115_v13 }
  0x54   :  { %2976 = vmatprep.mubr.bf16.mxu1 %v377_v60  ;;  %v2329_v60 = vunpack.c.l.bf16 %v2702_v51  ;;  %v290_v51 = vadd.f32 %v3129_v19, %v219_v41 }
  0x55   :  { %v343_v1 = vmax.f32 %v279_v56, 0.0  ;;  %v293_v6 = vadd.f32 %v3129_v19, %v222_v62 }
  0x56   :  { %v212_v5 = vmul.f32 %v2329_v60, %v3115_v13  ;;  %v353_v60 = vmax.f32 %v289_v50, 0.0  ;;  %v354_v61 = vmax.f32 %v290_v51, 0.0 }
  0x57   :  { %v385_v11 = vpack.c.bf16 %v344_v2, %v343_v1  ;;  %v224_v2 = vmul.f32 %v2353_v58, %v3115_v13  ;;  %v357_v14 = vmax.f32 %v293_v6, 0.0 }
  0x58   :  { %v283_v15 = vadd.f32 %v3129_v19, %v212_v5  ;;  %v390_v5 = vpack.c.bf16 %v354_v61, %v353_v60 }
  0x5a   :  { %2897 = vmatmul.mubr.bf16.gmra.mxu0 %v378_v12  ;;  %v347_v25 = vmax.f32 %v283_v15, 0.0 }
  0x5b   :  { %2977 = vmatmul.mubr.bf16.gmra.mxu1 %v378_v12  ;;  %2900 = vmatprep.mubr.bf16.mxu0 %v379_v17  ;;  %v282_v12 = vadd.f32 %v3129_v19, %v211_v3 }
  0x5c   :  { %2980 = vmatprep.mubr.bf16.mxu1 %v379_v17  ;;  %v2337_v17 = vunpack.c.l.bf16 %v2704_v7  ;;  %v387_v36 = vpack.c.bf16 %v348_v26, %v347_v25  ;;  %v294_v7 = vadd.f32 %v3129_v19, %v223_v63  ;;  %v361_v25 = vmax.f32 %v297_v22, 0.0 }
  0x5d   :  { %v346_v21 = vmax.f32 %v282_v12, 0.0 }
  0x5e   :  { %v216_v27 = vmul.f32 %v2337_v17, %v3115_v13  ;;  %v358_v15 = vmax.f32 %v294_v7, 0.0  ;;  %v227_v17 = vmul.f32 %v2358_v9, %v3115_v13 }
  0x5f   :  { %v386_v32 = vpack.c.bf16 %v346_v21, %v345_v20 }
  0x60   :  { %v287_v37 = vadd.f32 %v3129_v19, %v216_v27  ;;  %v392_v21 = vpack.c.bf16 %v358_v15, %v357_v14  ;;  %v298_v23 = vadd.f32 %v3129_v19, %v227_v17 }
  0x62   :  { %2901 = vmatmul.mubr.bf16.gmra.mxu0 %v380_v35  ;;  %v351_v45 = vmax.f32 %v287_v37, 0.0  ;;  %v362_v26 = vmax.f32 %v298_v23, 0.0 }
  0x63   :  { %2981 = vmatmul.mubr.bf16.gmra.mxu1 %v380_v35  ;;  %2904 = vmatprep.mubr.bf16.mxu0 %v381_v39  ;;  %v2345_v35 = vunpack.c.l.bf16 %v2706_v29 }
  0x64   :  { %2984 = vmatprep.mubr.bf16.mxu1 %v381_v39  ;;  %v2346_v39 = vunpack.c.h.bf16 %v2706_v29  ;;  %v389_v56 = vpack.c.bf16 %v352_v46, %v351_v45  ;;  %v394_v27 = vpack.c.bf16 %v362_v26, %v361_v25 }
  0x65   :  { %v220_v44 = vmul.f32 %v2345_v35, %v3115_v13 }
  0x66   :  { %v221_v47 = vmul.f32 %v2346_v39, %v3115_v13 }
  0x67   :  { %v291_v53 = vadd.f32 %v3129_v19, %v220_v44 }
  0x68   :  { %v292_v57 = vadd.f32 %v3129_v19, %v221_v47 }
  0x69   :  { %v355_v0 = vmax.f32 %v291_v53, 0.0 }
  0x6a   :  { %2905 = vmatmul.mubr.bf16.gmra.mxu0 %v382_v52  ;;  %v356_v1 = vmax.f32 %v292_v57, 0.0 }
  0x6b   :  { %2985 = vmatmul.mubr.bf16.gmra.mxu1 %v382_v52  ;;  %2908 = vmatprep.mubr.bf16.mxu0 %v383_v59  ;;  %v388_v52 = vpack.c.bf16 %v350_v43, %v349_v42 }
  0x6c   :  { %2988 = vmatprep.mubr.bf16.mxu1 %v383_v59  ;;  %v2354_v59 = vunpack.c.h.bf16 %v2708_v49 }
  0x6e   :  { %v225_v3 = vmul.f32 %v2354_v59, %v3115_v13  ;;  %v3358_v13 = vld [vmem:[%s3690_s4] ss:$0 sm:$0xff] }
  0x70   :  { %v296_v12 = vadd.f32 %v3129_v19, %v225_v3 }
  0x72   :  { %2909 = vmatmul.mubr.bf16.gmra.mxu0 %v384_v10  ;;  %v360_v20 = vmax.f32 %v296_v12, 0.0 }
  0x73   :  { %2989 = vmatmul.mubr.bf16.gmra.mxu1 %v384_v10  ;;  %2912 = vmatprep.mubr.bf16.mxu0 %v385_v11  ;;  %v391_v10 = vpack.c.bf16 %v356_v1, %v355_v0 }
  0x74   :  { %2992 = vmatprep.mubr.bf16.mxu1 %v385_v11  ;;  %v295_v11 = vadd.f32 %v3129_v19, %v224_v2  ;;  %v3364_v19 = vld [vmem:[%s3691_s5] ss:$0 sm:$0xff] }
  0x76   :  { %v359_v18 = vmax.f32 %v295_v11, 0.0 }
  0x78   :  { %v393_v24 = vpack.c.bf16 %v360_v20, %v359_v18 }
  0x7a   :  { %2913 = vmatmul.mubr.bf16.gmra.mxu0 %v386_v32 }
  0x7b   :  { %2993 = vmatmul.mubr.bf16.gmra.mxu1 %v386_v32  ;;  %2916 = vmatprep.mubr.bf16.mxu0 %v387_v36 }
  0x7c   :  { %2996 = vmatprep.mubr.bf16.mxu1 %v387_v36 }
  0x82   :  { %2917 = vmatmul.mubr.bf16.gmra.mxu0 %v388_v52 }
  0x83   :  { %2997 = vmatmul.mubr.bf16.gmra.mxu1 %v388_v52  ;;  %2920 = vmatprep.mubr.bf16.mxu0 %v389_v56 }
  0x84   :  { %3000 = vmatprep.mubr.bf16.mxu1 %v389_v56 }
  0x8a   :  { %2921 = vmatmul.mubr.bf16.gmra.mxu0 %v390_v5 }
  0x8b   :  { %3001 = vmatmul.mubr.bf16.gmra.mxu1 %v390_v5  ;;  %2924 = vmatprep.mubr.bf16.mxu0 %v391_v10 }
  0x8c   :  { %3004 = vmatprep.mubr.bf16.mxu1 %v391_v10 }
  0x92   :  { %2925 = vmatmul.mubr.bf16.gmra.mxu0 %v392_v21 }
  0x93   :  { %3005 = vmatmul.mubr.bf16.gmra.mxu1 %v392_v21  ;;  %2928 = vmatprep.mubr.bf16.mxu0 %v393_v24 }
  0x94   :  { %3008 = vmatprep.mubr.bf16.mxu1 %v393_v24 }
  0x9a   :  { %2929 = vmatmul.mubr.bf16.gmra.mxu0 %v394_v27 }
  0x9b   :  { %3009 = vmatmul.mubr.bf16.gmra.mxu1 %v394_v27 }
  0xe2   :  { %v2870_v28 = vpop.f32.mrf.mxu0 }
  0xe3   :  { %v757_v29 = vmul.f32 %v2870_v28, %v3358_v13  ;;  %v2950_v30 = vpop.f32.mrf.mxu1 }
  0xe4   :  { %v493_v31 = vpop.f32.mrf.mxu0 }
  0xe5   :  { %v755_v32 = vmul.f32 %v3358_v13, %v493_v31  ;;  %v1372_v33 = vpop.f32.mrf.mxu1  ;;  %v828_v35 = vadd.f32 %v3364_v19, %v757_v29 }
  0xe6   :  { %v2871_v34 = vpop.f32.mrf.mxu0 }
  0xe7   :  { %v758_v36 = vmul.f32 %v2871_v34, %v3358_v13  ;;  %v2951_v37 = vpop.f32.mrf.mxu1  ;;  %v826_v40 = vadd.f32 %v3364_v19, %v755_v32  ;;  %v892_v46 = vmax.f32 %v828_v35, 0.0 }
  0xe8   :  { %v2527_v38 = vpack.c.bf16 %v2951_v37, %v2950_v30  ;;  %v496_v39 = vpop.f32.mrf.mxu0 }
  0xe9   :  { %v829_v41 = vadd.f32 %v3364_v19, %v758_v36  ;;  %v756_v42 = vmul.f32 %v3358_v13, %v496_v39  ;;  %v1375_v43 = vpop.f32.mrf.mxu1  ;;  %v890_v52 = vmax.f32 %v826_v40, 0.0 }
  0xea   :  { %2741 = vst [vmem:[%s3692_s8 + $0x8] sm:$0xff] %v2527_v38   ;;  %v2522_v44 = vpack.c.bf16 %v1375_v43, %v1372_v33  ;;  %v2874_v45 = vpop.f32.mrf.mxu0 }
  0xeb   :  { %v893_v47 = vmax.f32 %v829_v41, 0.0  ;;  %v827_v48 = vadd.f32 %v3364_v19, %v756_v42  ;;  %v761_v49 = vmul.f32 %v2874_v45, %v3358_v13  ;;  %v2954_v50 = vpop.f32.mrf.mxu1 }
  0xec   :  { %2523 = vst [vmem:[%s3692_s8] sm:$0xff] %v2522_v44   ;;  %v509_v51 = vpop.f32.mrf.mxu0 }
  0xed   :  { %v2367_v53 = vpack.c.bf16 %v893_v47, %v892_v46  ;;  %v891_v54 = vmax.f32 %v827_v48, 0.0  ;;  %v759_v55 = vmul.f32 %v3358_v13, %v509_v51  ;;  %v1388_v56 = vpop.f32.mrf.mxu1  ;;  %v832_v59 = vadd.f32 %v3364_v19, %v761_v49 }
  0xee   :  { %v2875_v57 = vpop.f32.mrf.mxu0 }
  0xef   :  { %2710 = vst [vmem:[%s3693_s7 + $0x8] sm:$0xff] %v2367_v53   ;;  %v2362_v58 = vpack.c.bf16 %v891_v54, %v890_v52  ;;  %v762_v60 = vmul.f32 %v2875_v57, %v3358_v13  ;;  %v2955_v61 = vpop.f32.mrf.mxu1  ;;  %v830_v0 = vadd.f32 %v3364_v19, %v759_v55  ;;  %v896_v6 = vmax.f32 %v832_v59, 0.0 }
  0xf0   :  { %v2537_v62 = vpack.c.bf16 %v2955_v61, %v2954_v50  ;;  %v512_v63 = vpop.f32.mrf.mxu0 }
  0xf1   :  { %2363 = vst [vmem:[%s3693_s7] sm:$0xff] %v2362_v58   ;;  %v833_v1 = vadd.f32 %v3364_v19, %v762_v60  ;;  %v760_v2 = vmul.f32 %v3358_v13, %v512_v63  ;;  %v1391_v3 = vpop.f32.mrf.mxu1  ;;  %v894_v12 = vmax.f32 %v830_v0, 0.0 }
  0xf2   :  { %2743 = vst [vmem:[%s3692_s8 + $0x18] sm:$0xff] %v2537_v62   ;;  %v2532_v4 = vpack.c.bf16 %v1391_v3, %v1388_v56  ;;  %v2878_v5 = vpop.f32.mrf.mxu0 }
  0xf3   :  { %v897_v7 = vmax.f32 %v833_v1, 0.0  ;;  %v831_v8 = vadd.f32 %v3364_v19, %v760_v2  ;;  %v765_v9 = vmul.f32 %v2878_v5, %v3358_v13  ;;  %v2958_v10 = vpop.f32.mrf.mxu1 }
  0xf4   :  { %2742 = vst [vmem:[%s3692_s8 + $0x10] sm:$0xff] %v2532_v4   ;;  %v525_v11 = vpop.f32.mrf.mxu0 }
  0xf5   :  { %v2377_v14 = vpack.c.bf16 %v897_v7, %v896_v6  ;;  %v895_v15 = vmax.f32 %v831_v8, 0.0  ;;  %v763_v16 = vmul.f32 %v3358_v13, %v525_v11  ;;  %v1404_v17 = vpop.f32.mrf.mxu1  ;;  %v836_v21 = vadd.f32 %v3364_v19, %v765_v9 }
  0xf6   :  { %v2879_v18 = vpop.f32.mrf.mxu0 }
  0xf7   :  { %2712 = vst [vmem:[%s3693_s7 + $0x18] sm:$0xff] %v2377_v14   ;;  %v2372_v20 = vpack.c.bf16 %v895_v15, %v894_v12  ;;  %v766_v22 = vmul.f32 %v2879_v18, %v3358_v13  ;;  %v2959_v23 = vpop.f32.mrf.mxu1  ;;  %v834_v26 = vadd.f32 %v3364_v19, %v763_v16  ;;  %v900_v32 = vmax.f32 %v836_v21, 0.0 }
  0xf8   :  { %v2547_v24 = vpack.c.bf16 %v2959_v23, %v2958_v10  ;;  %v528_v25 = vpop.f32.mrf.mxu0 }
  0xf9   :  { %2711 = vst [vmem:[%s3693_s7 + $0x10] sm:$0xff] %v2372_v20   ;;  %v837_v27 = vadd.f32 %v3364_v19, %v766_v22  ;;  %v764_v28 = vmul.f32 %v3358_v13, %v528_v25  ;;  %v1407_v29 = vpop.f32.mrf.mxu1  ;;  %v898_v38 = vmax.f32 %v834_v26, 0.0 }
  0xfa   :  { %2745 = vst [vmem:[%s3692_s8 + $0x28] sm:$0xff] %v2547_v24   ;;  %v2542_v30 = vpack.c.bf16 %v1407_v29, %v1404_v17  ;;  %v2882_v31 = vpop.f32.mrf.mxu0 }
  0xfb   :  { %v901_v33 = vmax.f32 %v837_v27, 0.0  ;;  %v835_v34 = vadd.f32 %v3364_v19, %v764_v28  ;;  %v769_v35 = vmul.f32 %v2882_v31, %v3358_v13  ;;  %v2962_v36 = vpop.f32.mrf.mxu1 }
  0xfc   :  { %2744 = vst [vmem:[%s3692_s8 + $0x20] sm:$0xff] %v2542_v30   ;;  %v541_v37 = vpop.f32.mrf.mxu0 }
  0xfd   :  { %v2387_v39 = vpack.c.bf16 %v901_v33, %v900_v32  ;;  %v899_v40 = vmax.f32 %v835_v34, 0.0  ;;  %v767_v41 = vmul.f32 %v3358_v13, %v541_v37  ;;  %v1420_v42 = vpop.f32.mrf.mxu1  ;;  %v840_v45 = vadd.f32 %v3364_v19, %v769_v35 }
  0xfe   :  { %v2883_v43 = vpop.f32.mrf.mxu0 }
  0xff   :  { %2714 = vst [vmem:[%s3693_s7 + $0x28] sm:$0xff] %v2387_v39   ;;  %v2382_v44 = vpack.c.bf16 %v899_v40, %v898_v38  ;;  %v770_v46 = vmul.f32 %v2883_v43, %v3358_v13  ;;  %v2963_v47 = vpop.f32.mrf.mxu1  ;;  %v838_v50 = vadd.f32 %v3364_v19, %v767_v41  ;;  %v904_v56 = vmax.f32 %v840_v45, 0.0 }
 0x100   :  { %v2557_v48 = vpack.c.bf16 %v2963_v47, %v2962_v36  ;;  %v544_v49 = vpop.f32.mrf.mxu0 }
 0x101   :  { %2713 = vst [vmem:[%s3693_s7 + $0x20] sm:$0xff] %v2382_v44   ;;  %v841_v51 = vadd.f32 %v3364_v19, %v770_v46  ;;  %v768_v52 = vmul.f32 %v3358_v13, %v544_v49  ;;  %v1423_v53 = vpop.f32.mrf.mxu1  ;;  %v902_v62 = vmax.f32 %v838_v50, 0.0 }
 0x102   :  { %2747 = vst [vmem:[%s3692_s8 + $0x38] sm:$0xff] %v2557_v48   ;;  %v2552_v54 = vpack.c.bf16 %v1423_v53, %v1420_v42  ;;  %v2886_v55 = vpop.f32.mrf.mxu0 }
 0x103   :  { %v905_v57 = vmax.f32 %v841_v51, 0.0  ;;  %v839_v58 = vadd.f32 %v3364_v19, %v768_v52  ;;  %v773_v59 = vmul.f32 %v2886_v55, %v3358_v13  ;;  %v2966_v60 = vpop.f32.mrf.mxu1 }
 0x104   :  { %2746 = vst [vmem:[%s3692_s8 + $0x30] sm:$0xff] %v2552_v54   ;;  %v557_v61 = vpop.f32.mrf.mxu0 }
 0x105   :  { %v2397_v63 = vpack.c.bf16 %v905_v57, %v904_v56  ;;  %v903_v0 = vmax.f32 %v839_v58, 0.0  ;;  %v771_v1 = vmul.f32 %v3358_v13, %v557_v61  ;;  %v1436_v2 = vpop.f32.mrf.mxu1  ;;  %v844_v5 = vadd.f32 %v3364_v19, %v773_v59 }
 0x106   :  { %v2887_v3 = vpop.f32.mrf.mxu0 }
 0x107   :  { %2716 = vst [vmem:[%s3693_s7 + $0x38] sm:$0xff] %v2397_v63   ;;  %v2392_v4 = vpack.c.bf16 %v903_v0, %v902_v62  ;;  %v774_v6 = vmul.f32 %v2887_v3, %v3358_v13  ;;  %v2967_v7 = vpop.f32.mrf.mxu1  ;;  %v842_v10 = vadd.f32 %v3364_v19, %v771_v1  ;;  %v908_v17 = vmax.f32 %v844_v5, 0.0 }
 0x108   :  { %v2567_v8 = vpack.c.bf16 %v2967_v7, %v2966_v60  ;;  %v560_v9 = vpop.f32.mrf.mxu0 }
 0x109   :  { %2715 = vst [vmem:[%s3693_s7 + $0x30] sm:$0xff] %v2392_v4   ;;  %v845_v11 = vadd.f32 %v3364_v19, %v774_v6  ;;  %v772_v12 = vmul.f32 %v3358_v13, %v560_v9  ;;  %v1439_v14 = vpop.f32.mrf.mxu1  ;;  %v906_v24 = vmax.f32 %v842_v10, 0.0 }
 0x10a   :  { %2749 = vst [vmem:[%s3692_s8 + $0x48] sm:$0xff] %v2567_v8   ;;  %v2562_v15 = vpack.c.bf16 %v1439_v14, %v1436_v2  ;;  %v2890_v16 = vpop.f32.mrf.mxu0 }
 0x10b   :  { %v909_v18 = vmax.f32 %v845_v11, 0.0  ;;  %v843_v20 = vadd.f32 %v3364_v19, %v772_v12  ;;  %v777_v21 = vmul.f32 %v2890_v16, %v3358_v13  ;;  %v2970_v22 = vpop.f32.mrf.mxu1 }
 0x10c   :  { %2748 = vst [vmem:[%s3692_s8 + $0x40] sm:$0xff] %v2562_v15   ;;  %v573_v23 = vpop.f32.mrf.mxu0 }
 0x10d   :  { %v2407_v25 = vpack.c.bf16 %v909_v18, %v908_v17  ;;  %v907_v26 = vmax.f32 %v843_v20, 0.0  ;;  %v775_v27 = vmul.f32 %v3358_v13, %v573_v23  ;;  %v1452_v28 = vpop.f32.mrf.mxu1  ;;  %v848_v31 = vadd.f32 %v3364_v19, %v777_v21 }
 0x10e   :  { %v2891_v29 = vpop.f32.mrf.mxu0 }
 0x10f   :  { %2718 = vst [vmem:[%s3693_s7 + $0x48] sm:$0xff] %v2407_v25   ;;  %v2402_v30 = vpack.c.bf16 %v907_v26, %v906_v24  ;;  %v778_v32 = vmul.f32 %v2891_v29, %v3358_v13  ;;  %v2971_v33 = vpop.f32.mrf.mxu1  ;;  %v846_v36 = vadd.f32 %v3364_v19, %v775_v27  ;;  %v912_v42 = vmax.f32 %v848_v31, 0.0 }
 0x110   :  { %v2577_v34 = vpack.c.bf16 %v2971_v33, %v2970_v22  ;;  %v576_v35 = vpop.f32.mrf.mxu0 }
 0x111   :  { %2717 = vst [vmem:[%s3693_s7 + $0x40] sm:$0xff] %v2402_v30   ;;  %v849_v37 = vadd.f32 %v3364_v19, %v778_v32  ;;  %v776_v38 = vmul.f32 %v3358_v13, %v576_v35  ;;  %v1455_v39 = vpop.f32.mrf.mxu1  ;;  %v910_v48 = vmax.f32 %v846_v36, 0.0 }
 0x112   :  { %2751 = vst [vmem:[%s3692_s8 + $0x58] sm:$0xff] %v2577_v34   ;;  %v2572_v40 = vpack.c.bf16 %v1455_v39, %v1452_v28  ;;  %v2894_v41 = vpop.f32.mrf.mxu0 }
 0x113   :  { %v913_v43 = vmax.f32 %v849_v37, 0.0  ;;  %v847_v44 = vadd.f32 %v3364_v19, %v776_v38  ;;  %v781_v45 = vmul.f32 %v2894_v41, %v3358_v13  ;;  %v2974_v46 = vpop.f32.mrf.mxu1 }
 0x114   :  { %2750 = vst [vmem:[%s3692_s8 + $0x50] sm:$0xff] %v2572_v40   ;;  %v589_v47 = vpop.f32.mrf.mxu0 }
 0x115   :  { %v2417_v49 = vpack.c.bf16 %v913_v43, %v912_v42  ;;  %v911_v50 = vmax.f32 %v847_v44, 0.0  ;;  %v779_v51 = vmul.f32 %v3358_v13, %v589_v47  ;;  %v1468_v52 = vpop.f32.mrf.mxu1  ;;  %v852_v55 = vadd.f32 %v3364_v19, %v781_v45 }
 0x116   :  { %v2895_v53 = vpop.f32.mrf.mxu0 }
 0x117   :  { %2720 = vst [vmem:[%s3693_s7 + $0x58] sm:$0xff] %v2417_v49   ;;  %v2412_v54 = vpack.c.bf16 %v911_v50, %v910_v48  ;;  %v782_v56 = vmul.f32 %v2895_v53, %v3358_v13  ;;  %v2975_v57 = vpop.f32.mrf.mxu1  ;;  %v850_v60 = vadd.f32 %v3364_v19, %v779_v51  ;;  %v916_v2 = vmax.f32 %v852_v55, 0.0 }
 0x118   :  { %v2587_v58 = vpack.c.bf16 %v2975_v57, %v2974_v46  ;;  %v592_v59 = vpop.f32.mrf.mxu0 }
 0x119   :  { %2719 = vst [vmem:[%s3693_s7 + $0x50] sm:$0xff] %v2412_v54   ;;  %v853_v61 = vadd.f32 %v3364_v19, %v782_v56  ;;  %v780_v62 = vmul.f32 %v3358_v13, %v592_v59  ;;  %v1471_v63 = vpop.f32.mrf.mxu1  ;;  %v914_v8 = vmax.f32 %v850_v60, 0.0 }
 0x11a   :  { %2753 = vst [vmem:[%s3692_s8 + $0x68] sm:$0xff] %v2587_v58   ;;  %v2582_v0 = vpack.c.bf16 %v1471_v63, %v1468_v52  ;;  %v2898_v1 = vpop.f32.mrf.mxu0 }
 0x11b   :  { %v917_v3 = vmax.f32 %v853_v61, 0.0  ;;  %v851_v4 = vadd.f32 %v3364_v19, %v780_v62  ;;  %v785_v5 = vmul.f32 %v2898_v1, %v3358_v13  ;;  %v2978_v6 = vpop.f32.mrf.mxu1 }
 0x11c   :  { %2752 = vst [vmem:[%s3692_s8 + $0x60] sm:$0xff] %v2582_v0   ;;  %v605_v7 = vpop.f32.mrf.mxu0 }
 0x11d   :  { %v2427_v9 = vpack.c.bf16 %v917_v3, %v916_v2  ;;  %v915_v10 = vmax.f32 %v851_v4, 0.0  ;;  %v783_v11 = vmul.f32 %v3358_v13, %v605_v7  ;;  %v1484_v12 = vpop.f32.mrf.mxu1  ;;  %v856_v16 = vadd.f32 %v3364_v19, %v785_v5 }
 0x11e   :  { %v2899_v14 = vpop.f32.mrf.mxu0 }
 0x11f   :  { %2722 = vst [vmem:[%s3693_s7 + $0x68] sm:$0xff] %v2427_v9   ;;  %v2422_v15 = vpack.c.bf16 %v915_v10, %v914_v8  ;;  %v786_v17 = vmul.f32 %v2899_v14, %v3358_v13  ;;  %v2979_v18 = vpop.f32.mrf.mxu1  ;;  %v854_v22 = vadd.f32 %v3364_v19, %v783_v11  ;;  %v920_v28 = vmax.f32 %v856_v16, 0.0 }
 0x120   :  { %v2597_v20 = vpack.c.bf16 %v2979_v18, %v2978_v6  ;;  %v608_v21 = vpop.f32.mrf.mxu0 }
 0x121   :  { %2721 = vst [vmem:[%s3693_s7 + $0x60] sm:$0xff] %v2422_v15   ;;  %v857_v23 = vadd.f32 %v3364_v19, %v786_v17  ;;  %v784_v24 = vmul.f32 %v3358_v13, %v608_v21  ;;  %v1487_v25 = vpop.f32.mrf.mxu1  ;;  %v918_v34 = vmax.f32 %v854_v22, 0.0 }
 0x122   :  { %2755 = vst [vmem:[%s3692_s8 + $0x78] sm:$0xff] %v2597_v20   ;;  %v2592_v26 = vpack.c.bf16 %v1487_v25, %v1484_v12  ;;  %v2902_v27 = vpop.f32.mrf.mxu0 }
 0x123   :  { %v921_v29 = vmax.f32 %v857_v23, 0.0  ;;  %v855_v30 = vadd.f32 %v3364_v19, %v784_v24  ;;  %v789_v31 = vmul.f32 %v2902_v27, %v3358_v13  ;;  %v2982_v32 = vpop.f32.mrf.mxu1 }
 0x124   :  { %2754 = vst [vmem:[%s3692_s8 + $0x70] sm:$0xff] %v2592_v26   ;;  %v621_v33 = vpop.f32.mrf.mxu0 }
 0x125   :  { %v2437_v35 = vpack.c.bf16 %v921_v29, %v920_v28  ;;  %v919_v36 = vmax.f32 %v855_v30, 0.0  ;;  %v787_v37 = vmul.f32 %v3358_v13, %v621_v33  ;;  %v1500_v38 = vpop.f32.mrf.mxu1  ;;  %v860_v41 = vadd.f32 %v3364_v19, %v789_v31 }
 0x126   :  { %v2903_v39 = vpop.f32.mrf.mxu0 }
 0x127   :  { %2724 = vst [vmem:[%s3693_s7 + $0x78] sm:$0xff] %v2437_v35   ;;  %v2432_v40 = vpack.c.bf16 %v919_v36, %v918_v34  ;;  %v790_v42 = vmul.f32 %v2903_v39, %v3358_v13  ;;  %v2983_v43 = vpop.f32.mrf.mxu1  ;;  %v858_v46 = vadd.f32 %v3364_v19, %v787_v37  ;;  %v924_v52 = vmax.f32 %v860_v41, 0.0 }
 0x128   :  { %v2607_v44 = vpack.c.bf16 %v2983_v43, %v2982_v32  ;;  %v624_v45 = vpop.f32.mrf.mxu0 }
 0x129   :  { %2723 = vst [vmem:[%s3693_s7 + $0x70] sm:$0xff] %v2432_v40   ;;  %v861_v47 = vadd.f32 %v3364_v19, %v790_v42  ;;  %v788_v48 = vmul.f32 %v3358_v13, %v624_v45  ;;  %v1503_v49 = vpop.f32.mrf.mxu1  ;;  %v922_v58 = vmax.f32 %v858_v46, 0.0 }
 0x12a   :  { %2757 = vst [vmem:[%s3692_s8 + $0x88] sm:$0xff] %v2607_v44   ;;  %v2602_v50 = vpack.c.bf16 %v1503_v49, %v1500_v38  ;;  %v2906_v51 = vpop.f32.mrf.mxu0 }
 0x12b   :  { %v925_v53 = vmax.f32 %v861_v47, 0.0  ;;  %v859_v54 = vadd.f32 %v3364_v19, %v788_v48  ;;  %v793_v55 = vmul.f32 %v2906_v51, %v3358_v13  ;;  %v2986_v56 = vpop.f32.mrf.mxu1 }
 0x12c   :  { %2756 = vst [vmem:[%s3692_s8 + $0x80] sm:$0xff] %v2602_v50   ;;  %v637_v57 = vpop.f32.mrf.mxu0 }
 0x12d   :  { %v2447_v59 = vpack.c.bf16 %v925_v53, %v924_v52  ;;  %v923_v60 = vmax.f32 %v859_v54, 0.0  ;;  %v791_v61 = vmul.f32 %v3358_v13, %v637_v57  ;;  %v1516_v62 = vpop.f32.mrf.mxu1  ;;  %v864_v1 = vadd.f32 %v3364_v19, %v793_v55 }
 0x12e   :  { %v2907_v63 = vpop.f32.mrf.mxu0 }
 0x12f   :  { %2726 = vst [vmem:[%s3693_s7 + $0x88] sm:$0xff] %v2447_v59   ;;  %v2442_v0 = vpack.c.bf16 %v923_v60, %v922_v58  ;;  %v794_v2 = vmul.f32 %v2907_v63, %v3358_v13  ;;  %v2987_v3 = vpop.f32.mrf.mxu1  ;;  %v862_v6 = vadd.f32 %v3364_v19, %v791_v61  ;;  %v928_v12 = vmax.f32 %v864_v1, 0.0 }
 0x130   :  { %v2617_v4 = vpack.c.bf16 %v2987_v3, %v2986_v56  ;;  %v640_v5 = vpop.f32.mrf.mxu0 }
 0x131   :  { %2725 = vst [vmem:[%s3693_s7 + $0x80] sm:$0xff] %v2442_v0   ;;  %v865_v7 = vadd.f32 %v3364_v19, %v794_v2  ;;  %v792_v8 = vmul.f32 %v3358_v13, %v640_v5  ;;  %v1519_v9 = vpop.f32.mrf.mxu1  ;;  %v926_v20 = vmax.f32 %v862_v6, 0.0 }
 0x132   :  { %2759 = vst [vmem:[%s3692_s8 + $0x98] sm:$0xff] %v2617_v4   ;;  %v2612_v10 = vpack.c.bf16 %v1519_v9, %v1516_v62  ;;  %v2910_v11 = vpop.f32.mrf.mxu0 }
 0x133   :  { %v929_v14 = vmax.f32 %v865_v7, 0.0  ;;  %v863_v15 = vadd.f32 %v3364_v19, %v792_v8  ;;  %v797_v16 = vmul.f32 %v2910_v11, %v3358_v13  ;;  %v2990_v17 = vpop.f32.mrf.mxu1 }
 0x134   :  { %2758 = vst [vmem:[%s3692_s8 + $0x90] sm:$0xff] %v2612_v10   ;;  %v653_v18 = vpop.f32.mrf.mxu0 }
 0x135   :  { %v2457_v21 = vpack.c.bf16 %v929_v14, %v928_v12  ;;  %v927_v22 = vmax.f32 %v863_v15, 0.0  ;;  %v795_v23 = vmul.f32 %v3358_v13, %v653_v18  ;;  %v1532_v24 = vpop.f32.mrf.mxu1  ;;  %v868_v27 = vadd.f32 %v3364_v19, %v797_v16 }
 0x136   :  { %v2911_v25 = vpop.f32.mrf.mxu0 }
 0x137   :  { %2728 = vst [vmem:[%s3693_s7 + $0x98] sm:$0xff] %v2457_v21   ;;  %v2452_v26 = vpack.c.bf16 %v927_v22, %v926_v20  ;;  %v798_v28 = vmul.f32 %v2911_v25, %v3358_v13  ;;  %v2991_v29 = vpop.f32.mrf.mxu1  ;;  %v866_v32 = vadd.f32 %v3364_v19, %v795_v23  ;;  %v932_v38 = vmax.f32 %v868_v27, 0.0 }
 0x138   :  { %v2627_v30 = vpack.c.bf16 %v2991_v29, %v2990_v17  ;;  %v656_v31 = vpop.f32.mrf.mxu0 }
 0x139   :  { %2727 = vst [vmem:[%s3693_s7 + $0x90] sm:$0xff] %v2452_v26   ;;  %v869_v33 = vadd.f32 %v3364_v19, %v798_v28  ;;  %v796_v34 = vmul.f32 %v3358_v13, %v656_v31  ;;  %v1535_v35 = vpop.f32.mrf.mxu1  ;;  %v930_v44 = vmax.f32 %v866_v32, 0.0 }
 0x13a   :  { %2761 = vst [vmem:[%s3692_s8 + $0xa8] sm:$0xff] %v2627_v30   ;;  %v2622_v36 = vpack.c.bf16 %v1535_v35, %v1532_v24  ;;  %v2914_v37 = vpop.f32.mrf.mxu0 }
 0x13b   :  { %v933_v39 = vmax.f32 %v869_v33, 0.0  ;;  %v867_v40 = vadd.f32 %v3364_v19, %v796_v34  ;;  %v801_v41 = vmul.f32 %v2914_v37, %v3358_v13  ;;  %v2994_v42 = vpop.f32.mrf.mxu1 }
 0x13c   :  { %2760 = vst [vmem:[%s3692_s8 + $0xa0] sm:$0xff] %v2622_v36   ;;  %v669_v43 = vpop.f32.mrf.mxu0 }
 0x13d   :  { %v2467_v45 = vpack.c.bf16 %v933_v39, %v932_v38  ;;  %v931_v46 = vmax.f32 %v867_v40, 0.0  ;;  %v799_v47 = vmul.f32 %v3358_v13, %v669_v43  ;;  %v1548_v48 = vpop.f32.mrf.mxu1  ;;  %v872_v51 = vadd.f32 %v3364_v19, %v801_v41 }
 0x13e   :  { %v2915_v49 = vpop.f32.mrf.mxu0 }
 0x13f   :  { %2730 = vst [vmem:[%s3693_s7 + $0xa8] sm:$0xff] %v2467_v45   ;;  %v2462_v50 = vpack.c.bf16 %v931_v46, %v930_v44  ;;  %v802_v52 = vmul.f32 %v2915_v49, %v3358_v13  ;;  %v2995_v53 = vpop.f32.mrf.mxu1  ;;  %v870_v56 = vadd.f32 %v3364_v19, %v799_v47  ;;  %v936_v62 = vmax.f32 %v872_v51, 0.0 }
 0x140   :  { %v2637_v54 = vpack.c.bf16 %v2995_v53, %v2994_v42  ;;  %v672_v55 = vpop.f32.mrf.mxu0 }
 0x141   :  { %2729 = vst [vmem:[%s3693_s7 + $0xa0] sm:$0xff] %v2462_v50   ;;  %v873_v57 = vadd.f32 %v3364_v19, %v802_v52  ;;  %v800_v58 = vmul.f32 %v3358_v13, %v672_v55  ;;  %v1551_v59 = vpop.f32.mrf.mxu1  ;;  %v934_v4 = vmax.f32 %v870_v56, 0.0 }
 0x142   :  { %2763 = vst [vmem:[%s3692_s8 + $0xb8] sm:$0xff] %v2637_v54   ;;  %v2632_v60 = vpack.c.bf16 %v1551_v59, %v1548_v48  ;;  %v2918_v61 = vpop.f32.mrf.mxu0 }
 0x143   :  { %v937_v63 = vmax.f32 %v873_v57, 0.0  ;;  %v871_v0 = vadd.f32 %v3364_v19, %v800_v58  ;;  %v805_v1 = vmul.f32 %v2918_v61, %v3358_v13  ;;  %v2998_v2 = vpop.f32.mrf.mxu1 }
 0x144   :  { %2762 = vst [vmem:[%s3692_s8 + $0xb0] sm:$0xff] %v2632_v60   ;;  %v685_v3 = vpop.f32.mrf.mxu0 }
 0x145   :  { %v2477_v5 = vpack.c.bf16 %v937_v63, %v936_v62  ;;  %v935_v6 = vmax.f32 %v871_v0, 0.0  ;;  %v803_v7 = vmul.f32 %v3358_v13, %v685_v3  ;;  %v1564_v8 = vpop.f32.mrf.mxu1  ;;  %v876_v11 = vadd.f32 %v3364_v19, %v805_v1 }
 0x146   :  { %v2919_v9 = vpop.f32.mrf.mxu0 }
 0x147   :  { %2732 = vst [vmem:[%s3693_s7 + $0xb8] sm:$0xff] %v2477_v5   ;;  %v2472_v10 = vpack.c.bf16 %v935_v6, %v934_v4  ;;  %v806_v12 = vmul.f32 %v2919_v9, %v3358_v13  ;;  %v2999_v14 = vpop.f32.mrf.mxu1  ;;  %v874_v17 = vadd.f32 %v3364_v19, %v803_v7  ;;  %v940_v24 = vmax.f32 %v876_v11, 0.0 }
 0x148   :  { %v2647_v15 = vpack.c.bf16 %v2999_v14, %v2998_v2  ;;  %v688_v16 = vpop.f32.mrf.mxu0 }
 0x149   :  { %2731 = vst [vmem:[%s3693_s7 + $0xb0] sm:$0xff] %v2472_v10   ;;  %v877_v18 = vadd.f32 %v3364_v19, %v806_v12  ;;  %v804_v20 = vmul.f32 %v3358_v13, %v688_v16  ;;  %v1567_v21 = vpop.f32.mrf.mxu1  ;;  %v938_v30 = vmax.f32 %v874_v17, 0.0 }
 0x14a   :  { %2765 = vst [vmem:[%s3692_s8 + $0xc8] sm:$0xff] %v2647_v15   ;;  %v2642_v22 = vpack.c.bf16 %v1567_v21, %v1564_v8  ;;  %v2922_v23 = vpop.f32.mrf.mxu0 }
 0x14b   :  { %v941_v25 = vmax.f32 %v877_v18, 0.0  ;;  %v875_v26 = vadd.f32 %v3364_v19, %v804_v20  ;;  %v809_v27 = vmul.f32 %v2922_v23, %v3358_v13  ;;  %v3002_v28 = vpop.f32.mrf.mxu1 }
 0x14c   :  { %2764 = vst [vmem:[%s3692_s8 + $0xc0] sm:$0xff] %v2642_v22   ;;  %v701_v29 = vpop.f32.mrf.mxu0 }
 0x14d   :  { %v2487_v31 = vpack.c.bf16 %v941_v25, %v940_v24  ;;  %v939_v32 = vmax.f32 %v875_v26, 0.0  ;;  %v807_v33 = vmul.f32 %v3358_v13, %v701_v29  ;;  %v1580_v34 = vpop.f32.mrf.mxu1  ;;  %v880_v37 = vadd.f32 %v3364_v19, %v809_v27 }
 0x14e   :  { %v2923_v35 = vpop.f32.mrf.mxu0 }
 0x14f   :  { %2734 = vst [vmem:[%s3693_s7 + $0xc8] sm:$0xff] %v2487_v31   ;;  %v2482_v36 = vpack.c.bf16 %v939_v32, %v938_v30  ;;  %v810_v38 = vmul.f32 %v2923_v35, %v3358_v13  ;;  %v3003_v39 = vpop.f32.mrf.mxu1  ;;  %v878_v42 = vadd.f32 %v3364_v19, %v807_v33  ;;  %v944_v48 = vmax.f32 %v880_v37, 0.0 }
 0x150   :  { %v2657_v40 = vpack.c.bf16 %v3003_v39, %v3002_v28  ;;  %v704_v41 = vpop.f32.mrf.mxu0 }
 0x151   :  { %2733 = vst [vmem:[%s3693_s7 + $0xc0] sm:$0xff] %v2482_v36   ;;  %v881_v43 = vadd.f32 %v3364_v19, %v810_v38  ;;  %v808_v44 = vmul.f32 %v3358_v13, %v704_v41  ;;  %v1583_v45 = vpop.f32.mrf.mxu1  ;;  %v942_v54 = vmax.f32 %v878_v42, 0.0 }
 0x152   :  { %2767 = vst [vmem:[%s3692_s8 + $0xd8] sm:$0xff] %v2657_v40   ;;  %v2652_v46 = vpack.c.bf16 %v1583_v45, %v1580_v34  ;;  %v2926_v47 = vpop.f32.mrf.mxu0 }
 0x153   :  { %v945_v49 = vmax.f32 %v881_v43, 0.0  ;;  %v879_v50 = vadd.f32 %v3364_v19, %v808_v44  ;;  %v813_v51 = vmul.f32 %v2926_v47, %v3358_v13  ;;  %v3006_v52 = vpop.f32.mrf.mxu1 }
 0x154   :  { %2766 = vst [vmem:[%s3692_s8 + $0xd0] sm:$0xff] %v2652_v46   ;;  %v717_v53 = vpop.f32.mrf.mxu0 }
 0x155   :  { %v2497_v55 = vpack.c.bf16 %v945_v49, %v944_v48  ;;  %v943_v56 = vmax.f32 %v879_v50, 0.0  ;;  %v811_v57 = vmul.f32 %v3358_v13, %v717_v53  ;;  %v1596_v58 = vpop.f32.mrf.mxu1  ;;  %v884_v61 = vadd.f32 %v3364_v19, %v813_v51 }
 0x156   :  { %v2927_v59 = vpop.f32.mrf.mxu0 }
 0x157   :  { %2736 = vst [vmem:[%s3693_s7 + $0xd8] sm:$0xff] %v2497_v55   ;;  %v2492_v60 = vpack.c.bf16 %v943_v56, %v942_v54  ;;  %v814_v62 = vmul.f32 %v2927_v59, %v3358_v13  ;;  %v3007_v63 = vpop.f32.mrf.mxu1  ;;  %v882_v2 = vadd.f32 %v3364_v19, %v811_v57  ;;  %v948_v8 = vmax.f32 %v884_v61, 0.0 }
 0x158   :  { %v2667_v0 = vpack.c.bf16 %v3007_v63, %v3006_v52  ;;  %v720_v1 = vpop.f32.mrf.mxu0 }
 0x159   :  { %2735 = vst [vmem:[%s3693_s7 + $0xd0] sm:$0xff] %v2492_v60   ;;  %v885_v3 = vadd.f32 %v3364_v19, %v814_v62  ;;  %v812_v4 = vmul.f32 %v3358_v13, %v720_v1  ;;  %v1599_v5 = vpop.f32.mrf.mxu1  ;;  %v946_v15 = vmax.f32 %v882_v2, 0.0 }
 0x15a   :  { %2769 = vst [vmem:[%s3692_s8 + $0xe8] sm:$0xff] %v2667_v0   ;;  %v2662_v6 = vpack.c.bf16 %v1599_v5, %v1596_v58  ;;  %v2930_v7 = vpop.f32.mrf.mxu0 }
 0x15b   :  { %v949_v9 = vmax.f32 %v885_v3, 0.0  ;;  %v883_v10 = vadd.f32 %v3364_v19, %v812_v4  ;;  %v817_v11 = vmul.f32 %v2930_v7, %v3358_v13  ;;  %v3010_v12 = vpop.f32.mrf.mxu1 }
 0x15c   :  { %2768 = vst [vmem:[%s3692_s8 + $0xe0] sm:$0xff] %v2662_v6   ;;  %v733_v14 = vpop.f32.mrf.mxu0 }
 0x15d   :  { %v2507_v16 = vpack.c.bf16 %v949_v9, %v948_v8  ;;  %v947_v17 = vmax.f32 %v883_v10, 0.0  ;;  %v815_v18 = vmul.f32 %v3358_v13, %v733_v14  ;;  %v1612_v20 = vpop.f32.mrf.mxu1  ;;  %v888_v23 = vadd.f32 %v3364_v19, %v817_v11 }
 0x15e   :  { %v2931_v21 = vpop.f32.mrf.mxu0 }
 0x15f   :  { %2738 = vst [vmem:[%s3693_s7 + $0xe8] sm:$0xff] %v2507_v16   ;;  %v2502_v22 = vpack.c.bf16 %v947_v17, %v946_v15  ;;  %v818_v24 = vmul.f32 %v2931_v21, %v3358_v13  ;;  %v3011_v25 = vpop.f32.mrf.mxu1  ;;  %v886_v28 = vadd.f32 %v3364_v19, %v815_v18  ;;  %v952_v33 = vmax.f32 %v888_v23, 0.0 }
 0x160   :  { %v2677_v26 = vpack.c.bf16 %v3011_v25, %v3010_v12  ;;  %v736_v27 = vpop.f32.mrf.mxu0 }
 0x161   :  { %2737 = vst [vmem:[%s3693_s7 + $0xe0] sm:$0xff] %v2502_v22   ;;  %v889_v29 = vadd.f32 %v3364_v19, %v818_v24  ;;  %v816_v30 = vmul.f32 %v3358_v13, %v736_v27  ;;  %v1615_v31 = vpop.f32.mrf.mxu1  ;;  %v950_v36 = vmax.f32 %v886_v28, 0.0 }
 0x162   :  { %2771 = vst [vmem:[%s3692_s8 + $0xf8] sm:$0xff] %v2677_v26   ;;  %v2672_v32 = vpack.c.bf16 %v1615_v31, %v1612_v20 }
 0x163   :  { %v953_v34 = vmax.f32 %v889_v29, 0.0  ;;  %v887_v35 = vadd.f32 %v3364_v19, %v816_v30 }
 0x164   :  { %2770 = vst [vmem:[%s3692_s8 + $0xf0] sm:$0xff] %v2672_v32  }
 0x165   :  { %v2517_v37 = vpack.c.bf16 %v953_v34, %v952_v33  ;;  %v951_v38 = vmax.f32 %v887_v35, 0.0 }
 0x167   :  { %2740 = vst [vmem:[%s3693_s7 + $0xf8] sm:$0xff] %v2517_v37   ;;  %v2512_v13 = vpack.c.bf16 %v951_v38, %v950_v36 }
 0x169   :  { %2739 = vst [vmem:[%s3693_s7 + $0xf0] sm:$0xff] %v2512_v13  }

// kernel: preact_bottleneck_forward.7
= control target key start
LH: loop header
LB: loop body
LE: loop exit
PB: predicated region body
PF: predicated region fallthrough
CT: control target
= control target key end

     0   :  { %s848_s12 = smov 0   ;;  %s850_s13 = smov 0   ;;  %s991_s0 = inlined_call_operand.vmem [shape: bf16[2,256,128], index: 0, kind: input, shape index: {}]   ;;  %s992_s1 = inlined_call_operand.vmem [shape: f32[2,1,128], index: 1, kind: input, shape index: {}]   ;;  %s993_s2 = inlined_call_operand.vmem [shape: bf16[2,256,128], index: 2, kind: input, shape index: {}]   ;;  %s994_s3 = inlined_call_operand.vmem [shape: f32[2,256,128], index: 3, kind: output, shape index: {}]  }
   0x1   :  { %s852_s14 = smov 0  }
   0x2 LB: > { %s25_s15 = sadd.s32 1, %s822_s13  ;;  %p609_p0 = scmp.ge.s32.totalorder %s826_s14, 1  ;;  %s826_s14 = sphi %s852_s14, %s13_s14   ;;  %s822_s13 = sphi %s850_s13, %s996_s13   ;;  %s818_s12 = sphi %s848_s12, %s995_s12  }
   0x3   : > { %p27_p1 = scmp.ge.s32.totalorder %s25_s15, 2  ;;  %p183_p2 = scmp.lt.s32.totalorder %s826_s14, 3 }
   0x5   : > { %s998_s15 = smov (%p27_p1, %s25_s15), 0  ;;  %p184_p3 = pnand %p609_p0, %p183_p2 }
   0x6   : > { %p228_p4 = scmp.lt.s32.totalorder (!%p184_p3), %s818_s12, 1 }
   0x7   : > { %187 = sbr.rel (%p184_p3) target bundleno = 53 (0x35), region = 32 }
   0xc   : > { %s1000_s12 = smov (!%p228_p4, %s818_s12), 1 }
   0xd   : > { %s619_s16 = sshll.u32 %s1000_s12, 7  ;;  %s239_s19 = scalar_lea.vmem %s992_s1, %s1000_s12 }
   0xe   : > { %s872_s22 = scalar_lea.vmem %s991_s0, %s619_s16  ;;  %s877_s25 = scalar_lea.vmem %s993_s2, %s619_s16  ;;  %v879_v0 = vld [vmem:[%s239_s19] ss:$0 sm:$0xff] }
   0xf   : > { %v623_v1 = vld [vmem:[%s872_s22] sm:$0xff]   ;;  %v750_v3 = vld [vmem:[%s872_s22 + $0x8] sm:$0xff]   ;;  %s621_s26 = sshll.u32 %s1000_s12, 8  ;;  %v751_v9 = vld [vmem:[%s872_s22 + $0x10] sm:$0xff]  }
  0x10   : > { %v687_v2 = vld [vmem:[%s877_s25] sm:$0xff]   ;;  %v624_v4 = vunpack.c.l.bf16 %v623_v1  ;;  %v625_v6 = vunpack.c.h.bf16 %v623_v1  ;;  %v765_v8 = vld [vmem:[%s877_s25 + $0x8] sm:$0xff]   ;;  %v766_v10 = vld [vmem:[%s877_s25 + $0x10] sm:$0xff]   ;;  %v628_v11 = vunpack.c.l.bf16 %v750_v3  ;;  %v629_v13 = vunpack.c.h.bf16 %v750_v3  ;;  %s894_s29 = scalar_lea.vmem %s994_s3, %s621_s26 }
  0x11   : > { %v688_v5 = vunpack.c.l.bf16 %v687_v2  ;;  %v689_v7 = vunpack.c.h.bf16 %v687_v2  ;;  %v692_v12 = vunpack.c.l.bf16 %v765_v8  ;;  %v693_v14 = vunpack.c.h.bf16 %v765_v8  ;;  %v752_v15 = vld [vmem:[%s872_s22 + $0x18] sm:$0xff]   ;;  %v753_v29 = vld [vmem:[%s872_s22 + $0x20] sm:$0xff]   ;;  %v754_v35 = vld [vmem:[%s872_s22 + $0x28] sm:$0xff]  }
  0x12   : > { %v331_v16 = vmul.f32 %v624_v4, %v879_v0  ;;  %v332_v17 = vmul.f32 %v625_v6, %v879_v0  ;;  %v632_v18 = vunpack.c.l.bf16 %v751_v9  ;;  %v696_v19 = vunpack.c.l.bf16 %v766_v10  ;;  %v767_v20 = vld [vmem:[%s877_s25 + $0x18] sm:$0xff]   ;;  %v768_v30 = vld [vmem:[%s877_s25 + $0x20] sm:$0xff]   ;;  %v769_v40 = vld [vmem:[%s877_s25 + $0x28] sm:$0xff]  }
  0x13   : > { %v333_v21 = vmul.f32 %v628_v11, %v879_v0  ;;  %v334_v22 = vmul.f32 %v629_v13, %v879_v0  ;;  %v633_v23 = vunpack.c.h.bf16 %v751_v9  ;;  %v697_v24 = vunpack.c.h.bf16 %v766_v10  ;;  %v755_v45 = vld [vmem:[%s872_s22 + $0x30] sm:$0xff]   ;;  %v756_v59 = vld [vmem:[%s872_s22 + $0x38] sm:$0xff]   ;;  %v757_v2 = vld [vmem:[%s872_s22 + $0x40] sm:$0xff]  }
  0x14   : > { %v427_v25 = vadd.f32 %v688_v5, %v331_v16  ;;  %v428_v26 = vadd.f32 %v689_v7, %v332_v17  ;;  %v335_v27 = vmul.f32 %v632_v18, %v879_v0  ;;  %v636_v28 = vunpack.c.l.bf16 %v752_v15  ;;  %v770_v50 = vld [vmem:[%s877_s25 + $0x30] sm:$0xff]   ;;  %v771_v60 = vld [vmem:[%s877_s25 + $0x38] sm:$0xff]   ;;  %v772_v7 = vld [vmem:[%s877_s25 + $0x40] sm:$0xff]  }
  0x15   : > { %v429_v31 = vadd.f32 %v692_v12, %v333_v21  ;;  %v430_v32 = vadd.f32 %v693_v14, %v334_v22  ;;  %v336_v33 = vmul.f32 %v633_v23, %v879_v0  ;;  %v700_v34 = vunpack.c.l.bf16 %v767_v20  ;;  %v758_v12 = vld [vmem:[%s872_s22 + $0x48] sm:$0xff]  }
  0x16   : > { %459 = vst [vmem:[%s894_s29] sm:$0xff] %v427_v25  ;;  %460 = vst [vmem:[%s894_s29 + $0x8] sm:$0xff] %v428_v26  ;;  %v431_v36 = vadd.f32 %v696_v19, %v335_v27  ;;  %v337_v37 = vmul.f32 %v636_v28, %v879_v0  ;;  %v637_v38 = vunpack.c.h.bf16 %v752_v15  ;;  %v701_v39 = vunpack.c.h.bf16 %v767_v20  ;;  %v773_v17 = vld [vmem:[%s877_s25 + $0x48] sm:$0xff]   ;;  %v759_v26 = vld [vmem:[%s872_s22 + $0x50] sm:$0xff]  }
  0x17   : > { %461 = vst [vmem:[%s894_s29 + $0x10] sm:$0xff] %v429_v31  ;;  %462 = vst [vmem:[%s894_s29 + $0x18] sm:$0xff] %v430_v32  ;;  %v432_v41 = vadd.f32 %v697_v24, %v336_v33  ;;  %v640_v42 = vunpack.c.l.bf16 %v753_v29  ;;  %v704_v43 = vunpack.c.l.bf16 %v768_v30  ;;  %v641_v44 = vunpack.c.h.bf16 %v753_v29  ;;  %v774_v27 = vld [vmem:[%s877_s25 + $0x50] sm:$0xff]   ;;  %v760_v32 = vld [vmem:[%s872_s22 + $0x58] sm:$0xff]  }
  0x18   : > { %463 = vst [vmem:[%s894_s29 + $0x20] sm:$0xff] %v431_v36  ;;  %v433_v46 = vadd.f32 %v700_v34, %v337_v37  ;;  %v338_v47 = vmul.f32 %v637_v38, %v879_v0  ;;  %v705_v48 = vunpack.c.h.bf16 %v768_v30  ;;  %v644_v49 = vunpack.c.l.bf16 %v754_v35  ;;  %v775_v37 = vld [vmem:[%s877_s25 + $0x58] sm:$0xff]  }
  0x19   : > { %464 = vst [vmem:[%s894_s29 + $0x28] sm:$0xff] %v432_v41  ;;  %v339_v51 = vmul.f32 %v640_v42, %v879_v0  ;;  %v340_v52 = vmul.f32 %v641_v44, %v879_v0  ;;  %v708_v53 = vunpack.c.l.bf16 %v769_v40  ;;  %v645_v54 = vunpack.c.h.bf16 %v754_v35  ;;  %v761_v42 = vld [vmem:[%s872_s22 + $0x60] sm:$0xff]  }
  0x1a   : > { %465 = vst [vmem:[%s894_s29 + $0x30] sm:$0xff] %v433_v46  ;;  %v434_v55 = vadd.f32 %v701_v39, %v338_v47  ;;  %v341_v56 = vmul.f32 %v644_v49, %v879_v0  ;;  %v709_v57 = vunpack.c.h.bf16 %v769_v40  ;;  %v648_v58 = vunpack.c.l.bf16 %v755_v45  ;;  %v776_v47 = vld [vmem:[%s877_s25 + $0x60] sm:$0xff]  }
  0x1b   : > { %v435_v61 = vadd.f32 %v704_v43, %v339_v51  ;;  %v436_v62 = vadd.f32 %v705_v48, %v340_v52  ;;  %v342_v63 = vmul.f32 %v645_v54, %v879_v0  ;;  %v712_v1 = vunpack.c.l.bf16 %v770_v50 }
  0x1c   : > { %466 = vst [vmem:[%s894_s29 + $0x38] sm:$0xff] %v434_v55  ;;  %v437_v3 = vadd.f32 %v708_v53, %v341_v56  ;;  %v343_v4 = vmul.f32 %v648_v58, %v879_v0  ;;  %v649_v5 = vunpack.c.h.bf16 %v755_v45  ;;  %v713_v6 = vunpack.c.h.bf16 %v770_v50  ;;  %v762_v56 = vld [vmem:[%s872_s22 + $0x68] sm:$0xff]  }
  0x1d   : > { %467 = vst [vmem:[%s894_s29 + $0x40] sm:$0xff] %v435_v61  ;;  %468 = vst [vmem:[%s894_s29 + $0x48] sm:$0xff] %v436_v62  ;;  %v438_v8 = vadd.f32 %v709_v57, %v342_v63  ;;  %v652_v9 = vunpack.c.l.bf16 %v756_v59  ;;  %v716_v10 = vunpack.c.l.bf16 %v771_v60  ;;  %v653_v11 = vunpack.c.h.bf16 %v756_v59  ;;  %v777_v57 = vld [vmem:[%s877_s25 + $0x68] sm:$0xff]   ;;  %v763_v62 = vld [vmem:[%s872_s22 + $0x70] sm:$0xff]  }
  0x1e   : > { %469 = vst [vmem:[%s894_s29 + $0x50] sm:$0xff] %v437_v3  ;;  %v439_v13 = vadd.f32 %v712_v1, %v343_v4  ;;  %v344_v14 = vmul.f32 %v649_v5, %v879_v0  ;;  %v717_v15 = vunpack.c.h.bf16 %v771_v60  ;;  %v656_v16 = vunpack.c.l.bf16 %v757_v2  ;;  %v778_v4 = vld [vmem:[%s877_s25 + $0x70] sm:$0xff]  }
  0x1f   : > { %470 = vst [vmem:[%s894_s29 + $0x58] sm:$0xff] %v438_v8  ;;  %v345_v18 = vmul.f32 %v652_v9, %v879_v0  ;;  %v346_v19 = vmul.f32 %v653_v11, %v879_v0  ;;  %v720_v20 = vunpack.c.l.bf16 %v772_v7  ;;  %v657_v21 = vunpack.c.h.bf16 %v757_v2  ;;  %v764_v9 = vld [vmem:[%s872_s22 + $0x78] sm:$0xff]  }
  0x20   : > { %471 = vst [vmem:[%s894_s29 + $0x60] sm:$0xff] %v439_v13  ;;  %v440_v22 = vadd.f32 %v713_v6, %v344_v14  ;;  %v347_v23 = vmul.f32 %v656_v16, %v879_v0  ;;  %v721_v24 = vunpack.c.h.bf16 %v772_v7  ;;  %v660_v25 = vunpack.c.l.bf16 %v758_v12  ;;  %v779_v14 = vld [vmem:[%s877_s25 + $0x78] sm:$0xff]  }
  0x21   : > { %v441_v28 = vadd.f32 %v716_v10, %v345_v18  ;;  %v442_v29 = vadd.f32 %v717_v15, %v346_v19  ;;  %v348_v30 = vmul.f32 %v657_v21, %v879_v0  ;;  %v724_v31 = vunpack.c.l.bf16 %v773_v17 }
  0x22   : > { %472 = vst [vmem:[%s894_s29 + $0x68] sm:$0xff] %v440_v22  ;;  %v443_v33 = vadd.f32 %v720_v20, %v347_v23  ;;  %v349_v34 = vmul.f32 %v660_v25, %v879_v0  ;;  %v661_v35 = vunpack.c.h.bf16 %v758_v12  ;;  %v725_v36 = vunpack.c.h.bf16 %v773_v17 }
  0x23   : > { %473 = vst [vmem:[%s894_s29 + $0x70] sm:$0xff] %v441_v28  ;;  %474 = vst [vmem:[%s894_s29 + $0x78] sm:$0xff] %v442_v29  ;;  %v444_v38 = vadd.f32 %v721_v24, %v348_v30  ;;  %v664_v39 = vunpack.c.l.bf16 %v759_v26  ;;  %v728_v40 = vunpack.c.l.bf16 %v774_v27  ;;  %v665_v41 = vunpack.c.h.bf16 %v759_v26 }
  0x24   : > { %475 = vst [vmem:[%s894_s29 + $0x80] sm:$0xff] %v443_v33  ;;  %v445_v43 = vadd.f32 %v724_v31, %v349_v34  ;;  %v350_v44 = vmul.f32 %v661_v35, %v879_v0  ;;  %v729_v45 = vunpack.c.h.bf16 %v774_v27  ;;  %v668_v46 = vunpack.c.l.bf16 %v760_v32 }
  0x25   : > { %476 = vst [vmem:[%s894_s29 + $0x88] sm:$0xff] %v444_v38  ;;  %v351_v48 = vmul.f32 %v664_v39, %v879_v0  ;;  %v352_v49 = vmul.f32 %v665_v41, %v879_v0  ;;  %v732_v50 = vunpack.c.l.bf16 %v775_v37  ;;  %v669_v51 = vunpack.c.h.bf16 %v760_v32 }
  0x26   : > { %477 = vst [vmem:[%s894_s29 + $0x90] sm:$0xff] %v445_v43  ;;  %v446_v52 = vadd.f32 %v725_v36, %v350_v44  ;;  %v353_v53 = vmul.f32 %v668_v46, %v879_v0  ;;  %v733_v54 = vunpack.c.h.bf16 %v775_v37  ;;  %v672_v55 = vunpack.c.l.bf16 %v761_v42 }
  0x27   : > { %v447_v58 = vadd.f32 %v728_v40, %v351_v48  ;;  %v448_v59 = vadd.f32 %v729_v45, %v352_v49  ;;  %v354_v60 = vmul.f32 %v669_v51, %v879_v0  ;;  %v736_v61 = vunpack.c.l.bf16 %v776_v47 }
  0x28   : > { %478 = vst [vmem:[%s894_s29 + $0x98] sm:$0xff] %v446_v52  ;;  %v449_v63 = vadd.f32 %v732_v50, %v353_v53  ;;  %v355_v1 = vmul.f32 %v672_v55, %v879_v0  ;;  %v673_v2 = vunpack.c.h.bf16 %v761_v42  ;;  %v737_v3 = vunpack.c.h.bf16 %v776_v47 }
  0x29   : > { %479 = vst [vmem:[%s894_s29 + $0xa0] sm:$0xff] %v447_v58  ;;  %480 = vst [vmem:[%s894_s29 + $0xa8] sm:$0xff] %v448_v59  ;;  %v450_v5 = vadd.f32 %v733_v54, %v354_v60  ;;  %v676_v6 = vunpack.c.l.bf16 %v762_v56  ;;  %v740_v7 = vunpack.c.l.bf16 %v777_v57  ;;  %v677_v8 = vunpack.c.h.bf16 %v762_v56 }
  0x2a   : > { %481 = vst [vmem:[%s894_s29 + $0xb0] sm:$0xff] %v449_v63  ;;  %v451_v10 = vadd.f32 %v736_v61, %v355_v1  ;;  %v356_v11 = vmul.f32 %v673_v2, %v879_v0  ;;  %v741_v12 = vunpack.c.h.bf16 %v777_v57  ;;  %v680_v13 = vunpack.c.l.bf16 %v763_v62 }
  0x2b   : > { %482 = vst [vmem:[%s894_s29 + $0xb8] sm:$0xff] %v450_v5  ;;  %v357_v15 = vmul.f32 %v676_v6, %v879_v0  ;;  %v358_v16 = vmul.f32 %v677_v8, %v879_v0  ;;  %v744_v17 = vunpack.c.l.bf16 %v778_v4  ;;  %v681_v18 = vunpack.c.h.bf16 %v763_v62 }
  0x2c   : > { %483 = vst [vmem:[%s894_s29 + $0xc0] sm:$0xff] %v451_v10  ;;  %v452_v19 = vadd.f32 %v737_v3, %v356_v11  ;;  %v359_v20 = vmul.f32 %v680_v13, %v879_v0  ;;  %v745_v21 = vunpack.c.h.bf16 %v778_v4  ;;  %v684_v22 = vunpack.c.l.bf16 %v764_v9 }
  0x2d   : > { %v453_v23 = vadd.f32 %v740_v7, %v357_v15  ;;  %v454_v24 = vadd.f32 %v741_v12, %v358_v16  ;;  %v360_v25 = vmul.f32 %v681_v18, %v879_v0  ;;  %v748_v26 = vunpack.c.l.bf16 %v779_v14 }
  0x2e   : > { %484 = vst [vmem:[%s894_s29 + $0xc8] sm:$0xff] %v452_v19  ;;  %v455_v27 = vadd.f32 %v744_v17, %v359_v20  ;;  %v361_v28 = vmul.f32 %v684_v22, %v879_v0  ;;  %v685_v29 = vunpack.c.h.bf16 %v764_v9  ;;  %v749_v30 = vunpack.c.h.bf16 %v779_v14 }
  0x2f   : > { %485 = vst [vmem:[%s894_s29 + $0xd0] sm:$0xff] %v453_v23  ;;  %486 = vst [vmem:[%s894_s29 + $0xd8] sm:$0xff] %v454_v24  ;;  %v456_v31 = vadd.f32 %v745_v21, %v360_v25 }
  0x30   : > { %487 = vst [vmem:[%s894_s29 + $0xe0] sm:$0xff] %v455_v27  ;;  %v457_v32 = vadd.f32 %v748_v26, %v361_v28  ;;  %v362_v33 = vmul.f32 %v685_v29, %v879_v0 }
  0x31   : > { %488 = vst [vmem:[%s894_s29 + $0xe8] sm:$0xff] %v456_v31 }
  0x32   : > { %489 = vst [vmem:[%s894_s29 + $0xf0] sm:$0xff] %v457_v32  ;;  %v458_v34 = vadd.f32 %v749_v30, %v362_v33 }
  0x34   : > { %490 = vst [vmem:[%s894_s29 + $0xf8] sm:$0xff] %v458_v34 }
  0x35 PF: > { %s13_s14 = sadd.s32 1, %s826_s14   ;;  %s995_s12 = smov %s822_s13 }
  0x36   : > { %p10_p5 = scmp.ge.s32.totalorder %s13_s14, 4   ;;  %s996_s13 = smov %s998_s15 }
  0x38   :  { %12 = sbr.rel (!%p10_p5) target bundleno = 2 (0x2), region = 68 }

// kernel: preact_bottleneck_forward.5
= control target key start
LH: loop header
LB: loop body
LE: loop exit
PB: predicated region body
PF: predicated region fallthrough
CT: control target
= control target key end

     0   :  { %s2602_s27 = smov 0   ;;  %s2604_s28 = smov 0   ;;  %s3075_s0 = inlined_call_operand.vmem [shape: bf16[2,18,18,128], index: 0, kind: input, shape index: {}, may-alias: {0,1,2}]   ;;  %s3076_s1 = inlined_call_operand.vmem [shape: bf16[2,18,18,128], index: 1, kind: input, shape index: {}, may-alias: {0,1,2}]   ;;  %s3077_s2 = inlined_call_operand.vmem [shape: bf16[2,18,18,128], index: 2, kind: input, shape index: {}, may-alias: {0,1,2}]   ;;  %s3078_s3 = inlined_call_operand.vmem [shape: bf16[1152,128], index: 3, kind: input, shape index: {}]   ;;  %s3079_s4 = inlined_call_operand.vmem [shape: f32[1,128], index: 4, kind: input, shape index: {}]   ;;  %s3080_s5 = inlined_call_operand.vmem [shape: f32[1,128], index: 5, kind: input, shape index: {}]   ;;  %s3081_s6 = inlined_call_operand.vmem [shape: bf16[128,128], index: 6, kind: input, shape index: {}]   ;;  %s3082_s7 = inlined_call_operand.vmem [shape: bf16[2,256,128], index: 7, kind: output, shape index: {0}]   ;;  %s3083_s8 = inlined_call_operand.vmem [shape: f32[2,4,8,128], index: 8, kind: output, shape index: {1}]  }
   0x1   :  { %s2606_s29 = smov 0   ;;  %s2608_s30 = smov 0  }
   0x2   :  { %s2610_s9 = smov 0  }
   0x3 LB: > { %s28_s10 = sadd.s32 1, %s2547_s29  ;;  %s31_s11 = sadd.s32 1, %s2551_s30  ;;  %s2555_s9 = sphi %s2610_s9, %s19_s9   ;;  %s2551_s30 = sphi %s2608_s30, %s3102_s30   ;;  %s2547_s29 = sphi %s2606_s29, %s3101_s29   ;;  %s2543_s28 = sphi %s2604_s28, %s3100_s28   ;;  %s2539_s27 = sphi %s2602_s27, %s3099_s27  }
   0x4   : > { %p29_p0 = scmp.ge.s32.totalorder %s28_s10, 4  ;;  %p1990_p1 = scmp.ge.s32.totalorder %s2555_s9, 1 }
   0x5   : > { %p351_p2 = scmp.lt.s32.totalorder %s2555_s9, 9 }
   0x6   : > { %s3104_s10 = smov (%p29_p0, %s28_s10), 0  ;;  %s3106_s11 = smov (!%p29_p0, %s31_s11), %s2551_s30 }
   0x7   : > { %p352_p3 = pnand %p1990_p1, %p351_p2  ;;  %p33_p4 = scmp.ge.s32.totalorder %s3106_s11, 2 }
   0x9   : > { %s3108_s11 = smov (%p33_p4, %s3106_s11), 0  ;;  %355 = sbr.rel (%p352_p3) target bundleno = 548 (0x224), region = 48 }
   0xe   : > { %v2425_v0 = vld [vmem:[%s3078_s3 + $0x78] sm:$0xff]   ;;  %v2429_v4 = vld [vmem:[%s3078_s3 + $0x70] sm:$0xff]   ;;  %v2433_v8 = vld [vmem:[%s3078_s3 + $0x68] sm:$0xff]   ;;  %s2667_s17 = sshll.u32 %s2539_s27, 2  ;;  %p436_p5 = scmp.lt.s32.totalorder %s2543_s28, 1  ;;  %vm605_vm0 = vcmask 1046528  }
   0xf   : > { %v2426_v1 = vld [vmem:[%s3078_s3 + $0xf8] sm:$0xff]   ;;  %2149 = vmatprep.subr.bf16.mxu0 %v2425_v0  ;;  %v2430_v5 = vld [vmem:[%s3078_s3 + $0xf0] sm:$0xff]   ;;  %v2434_v9 = vld [vmem:[%s3078_s3 + $0xe8] sm:$0xff]   ;;  %p438_p6 = scmp.lt.s32.totalorder %s2667_s17, 17  ;;  %s2731_s15 = sadd.s32 4, %s2667_s17 }
  0x10   : > { %v2427_v2 = vld [vmem:[%s3078_s3 + $0x38] sm:$0xff]   ;;  %2189 = vmatprep.subr.bf16.mxu1 %v2426_v1  ;;  %v2431_v6 = vld [vmem:[%s3078_s3 + $0x30] sm:$0xff]   ;;  %v2435_v10 = vld [vmem:[%s3078_s3 + $0x28] sm:$0xff]   ;;  %s3110_s28 = smov (!%p436_p5, %s2543_s28), 1  ;;  %p455_p7 = scmp.lt.s32.totalorder %s2731_s15, 17 }
  0x11   : > { %v2428_v3 = vld [vmem:[%s3078_s3 + $0xb8] sm:$0xff]   ;;  %2150 = vmatpush3.bf16.msra.mxu0 %v2427_v2  ;;  %v2432_v7 = vld [vmem:[%s3078_s3 + $0xb0] sm:$0xff]   ;;  %v2436_v11 = vld [vmem:[%s3078_s3 + $0xa8] sm:$0xff]   ;;  %s439_s18 = scalar_select %p438_p6, %s2667_s17, 17  ;;  %vm552_vm1 = vsmask.f32 7424 }
  0x12   : > { %2190 = vmatpush3.bf16.msra.mxu1 %v2428_v3  ;;  %2151 = vmatprep.subr.bf16.mxu0 %v2429_v4  ;;  %v2437_v12 = vld [vmem:[%s3078_s3 + $0x60] sm:$0xff]   ;;  %v2441_v16 = vld [vmem:[%s3078_s3 + $0x58] sm:$0xff]   ;;  %s2706_s25 = smul.u32 54, %s3110_s28  ;;  %v2445_v20 = vld [vmem:[%s3078_s3 + $0x50] sm:$0xff]   ;;  %s466_s19 = sadd.s32 1, %s2731_s15 }
  0x13   : > { %2191 = vmatprep.subr.bf16.mxu1 %v2430_v5  ;;  %v2438_v13 = vld [vmem:[%s3078_s3 + $0xe0] sm:$0xff]   ;;  %v2442_v17 = vld [vmem:[%s3078_s3 + $0xd8] sm:$0xff]   ;;  %s2381_s13 = smul.u32 3, %s439_s18  ;;  %v2446_v21 = vld [vmem:[%s3078_s3 + $0xd0] sm:$0xff]   ;;  %p2769_p8 = scmp.lt.s32.totalorder %s466_s19, 17 }
  0x14   : > { %v2439_v14 = vld [vmem:[%s3078_s3 + $0x20] sm:$0xff]   ;;  %v2443_v18 = vld [vmem:[%s3078_s3 + $0x18] sm:$0xff]   ;;  %v2447_v22 = vld [vmem:[%s3078_s3 + $0x10] sm:$0xff]   ;;  %s2759_s20 = scalar_select %p455_p7, %s2731_s15, 17 }
  0x15   : > { %2152 = vmatpush3.bf16.msra.mxu0 %v2431_v6  ;;  %v2440_v15 = vld [vmem:[%s3078_s3 + $0xa0] sm:$0xff]   ;;  %v2444_v19 = vld [vmem:[%s3078_s3 + $0x98] sm:$0xff]   ;;  %v2448_v23 = vld [vmem:[%s3078_s3 + $0x90] sm:$0xff]   ;;  %s442_s18 = sadd.s32 %s2706_s25, %s2381_s13  ;;  %s3112_s19 = smov (!%p2769_p8, %s466_s19), 17 }
  0x16   : > { %2192 = vmatpush3.bf16.msra.mxu1 %v2432_v7  ;;  %2153 = vmatprep.subr.bf16.mxu0 %v2433_v8  ;;  %v2449_v24 = vld [vmem:[%s3078_s3 + $0x48] sm:$0xff]   ;;  %s1992_s13 = sshll.u32 %s442_s18, 2  ;;  %v2453_v28 = vld [vmem:[%s3078_s3 + $0x40] sm:$0xff]   ;;  %v2460_v40 = vld [vmem:[%s3078_s3 + $0x178] sm:$0xff]   ;;  %s2383_s16 = smul.u32 3, %s2759_s20 }
  0x17   : > { %2193 = vmatprep.subr.bf16.mxu1 %v2434_v9  ;;  %v2450_v25 = vld [vmem:[%s3078_s3 + $0xc8] sm:$0xff]   ;;  %v2454_v29 = vld [vmem:[%s3078_s3 + $0xc0] sm:$0xff]   ;;  %s2748_s18 = scalar_lea.vmem %s3075_s0, %s1992_s13  ;;  %v2462_v43 = vld [vmem:[%s3078_s3 + $0x1f8] sm:$0xff]   ;;  %s2384_s23 = smul.u32 3, %s3112_s19 }
  0x18   : > { %v2451_v26 = vld [vmem:[%s3078_s3 + $0x8] sm:$0xff]   ;;  %v2455_v30 = vld [vmem:[%s3078_s3] sm:$0xff]   ;;  %v2461_v45 = vld [vmem:[%s3078_s3 + $0x138] sm:$0xff]   ;;  %s2803_s21 = sadd.s32 %s2383_s16, %s2706_s25  ;;  %s1998_s14 = sshll.u32 %s3110_s28, 5 }
  0x19   : > { %2154 = vmatpush3.bf16.msra.mxu0 %v2435_v10  ;;  %v2452_v27 = vld [vmem:[%s3078_s3 + $0x88] sm:$0xff]   ;;  %v2456_v31 = vld [vmem:[%s3078_s3 + $0x80] sm:$0xff]   ;;  %v2463_v47 = vld [vmem:[%s3078_s3 + $0x1b8] sm:$0xff]   ;;  %s1994_s16 = sshll.u32 %s2803_s21, 2  ;;  %p491_p10 = scmp.lt.s32.totalorder %s2539_s27, 3 }
  0x1a   : > { %2194 = vmatpush3.bf16.msra.mxu1 %v2436_v11  ;;  %2155 = vmatprep.subr.bf16.mxu0 %v2437_v12  ;;  %v2457_v32 = vld [vmem:[%s2748_s18] sm:$0xff]   ;;  %v2458_v33 = vld [vmem:[%s2748_s18 + $0x8] ss:$0 sps:$4 sm:$0x11]   ;;  %v2459_v34 = vld [vmem:[%s2748_s18 + $0xc] sm:$0xff]   ;;  %s2879_s22 = scalar_lea.vmem %s3076_s1, %s1994_s16 }
  0x1b   : > { %2195 = vmatprep.subr.bf16.mxu1 %v2438_v13  ;;  %v554_v35 = vshrl.u32 %v2457_v32, 16  ;;  %v556_v36 = vshll.u32 %v2457_v32, 16  ;;  %v561_v37 = vshll.u32 %v2458_v33, 16  ;;  %v606_v38 = vrot.slane %v2457_v32, 1  ;;  %1347 = vmatprep.mubr.bf16.mxu1 %v2459_v34  ;;  %v2464_v51 = vld [vmem:[%s3078_s3 + $0x170] sm:$0xff]   ;;  %v2793_v57 = vld [vmem:[%s2748_s18 + $0x18] sm:$0xff]  }
  0x1c   : > { %v607_v39 = vrot.slane %v2458_v33, 1  ;;  %v566_v48 = vshrl.u32 %v2459_v34, 16  ;;  %v568_v49 = vshll.u32 %v2459_v34, 16  ;;  %v609_v52 = vrot.slane %v2459_v34, 1  ;;  %v2465_v53 = vld [vmem:[%s3078_s3 + $0x130] sm:$0xff]   ;;  %v2470_v62 = vld [vmem:[%s3078_s3 + $0x168] sm:$0xff]  }
  0x1d   : > { %2156 = vmatpush3.bf16.msra.mxu0 %v2439_v14  ;;  %v558_v41 = vrot.slane %v556_v36, 1  ;;  %v563_v42 = vrot.slane %v561_v37, 1  ;;  %v2466_v54 = vld [vmem:[%s3078_s3 + $0x1f0] sm:$0xff]   ;;  %v2471_v1 = vld [vmem:[%s3078_s3 + $0x128] sm:$0xff]   ;;  %v580_v5 = vshll.u32 %v2793_v57, 16  ;;  %v2474_v6 = vld [vmem:[%s3078_s3 + $0x160] sm:$0xff]  }
  0x1e   : > { %2196 = vmatpush3.bf16.msra.mxu1 %v2440_v15  ;;  %2157 = vmatprep.subr.bf16.mxu0 %v2441_v16  ;;  %v608_v44 = vsel %vm605_vm0, %v606_v38, %v607_v39  ;;  %v570_v55 = vrot.slane %v568_v49, 1  ;;  %v2467_v56 = vld [vmem:[%s2748_s18 + $0x14] ss:$0 sps:$4 sm:$0x11]   ;;  %v2472_v2 = vld [vmem:[%s3078_s3 + $0x1e8] sm:$0xff]   ;;  %v578_v7 = vshrl.u32 %v2793_v57, 16 }
  0x1f   : > { %2197 = vmatprep.subr.bf16.mxu1 %v2442_v17  ;;  %v559_v46 = vor.u32 %v558_v41, %v554_v35  ;;  %v573_v59 = vshll.u32 %v2467_v56, 16  ;;  %v2469_v60 = vld [vmem:[%s3078_s3 + $0x1b0] sm:$0xff]   ;;  %v610_v61 = vrot.slane %v2467_v56, 1  ;;  %v2473_v4 = vld [vmem:[%s3078_s3 + $0x1a8] sm:$0xff]   ;;  %v2475_v8 = vld [vmem:[%s3078_s3 + $0x120] sm:$0xff]   ;;  %v582_v9 = vrot.slane %v580_v5, 1 }
  0x20   : > { %v571_v58 = vor.u32 %v570_v55, %v566_v48  ;;  %v2476_v10 = vld [vmem:[%s3078_s3 + $0x1e0] sm:$0xff]   ;;  %v612_v13 = vrot.slane %v2793_v57, 1  ;;  %v2489_v36 = vld [vmem:[%s3078_s3 + $0x190] sm:$0xff]   ;;  %v2490_v38 = vld [vmem:[%s3078_s3 + $0x148] sm:$0xff]  }
  0x21   : > { %2158 = vmatpush3.bf16.msra.mxu0 %v2443_v18  ;;  %v564_v50 = vsel %vm552_vm1, %v559_v46, %v563_v42  ;;  %v575_v63 = vrot.slane %v573_v59, 1  ;;  %v2806_v0 = vsel %vm605_vm0, %v609_v52, %v610_v61  ;;  %v2477_v11 = vld [vmem:[%s2748_s18 + $0x20] ss:$0 sps:$4 sm:$0x11]   ;;  %v2836_v12 = vld [vmem:[%s2748_s18 + $0x24] sm:$0xff]   ;;  %v583_v14 = vor.u32 %v582_v9, %v578_v7  ;;  %v2480_v18 = vld [vmem:[%s3078_s3 + $0x158] sm:$0xff]  }
  0x22   : > { %2198 = vmatpush3.bf16.msra.mxu1 %v2444_v19  ;;  %2159 = vmatprep.subr.bf16.mxu0 %v2445_v20  ;;  %v585_v15 = vshll.u32 %v2477_v11, 16  ;;  %v2479_v16 = vld [vmem:[%s3078_s3 + $0x1a0] sm:$0xff]   ;;  %v613_v17 = vrot.slane %v2477_v11, 1  ;;  %v2481_v20 = vld [vmem:[%s3078_s3 + $0x118] sm:$0xff]   ;;  %v2491_v41 = vld [vmem:[%s3078_s3 + $0x108] sm:$0xff]  }
  0x23   : > { %2199 = vmatprep.subr.bf16.mxu1 %v2446_v21  ;;  %1282 = vmatprep.mubr.bf16.mxu0 %v564_v50  ;;  %v2817_v3 = vsel %vm552_vm1, %v571_v58, %v575_v63  ;;  %v2891_v33 = vld [vmem:[%s2879_s22] sm:$0xff]   ;;  %v2492_v42 = vld [vmem:[%s3078_s3 + $0x1c8] sm:$0xff]   ;;  %v2498_v49 = vld [vmem:[%s3078_s3 + $0x238] sm:$0xff]  }
  0x24   : > { %v587_v19 = vrot.slane %v585_v15, 1  ;;  %v2850_v21 = vsel %vm605_vm0, %v612_v13, %v613_v17  ;;  %v2495_v46 = vld [vmem:[%s3078_s3 + $0x100] sm:$0xff]   ;;  %v634_v50 = vshll.u32 %v2891_v33, 16  ;;  %v632_v52 = vshrl.u32 %v2891_v33, 16  ;;  %v2500_v55 = vld [vmem:[%s3078_s3 + $0x228] sm:$0xff]   ;;  %v2510_v17 = vld [vmem:[%s3081_s6 + $0x30] sm:$0xff]  }
  0x25   : > { %2160 = vmatpush3.bf16.msra.mxu0 %v2447_v22  ;;  %v2482_v22 = vld [vmem:[%s3078_s3 + $0x1d8] sm:$0xff]   ;;  %v2497_v48 = vld [vmem:[%s3078_s3 + $0x180] sm:$0xff]   ;;  %v2505_v11 = vld [vmem:[%s3078_s3 + $0x208] sm:$0xff]  }
  0x26   : > { %2200 = vmatpush3.bf16.msra.mxu1 %v2448_v23  ;;  %2161 = vmatprep.subr.bf16.mxu0 %v2449_v24  ;;  %v2862_v23 = vsel %vm552_vm1, %v583_v14, %v587_v19  ;;  %v2483_v24 = vld [vmem:[%s3078_s3 + $0x198] sm:$0xff]   ;;  %v2501_v63 = vld [vmem:[%s3078_s3 + $0x220] sm:$0xff]  }
  0x27   : > { %2201 = vmatprep.subr.bf16.mxu1 %v2450_v25  ;;  %v592_v25 = vshll.u32 %v2836_v12, 16  ;;  %v2512_v19 = vld [vmem:[%s3081_s6 + $0x20] sm:$0xff]  }
  0x29   : > { %2162 = vmatpush3.bf16.msra.mxu0 %v2451_v26  ;;  %v2484_v26 = vld [vmem:[%s3078_s3 + $0x150] sm:$0xff]  }
  0x2a   : > { %2202 = vmatpush3.bf16.msra.mxu1 %v2452_v27  ;;  %2163 = vmatprep.subr.bf16.mxu0 %v2453_v28  ;;  %v590_v27 = vshrl.u32 %v2836_v12, 16  ;;  %v2485_v28 = vld [vmem:[%s3078_s3 + $0x110] sm:$0xff]  }
  0x2b   : > { %2203 = vmatprep.subr.bf16.mxu1 %v2454_v29  ;;  %v594_v29 = vrot.slane %v592_v25, 1 }
  0x2d   : > { %2164 = vmatpush3.bf16.msra.mxu0 %v2455_v30  ;;  %v2486_v30 = vld [vmem:[%s3078_s3 + $0x1d0] sm:$0xff]  }
  0x2e   : > { %2204 = vmatpush3.bf16.msra.mxu1 %v2456_v31  ;;  %2229 = vmatprep.subr.bf16.mxu0 %v2460_v40  ;;  %v615_v31 = vrot.slane %v2836_v12, 1 }
  0x2f   : > { %2269 = vmatprep.subr.bf16.mxu1 %v2462_v43 }
  0x30   : > { %1283 = vmatmul.mubr.bf16.vlgmr.msra.gmra.mxu0 %v2457_v32  ;;  %v2487_v32 = vld [vmem:[%s2748_s18 + $0x2c] ss:$0 sps:$4 sm:$0x11]   ;;  %s473_s18 = sadd.s32 %s2384_s23, %s2706_s25 }
  0x31   : > { %1348 = vmatmul.mubr.bf16.vlgmr.msra.gmra.mxu1 %v608_v44  ;;  %2230 = vmatpush3.bf16.msra.mxu0 %v2461_v45  ;;  %v597_v35 = vshll.u32 %v2487_v32, 16  ;;  %v616_v37 = vrot.slane %v2487_v32, 1  ;;  %v2493_v44 = vld [vmem:[%s3078_s3 + $0x188] sm:$0xff]   ;;  %v2494_v45 = vld [vmem:[%s3078_s3 + $0x140] sm:$0xff]   ;;  %s1996_s26 = sshll.u32 %s473_s18, 2 }
  0x32   : > { %2270 = vmatpush3.bf16.msra.mxu1 %v2463_v47  ;;  %2231 = vmatprep.subr.bf16.mxu0 %v2464_v51  ;;  %v2496_v47 = vld [vmem:[%s3078_s3 + $0x1c0] sm:$0xff]   ;;  %v2499_v51 = vld [vmem:[%s3078_s3 + $0x230] sm:$0xff]   ;;  %s475_s19 = scalar_lea.vmem %s3077_s2, %s1996_s26  ;;  %s2000_s26 = sshll.u32 %s3110_s28, 2 }
  0x33   : > { %2271 = vmatprep.subr.bf16.mxu1 %v2466_v54  ;;  %1355 = vmatprep.mubr.bf16.mxu1 %v2793_v57  ;;  %v599_v39 = vrot.slane %v597_v35, 1  ;;  %v2901_v40 = vsel %vm605_vm0, %v615_v31, %v616_v37  ;;  %v2503_v54 = vld [vmem:[%s2879_s22 + $0x8] ss:$0 sps:$4 sm:$0x11]   ;;  %v2506_v58 = vld [vmem:[%s475_s19] sm:$0xff]   ;;  %s1997_s22 = sshll.u32 %s2539_s27, 3 }
  0x34   : > { %1290 = vmatprep.mubr.bf16.mxu0 %v2817_v3  ;;  %v639_v56 = vshll.u32 %v2503_v54, 16  ;;  %v2507_v61 = vld [vmem:[%s475_s19 + $0x8] ss:$0 sps:$4 sm:$0x11]   ;;  %v645_v5 = vrot.slane %v2503_v54, 1  ;;  %v670_v13 = vrot.slane %v2506_v58, 1 }
  0x35   : > { %2232 = vmatpush3.bf16.msra.mxu0 %v2465_v53  ;;  %v636_v53 = vrot.slane %v634_v50, 1  ;;  %v671_v14 = vrot.slane %v2507_v61, 1  ;;  %p482_p9 = scmp.lt.s32.totalorder %s1997_s22, 31  ;;  %s3116_s27 = smov (!%p491_p10, %s2539_s27), 3 }
  0x36   : > { %2272 = vmatpush3.bf16.msra.mxu1 %v2469_v60  ;;  %2233 = vmatprep.subr.bf16.mxu0 %v2470_v62  ;;  %v641_v60 = vrot.slane %v639_v56, 1  ;;  %v660_v62 = vshll.u32 %v2506_v58, 16  ;;  %s494_s20 = sadd.s32 %s2000_s26, %s3116_s27 }
  0x37   : > { %2273 = vmatprep.subr.bf16.mxu1 %v2472_v2  ;;  %v637_v59 = vor.u32 %v636_v53, %v632_v52  ;;  %v665_v2 = vshll.u32 %v2507_v61, 16  ;;  %v672_v15 = vsel %vm605_vm0, %v670_v13, %v671_v14  ;;  %s3114_s22 = smov (!%p482_p9, %s1997_s22), 31  ;;  %s2001_s25 = sshll.u32 %s494_s20, 3 }
  0x38   : > { %1291 = vmatmul.mubr.bf16.gmra.mxu0 %v2459_v34  ;;  %v595_v34 = vor.u32 %v594_v29, %v590_v27  ;;  %s485_s18 = sadd.s32 %s1998_s14, %s3114_s22  ;;  %s496_s19 = scalar_lea.vmem %s3083_s8, %s2001_s25 }
  0x39   : > { %1356 = vmatmul.mubr.bf16.gmra.mxu1 %v2806_v0  ;;  %2234 = vmatpush3.bf16.msra.mxu0 %v2471_v1  ;;  %v662_v1 = vrot.slane %v660_v62, 1  ;;  %s1999_s15 = sshll.u32 %s485_s18, 2 }
  0x3a   : > { %2274 = vmatpush3.bf16.msra.mxu1 %v2473_v4  ;;  %2235 = vmatprep.subr.bf16.mxu0 %v2474_v6  ;;  %v2912_v43 = vsel %vm552_vm1, %v595_v34, %v599_v39  ;;  %v2502_v4 = vld [vmem:[%s3078_s3 + $0x218] sm:$0xff]   ;;  %v667_v6 = vrot.slane %v665_v2, 1  ;;  %s487_s24 = scalar_lea.vmem %s3082_s7, %s1999_s15 }
  0x3b   : > { %2275 = vmatprep.subr.bf16.mxu1 %v2476_v10  ;;  %1363 = vmatprep.mubr.bf16.mxu1 %v2836_v12 }
  0x3c   : > { %1298 = vmatprep.mubr.bf16.mxu0 %v2862_v23 }
  0x3d   : > { %2236 = vmatpush3.bf16.msra.mxu0 %v2475_v8  ;;  %v2504_v8 = vld [vmem:[%s3078_s3 + $0x210] sm:$0xff]  }
  0x3e   : > { %2276 = vmatpush3.bf16.msra.mxu1 %v2479_v16  ;;  %2237 = vmatprep.subr.bf16.mxu0 %v2480_v18  ;;  %v2509_v16 = vld [vmem:[%s3081_s6 + $0x38] sm:$0xff]   ;;  %v2511_v18 = vld [vmem:[%s3081_s6 + $0x28] sm:$0xff]  }
  0x3f   : > { %2277 = vmatprep.subr.bf16.mxu1 %v2482_v22  ;;  %v2515_v22 = vld [vmem:[%s3081_s6 + $0x8] sm:$0xff]  }
  0x40   : > { %1299 = vmatmul.mubr.bf16.gmra.mxu0 %v2793_v57 }
  0x41   : > { %1364 = vmatmul.mubr.bf16.gmra.mxu1 %v2850_v21  ;;  %2238 = vmatpush3.bf16.msra.mxu0 %v2481_v20  ;;  %v2513_v20 = vld [vmem:[%s3081_s6 + $0x18] sm:$0xff]  }
  0x42   : > { %2278 = vmatpush3.bf16.msra.mxu1 %v2483_v24  ;;  %2239 = vmatprep.subr.bf16.mxu0 %v2484_v26 }
  0x43   : > { %2279 = vmatprep.subr.bf16.mxu1 %v2486_v30  ;;  %1371 = vmatprep.mubr.bf16.mxu1 %v2891_v33 }
  0x44   : > { %1306 = vmatprep.mubr.bf16.mxu0 %v2912_v43 }
  0x45   : > { %2240 = vmatpush3.bf16.msra.mxu0 %v2485_v28 }
  0x46   : > { %2280 = vmatpush3.bf16.msra.mxu1 %v2489_v36  ;;  %2241 = vmatprep.subr.bf16.mxu0 %v2490_v38 }
  0x47   : > { %2281 = vmatprep.subr.bf16.mxu1 %v2492_v42 }
  0x48   : > { %1307 = vmatmul.mubr.bf16.gmra.mxu0 %v2836_v12 }
  0x49   : > { %1372 = vmatmul.mubr.bf16.gmra.mxu1 %v2901_v40  ;;  %2242 = vmatpush3.bf16.msra.mxu0 %v2491_v41 }
  0x4a   : > { %1477 = vmatprep.mubr.bf16.mxu1 %v2862_v23  ;;  %2282 = vmatpush3.bf16.msra.mxu1 %v2493_v44 }
  0x4b   : > { %2243 = vmatprep.subr.bf16.mxu0 %v2494_v45  ;;  %1412 = vmatprep.mubr.bf16.mxu0 %v2806_v0  ;;  %v658_v0 = vshrl.u32 %v2506_v58, 16 }
  0x4c   : > { %2283 = vmatprep.subr.bf16.mxu1 %v2496_v47 }
  0x4d   : > { %2244 = vmatpush3.bf16.msra.mxu0 %v2495_v46  ;;  %v663_v7 = vor.u32 %v662_v1, %v658_v0 }
  0x4e   : > { %2284 = vmatpush3.bf16.msra.mxu1 %v2497_v48  ;;  %2333 = vmatprep.subr.bf16.mxu0 %v2498_v49 }
  0x4f   : > { %v668_v10 = vsel %vm552_vm1, %v663_v7, %v667_v6  ;;  %2357 = vmatprep.subr.bf16.mxu1 %v2509_v16 }
  0x50   : > { %1413 = vmatmul.mubr.bf16.vlgmr.msra.gmra.mxu0 %v2817_v3  ;;  %v642_v3 = vsel %vm552_vm1, %v637_v59, %v641_v60 }
  0x51   : > { %1478 = vmatmul.mubr.bf16.vlgmr.msra.gmra.mxu1 %v2793_v57  ;;  %2334 = vmatpush3.bf16.msra.mxu0 %v2498_v49  ;;  %v644_v57 = vrot.slane %v2891_v33, 1 }
  0x52   : > { %1420 = vmatprep.mubr.bf16.mxu0 %v2850_v21  ;;  %2335 = vmatprep.subr.bf16.mxu0 %v2499_v51 }
  0x53   : > { %1485 = vmatprep.mubr.bf16.mxu1 %v2912_v43  ;;  %v646_v9 = vsel %vm605_vm0, %v644_v57, %v645_v5  ;;  %2358 = vmatpush3.bf16.msra.mxu1 %v2509_v16 }
  0x54   : > { %2359 = vmatprep.subr.bf16.mxu1 %v2510_v17 }
  0x55   : > { %2336 = vmatpush3.bf16.msra.mxu0 %v2499_v51 }
  0x56   : > { %2337 = vmatprep.subr.bf16.mxu0 %v2500_v55 }
  0x57   : > { %2360 = vmatpush3.bf16.msra.mxu1 %v2510_v17 }
  0x58   : > { %1421 = vmatmul.mubr.bf16.gmra.mxu0 %v2862_v23  ;;  %2361 = vmatprep.subr.bf16.mxu1 %v2511_v18  ;;  %v2516_v23 = vld [vmem:[%s3081_s6] sm:$0xff]  }
  0x59   : > { %1486 = vmatmul.mubr.bf16.gmra.mxu1 %v2836_v12  ;;  %2338 = vmatpush3.bf16.msra.mxu0 %v2500_v55  ;;  %v2508_v12 = vld [vmem:[%s3078_s3 + $0x200] sm:$0xff]  }
  0x5a   : > { %1428 = vmatprep.mubr.bf16.mxu0 %v2901_v40  ;;  %2339 = vmatprep.subr.bf16.mxu0 %v2501_v63 }
  0x5b   : > { %1493 = vmatprep.mubr.bf16.mxu1 %v642_v3  ;;  %2362 = vmatpush3.bf16.msra.mxu1 %v2511_v18 }
  0x5c   : > { %2363 = vmatprep.subr.bf16.mxu1 %v2512_v19 }
  0x5d   : > { %2340 = vmatpush3.bf16.msra.mxu0 %v2501_v63 }
  0x5e   : > { %2341 = vmatprep.subr.bf16.mxu0 %v2502_v4 }
  0x5f   : > { %2364 = vmatpush3.bf16.msra.mxu1 %v2512_v19 }
  0x60   : > { %1429 = vmatmul.mubr.bf16.gmra.mxu0 %v2912_v43  ;;  %2365 = vmatprep.subr.bf16.mxu1 %v2513_v20 }
  0x61   : > { %1494 = vmatmul.mubr.bf16.gmra.mxu1 %v2891_v33  ;;  %2342 = vmatpush3.bf16.msra.mxu0 %v2502_v4 }
  0x62   : > { %1436 = vmatprep.mubr.bf16.mxu0 %v646_v9  ;;  %2343 = vmatprep.subr.bf16.mxu0 %v2504_v8 }
  0x63   : > { %1501 = vmatprep.mubr.bf16.mxu1 %v668_v10  ;;  %2366 = vmatpush3.bf16.msra.mxu1 %v2513_v20 }
  0x65   : > { %2344 = vmatpush3.bf16.msra.mxu0 %v2504_v8 }
  0x66   : > { %2345 = vmatprep.subr.bf16.mxu0 %v2505_v11 }
  0x68   : > { %1437 = vmatmul.mubr.bf16.gmra.mxu0 %v642_v3 }
  0x69   : > { %1502 = vmatmul.mubr.bf16.gmra.mxu1 %v2506_v58  ;;  %2346 = vmatpush3.bf16.msra.mxu0 %v2505_v11 }
  0x6a   : > { %2349 = vmatprep.mubr.bf16.mxu0 %v2850_v21  ;;  %2347 = vmatprep.subr.bf16.mxu0 %v2508_v12  ;;  %v2514_v21 = vld [vmem:[%s3081_s6 + $0x10] sm:$0xff]  }
  0x6b   : > { %2367 = vmatprep.subr.bf16.mxu1 %v2514_v21 }
  0x6c   : > { %2368 = vmatpush3.bf16.msra.mxu1 %v2514_v21 }
  0x6d   : > { %2348 = vmatpush3.bf16.msra.mxu0 %v2508_v12  ;;  %2369 = vmatprep.subr.bf16.mxu1 %v2515_v22 }
  0x70   : > { %2350 = vmatmul.mubr.bf16.vlgmr.msra.gmra.mxu0 %v2901_v40  ;;  %2370 = vmatpush3.bf16.msra.mxu1 %v2515_v22 }
  0x71   : > { %2353 = vmatprep.mubr.bf16.mxu0 %v646_v9  ;;  %2371 = vmatprep.subr.bf16.mxu1 %v2516_v23 }
  0x74   : > { %2372 = vmatpush3.bf16.msra.mxu1 %v2516_v23 }
  0x78   : > { %2354 = vmatmul.mubr.bf16.gmra.mxu0 %v672_v15 }
  0xf0   : > { %v2165_v26 = vpop.f32.mrf.mxu0 }
  0xf1   : > { %v2205_v24 = vpop.f32.mrf.mxu1 }
  0xf2   : > { %v2166_v28 = vpop.f32.mrf.mxu0 }
  0xf3   : > { %v2206_v25 = vpop.f32.mrf.mxu1  ;;  %v2167_v18 = vadd.f32 %v2166_v28, %v2165_v26 }
  0xf4   : > { %v3008_v30 = vpop.f32.mrf.mxu0  ;;  %v2207_v19 = vadd.f32 %v2206_v25, %v2205_v24 }
  0xf5   : > { %v3004_v27 = vpop.f32.mrf.mxu1 }
  0xf6   : > { %v2169_v32 = vpop.f32.mrf.mxu0 }
  0xf7   : > { %v3006_v29 = vpop.f32.mrf.mxu1 }
  0xf8   : > { %v2171_v34 = vpop.f32.mrf.mxu0 }
  0xf9   : > { %v2211_v31 = vpop.f32.mrf.mxu1 }
  0xfa   : > { %v2172_v36 = vpop.f32.mrf.mxu0 }
  0xfb   : > { %v2212_v33 = vpop.f32.mrf.mxu1  ;;  %v2173_v14 = vadd.f32 %v2172_v36, %v2171_v34  ;;  %v2210_v34 = vadd.f32 %v3006_v29, %v3004_v27 }
  0xfc   : > { %v2174_v38 = vpop.f32.mrf.mxu0  ;;  %v2213_v15 = vadd.f32 %v2212_v33, %v2211_v31 }
  0xfd   : > { %v2214_v35 = vpop.f32.mrf.mxu1 }
  0xfe   : > { %v2175_v39 = vpop.f32.mrf.mxu0 }
  0xff   : > { %v2215_v37 = vpop.f32.mrf.mxu1  ;;  %v2176_v22 = vadd.f32 %v2175_v39, %v2174_v38 }
 0x100   : > { %v2177_v41 = vpop.f32.mrf.mxu0  ;;  %v2216_v23 = vadd.f32 %v2215_v37, %v2214_v35 }
 0x101   : > { %v2217_v40 = vpop.f32.mrf.mxu1 }
 0x102   : > { %v2178_v43 = vpop.f32.mrf.mxu0  ;;  %v1361_v25 = vadd.f32 %v2216_v23, %v2176_v22  ;;  %v2087_v23 = vld [vmem:[%s3080_s5] ss:$0 sm:$0xff] }
 0x103   : > { %v2218_v42 = vpop.f32.mrf.mxu1  ;;  %v2179_v33 = vadd.f32 %v2178_v43, %v2177_v41 }
 0x104   : > { %v3012_v45 = vpop.f32.mrf.mxu0  ;;  %v2219_v36 = vadd.f32 %v2218_v42, %v2217_v40 }
 0x105   : > { %v3010_v44 = vpop.f32.mrf.mxu1  ;;  %3085 = vst [vmem:[#allocation2_spill] sm:$0xff] %v3012_v45 }
 0x106   : > { %v3016_v47 = vpop.f32.mrf.mxu0 }
 0x107   : > { %v3014_v46 = vpop.f32.mrf.mxu1  ;;  %3086 = vst [vmem:[#allocation3_spill] sm:$0xff] %v3016_v47 }
 0x108   : > { %v2183_v50 = vpop.f32.mrf.mxu0  ;;  %v2222_v40 = vadd.f32 %v3014_v46, %v3010_v44  ;;  %v2086_v44 = vld [vmem:[%s3079_s4] ss:$0 sm:$0xff] }
 0x109   : > { %v2223_v48 = vpop.f32.mrf.mxu1 }
 0x10a   : > { %v2184_v51 = vpop.f32.mrf.mxu0 }
 0x10b   : > { %v2224_v49 = vpop.f32.mrf.mxu1  ;;  %v2185_v39 = vadd.f32 %v2184_v51, %v2183_v50 }
 0x10c   : > { %v3020_v53 = vpop.f32.mrf.mxu0 }
 0x10d   : > { %v3018_v52 = vpop.f32.mrf.mxu1  ;;  %3088 = vst [vmem:[#allocation5_spill] sm:$0xff] %v3020_v53  ;;  %v2170_v53 = vadd.f32 %v2169_v32, %v3008_v30  ;;  %v1366_v32 = vadd.f32 %v2219_v36, %v2179_v33 }
 0x10e   : > { %3087 = vst [vmem:[#allocation4_spill] sm:$0xff] %v3018_v52  ;;  %v3022_v54 = vpop.f32.mrf.mxu0 }
 0x10f   : > { %3089 = vst [vmem:[#allocation6_spill] sm:$0xff] %v3022_v54  ;;  %v3024_v55 = vpop.f32.mrf.mxu1  ;;  %v1350_v54 = vadd.f32 %v2207_v19, %v2167_v18 }
 0x110   : > { %3090 = vst [vmem:[#allocation7_spill] sm:$0xff] %v3024_v55  ;;  %v2245_v56 = vpop.f32.mrf.mxu0  ;;  %v1358_v55 = vadd.f32 %v2213_v15, %v2173_v14 }
 0x111   : > { %v2285_v58 = vpop.f32.mrf.mxu1 }
 0x112   : > { %v2246_v59 = vpop.f32.mrf.mxu0 }
 0x113   : > { %v2286_v60 = vpop.f32.mrf.mxu1  ;;  %v2247_v47 = vadd.f32 %v2246_v59, %v2245_v56  ;;  %v2225_v56 = vadd.f32 %v2224_v49, %v2223_v48 }
 0x114   : > { %v2248_v61 = vpop.f32.mrf.mxu0  ;;  %v2287_v38 = vadd.f32 %v2286_v60, %v2285_v58  ;;  %v3092_v58 = vld [vmem:[#allocation5_spill] sm:$0xff] }
 0x115   : > { %v2288_v62 = vpop.f32.mrf.mxu1  ;;  %v1415_v28 = vadd.f32 %v2247_v47, %v1350_v54  ;;  %v3094_v49 = vld [vmem:[#allocation4_spill] sm:$0xff] }
 0x116   : > { %v2249_v57 = vpop.f32.mrf.mxu0  ;;  %v3093_v50 = vld [vmem:[#allocation6_spill] sm:$0xff] }
 0x117   : > { %v2289_v63 = vpop.f32.mrf.mxu1  ;;  %v2250_v35 = vadd.f32 %v2249_v57, %v2248_v61  ;;  %v1480_v54 = vadd.f32 %v2287_v38, %v1415_v28  ;;  %v2188_v48 = vadd.f32 %v3093_v50, %v3092_v58  ;;  %v3095_v51 = vld [vmem:[#allocation7_spill] sm:$0xff]  ;;  %v3096_v57 = vld [vmem:[#allocation2_spill] sm:$0xff] }
 0x118   : > { %v2251_v0 = vpop.f32.mrf.mxu0  ;;  %v2290_v43 = vadd.f32 %v2289_v63, %v2288_v62 }
 0x119   : > { %v2291_v1 = vpop.f32.mrf.mxu1 }
 0x11a   : > { %v2252_v2 = vpop.f32.mrf.mxu0 }
 0x11b   : > { %v2292_v3 = vpop.f32.mrf.mxu1  ;;  %v2253_v20 = vadd.f32 %v2252_v2, %v2251_v0  ;;  %v1353_v0 = vadd.f32 %v2210_v34, %v2170_v53  ;;  %v2228_v53 = vadd.f32 %v3095_v51, %v3094_v49 }
 0x11c   : > { %v2254_v4 = vpop.f32.mrf.mxu0  ;;  %v2293_v26 = vadd.f32 %v2292_v3, %v2291_v1 }
 0x11d   : > { %v2294_v5 = vpop.f32.mrf.mxu1  ;;  %v1418_v42 = vadd.f32 %v2250_v35, %v1353_v0  ;;  %v1377_v19 = vadd.f32 %v2228_v53, %v2188_v48 }
 0x11e   : > { %v2255_v6 = vpop.f32.mrf.mxu0 }
 0x11f   : > { %v2295_v7 = vpop.f32.mrf.mxu1  ;;  %v2256_v31 = vadd.f32 %v2255_v6, %v2254_v4  ;;  %v1483_v18 = vadd.f32 %v2290_v43, %v1418_v42 }
 0x120   : > { %v2257_v8 = vpop.f32.mrf.mxu0  ;;  %v2296_v30 = vadd.f32 %v2295_v7, %v2294_v5 }
 0x121   : > { %v2297_v9 = vpop.f32.mrf.mxu1  ;;  %v1426_v2 = vadd.f32 %v2256_v31, %v1361_v25 }
 0x122   : > { %v2258_v10 = vpop.f32.mrf.mxu0 }
 0x123   : > { %v2298_v11 = vpop.f32.mrf.mxu1  ;;  %v2259_v14 = vadd.f32 %v2258_v10, %v2257_v8  ;;  %v1491_v62 = vadd.f32 %v2296_v30, %v1426_v2 }
 0x124   : > { %v2260_v12 = vpop.f32.mrf.mxu0  ;;  %v2299_v3 = vadd.f32 %v2298_v11, %v2297_v9 }
 0x125   : > { %v3026_v13 = vpop.f32.mrf.mxu1  ;;  %v1431_v63 = vadd.f32 %v2259_v14, %v1366_v32 }
 0x126   : > { %v2261_v16 = vpop.f32.mrf.mxu0 }
 0x127   : > { %v3028_v17 = vpop.f32.mrf.mxu1  ;;  %v2262_v8 = vadd.f32 %v2261_v16, %v2260_v12  ;;  %v1496_v36 = vadd.f32 %v2299_v3, %v1431_v63 }
 0x128   : > { %3091 = vst [vmem:[#allocation8_spill] sm:$0xff] %v3028_v17  ;;  %v2263_v21 = vpop.f32.mrf.mxu0  ;;  %v1423_v17 = vadd.f32 %v2253_v20, %v1358_v55  ;;  %v1374_v55 = vadd.f32 %v2225_v56, %v2185_v39 }
 0x129   : > { %v2303_v45 = vpop.f32.mrf.mxu1 }
 0x12a   : > { %v2264_v52 = vpop.f32.mrf.mxu0  ;;  %v1488_v29 = vadd.f32 %v2293_v26, %v1423_v17 }
 0x12b   : > { %v2304_v37 = vpop.f32.mrf.mxu1  ;;  %v2265_v27 = vadd.f32 %v2264_v52, %v2263_v21  ;;  %v3097_v52 = vld [vmem:[#allocation3_spill] sm:$0xff] }
 0x12c   : > { %v2266_v24 = vpop.f32.mrf.mxu0  ;;  %v2182_v1 = vadd.f32 %v3097_v52, %v3096_v57  ;;  %v2305_v5 = vadd.f32 %v2304_v37, %v2303_v45 }
 0x12d   : > { %v2306_v47 = vpop.f32.mrf.mxu1  ;;  %v1439_v4 = vadd.f32 %v2265_v27, %v1374_v55 }
 0x12e   : > { %v2267_v59 = vpop.f32.mrf.mxu0  ;;  %v1369_v9 = vadd.f32 %v2222_v40, %v2182_v1 }
 0x12f   : > { %v2268_v6 = vadd.f32 %v2267_v59, %v2266_v24  ;;  %v2307_v10 = vpop.f32.mrf.mxu1  ;;  %v3098_v11 = vld [vmem:[#allocation8_spill] sm:$0xff]  ;;  %v1504_v12 = vadd.f32 %v2305_v5, %v1439_v4 }
 0x130   : > { %v2351_v41 = vpop.f32.mrf.mxu0  ;;  %v2302_v22 = vadd.f32 %v3098_v11, %v3026_v13  ;;  %v2308_v33 = vadd.f32 %v2307_v10, %v2306_v47  ;;  %v1434_v26 = vadd.f32 %v2262_v8, %v1369_v9 }
 0x131   : > { %v1553_v60 = vadd.f32 %v2351_v41, %v1488_v29  ;;  %v1442_v31 = vadd.f32 %v2268_v6, %v1377_v19 }
 0x132   : > { %v1544_v61 = vpop.f32.mrf.mxu0  ;;  %v1499_v14 = vadd.f32 %v2302_v22, %v1434_v26 }
 0x133   : > { %v1545_v46 = vadd.f32 %v1544_v61, %v1480_v54  ;;  %v1584_v20 = vmul.f32 %v2086_v44, %v1553_v60  ;;  %v1507_v59 = vadd.f32 %v2308_v33, %v1442_v31 }
 0x134   : > { %v2352_v7 = vpop.f32.mrf.mxu0 }
 0x135   : > { %v1582_v15 = vmul.f32 %v2086_v44, %v1545_v46  ;;  %v1556_v17 = vadd.f32 %v2352_v7, %v1491_v62  ;;  %v1599_v38 = vadd.f32 %v2087_v23, %v1584_v20 }
 0x136   : > { %v1547_v21 = vpop.f32.mrf.mxu0 }
 0x137   : > { %v1585_v34 = vmul.f32 %v2086_v44, %v1556_v17  ;;  %v1548_v45 = vadd.f32 %v1547_v21, %v1483_v18  ;;  %v1597_v24 = vadd.f32 %v2087_v23, %v1582_v15  ;;  %v1607_v27 = vmax.f32 %v1599_v38, 0.0 }
 0x138   : > { %v2355_v16 = vpop.f32.mrf.mxu0 }
 0x139   : > { %v1600_v25 = vadd.f32 %v2087_v23, %v1585_v34  ;;  %v1583_v28 = vmul.f32 %v2086_v44, %v1548_v45  ;;  %v1569_v35 = vadd.f32 %v2355_v16, %v1504_v12  ;;  %v1605_v2 = vmax.f32 %v1597_v24, 0.0 }
 0x13a   : > { %v1560_v37 = vpop.f32.mrf.mxu0 }
 0x13b   : > { %v1598_v39 = vadd.f32 %v2087_v23, %v1583_v28  ;;  %v1561_v13 = vadd.f32 %v1560_v37, %v1496_v36  ;;  %v1608_v56 = vmax.f32 %v1600_v25, 0.0  ;;  %v1588_v29 = vmul.f32 %v2086_v44, %v1569_v35 }
 0x13c   : > { %v2356_v0 = vpop.f32.mrf.mxu0 }
 0x13d   : > { %v1606_v30 = vmax.f32 %v1598_v39, 0.0  ;;  %v1586_v32 = vmul.f32 %v2086_v44, %v1561_v13  ;;  %v1572_v41 = vadd.f32 %v2356_v0, %v1507_v59  ;;  %v1614_v47 = vpack.c.bf16 %v1608_v56, %v1607_v27 }
 0x13e   : > { %v1563_v40 = vpop.f32.mrf.mxu0  ;;  %v1603_v50 = vadd.f32 %v2087_v23, %v1588_v29 }
 0x13f   : > { %v1564_v42 = vadd.f32 %v1563_v40, %v1499_v14  ;;  %v1613_v43 = vpack.c.bf16 %v1606_v30, %v1605_v2  ;;  %v1589_v54 = vmul.f32 %v2086_v44, %v1572_v41  ;;  %v1601_v55 = vadd.f32 %v2087_v23, %v1586_v32 }
 0x140   : > { %v1611_v61 = vmax.f32 %v1603_v50, 0.0 }
 0x141   : > { %v1587_v58 = vmul.f32 %v2086_v44, %v1564_v42  ;;  %2373 = vmatprep.mubr.bf16.mxu1 %v1613_v43  ;;  %v1604_v48 = vadd.f32 %v2087_v23, %v1589_v54  ;;  %v1609_v53 = vmax.f32 %v1601_v55, 0.0 }
 0x142   : > { %2374 = vmatmul.mubr.bf16.vlgmr.msra.gmra.mxu1 %v1614_v47 }
 0x143   : > { %v1602_v49 = vadd.f32 %v2087_v23, %v1587_v58  ;;  %v1612_v51 = vmax.f32 %v1604_v48, 0.0 }
 0x145   : > { %v1610_v60 = vmax.f32 %v1602_v49, 0.0  ;;  %v1616_v52 = vpack.c.bf16 %v1612_v51, %v1611_v61 }
 0x147   : > { %v1615_v57 = vpack.c.bf16 %v1610_v60, %v1609_v53 }
 0x149   : > { %2377 = vmatprep.mubr.bf16.mxu1 %v1615_v57 }
 0x14a   : > { %2378 = vmatmul.mubr.bf16.gmra.mxu1 %v1616_v52 }
 0x202   : > { %v2375_v1 = vpop.f32.mrf.mxu1 }
 0x204   : > { %v1715_v3 = vpop.f32.mrf.mxu1 }
 0x206   : > { %v2376_v44 = vpop.f32.mrf.mxu1 }
 0x207   : > { %v2134_v46 = vpack.c.bf16 %v2376_v44, %v2375_v1 }
 0x208   : > { %v1718_v62 = vpop.f32.mrf.mxu1 }
 0x209   : > { %2146 = vst [vmem:[%s487_s24 + $0x8] sm:$0xff] %v2134_v46   ;;  %v2129_v63 = vpack.c.bf16 %v1718_v62, %v1715_v3  ;;  %v1786_v4 = vadd.f32 %v1718_v62, %v1715_v3 }
 0x20a   : > { %v2379_v5 = vpop.f32.mrf.mxu1 }
 0x20b   : > { %2130 = vst [vmem:[%s487_s24] sm:$0xff] %v2129_v63   ;;  %v1787_v6 = vadd.f32 %v2375_v1, %v1786_v4 }
 0x20c   : > { %v1731_v7 = vpop.f32.mrf.mxu1 }
 0x20d   : > { %v1788_v8 = vadd.f32 %v2376_v44, %v1787_v6 }
 0x20e   : > { %v2380_v10 = vpop.f32.mrf.mxu1 }
 0x20f   : > { %v1789_v15 = vadd.f32 %v1788_v8, %v1731_v7  ;;  %v2144_v17 = vpack.c.bf16 %v2380_v10, %v2379_v5 }
 0x210   : > { %v1734_v18 = vpop.f32.mrf.mxu1 }
 0x211   : > { %2148 = vst [vmem:[%s487_s24 + $0x18] sm:$0xff] %v2144_v17   ;;  %v2139_v19 = vpack.c.bf16 %v1734_v18, %v1731_v7  ;;  %v1790_v20 = vadd.f32 %v1789_v15, %v1734_v18 }
 0x213   : > { %2147 = vst [vmem:[%s487_s24 + $0x10] sm:$0xff] %v2139_v19   ;;  %v1791_v21 = vadd.f32 %v2379_v5, %v1790_v20 }
 0x215   : > { %v1792_v9 = vadd.f32 %v2380_v10, %v1791_v21 }
 0x217   : > { %v1793_v11 = vrot.slane %v1792_v9, 4 }
 0x219   : > { %v1794_v22 = vadd.f32 %v1793_v11, %v1792_v9 }
 0x21b   : > { %v1795_v23 = vrot.slane %v1794_v22, 2 }
 0x21d   : > { %v1796_v34 = vadd.f32 %v1795_v23, %v1794_v22 }
 0x21f   : > { %v1797_v45 = vrot.slane %v1796_v34, 1 }
 0x221   : > { %v1798_v31 = vadd.f32 %v1797_v45, %v1796_v34 }
 0x223   : > { %1799 = vst [vmem:[%s496_s19] sm:$0xff] %v1798_v31 }
 0x224 PF: > { %s19_s9 = sadd.s32 1, %s2555_s9   ;;  %s3099_s27 = smov %s2547_s29 }
 0x225   : > { %p16_p11 = scmp.ge.s32.totalorder %s19_s9, 10   ;;  %s3100_s28 = smov %s2551_s30 }
 0x226   : > { %s3101_s29 = smov %s3104_s10  ;;  %s3102_s30 = smov %s3108_s11 }
 0x227   :  { %18 = sbr.rel (!%p16_p11) target bundleno = 3 (0x3), region = 96 }

</bundles_post_ra>
